<compile_context>
chip_gen: v7x
topology: tpu7x:2x2x1
jax: 0.10.0
libtpu: 0.0.40
codegen_flags: <defaults>
</compile_context>

<pallas_src>
import functools
import math

import jax
import jax.numpy as jnp
from jax.experimental import pallas as pl
from jax.experimental.pallas import tpu as pltpu


def _round_up(x, m):
    return (x + m - 1) // m * m


def _direct_conv_kernel(x_ref, w_ref, b_ref, o_ref, *, kh, kw, tile_h, wo):
    """One (tile_h*wo, Cout_pad) output tile of batch image program_id(0).

    x_ref : (1, Hp_pad, Wp, Cin)        bf16  (full padded image, per-batch resident)
    w_ref : (kh, kw, Cin, Cout_pad)     bf16  (fully resident)
    b_ref : (1, Cout_pad)               f32   (fully resident)
    o_ref : (1, tile_h*wo, Cout_pad)    f32
    """
    r = pl.program_id(1)
    row0 = r * tile_h                       # first output row of this block
    cin = x_ref.shape[3]
    cout_pad = o_ref.shape[2]

    acc = jnp.zeros((tile_h * wo, cout_pad), jnp.float32)
    # kh*kw tap loop, fully unrolled; each tap is one MXU matmul with f32 acc.
    for i in range(kh):
        for j in range(kw):
            x_tap = x_ref[0, pl.ds(row0 + i, tile_h), pl.ds(j, wo), :]
            x_tap = x_tap.reshape(tile_h * wo, cin)
            acc = acc + jnp.dot(x_tap, w_ref[i, j],
                                preferred_element_type=jnp.float32)

    # Bias + ReLU fused into the single lane-dense store.
    o_ref[0] = jnp.maximum(acc + b_ref[...], 0.0).astype(o_ref.dtype)


def _vmem_bytes(shape, dtype):
    """Approximate VMEM footprint of one block with (8/16, 128) tiling."""
    itemsize = jnp.dtype(dtype).itemsize
    sublane = 8 * (4 // itemsize) if itemsize < 4 else 8
    shape = tuple(int(d) for d in shape)
    if len(shape) < 2:
        shape = (1,) * (2 - len(shape)) + shape
    outer = 1
    for d in shape[:-2]:
        outer *= d
    s = _round_up(max(shape[-2], 1), sublane)
    l = _round_up(max(shape[-1], 1), 128)
    return outer * s * l * itemsize


def basic_conv2d(x_nchw, weight, bias, stride=(1, 1), padding=(1, 1),
                 tile_h=None):
    """Equivalent of PyTorch BasicConv2d.forward (Conv2d + bias + ReLU).

    x_nchw : (N, Cin, H, W)      float32
    weight : (Cout, Cin, kh, kw) float32 (PyTorch layout)
    bias   : (Cout,)             float32
    returns: (N, Cout, Ho, Wo)   float32
    """
    if isinstance(stride, int):
        stride = (stride, stride)
    if isinstance(padding, int):
        padding = (padding, padding)
    sh, sw = stride
    ph, pw = padding
    assert (sh, sw) == (1, 1), "Pallas direct-conv path implements stride=1"

    n, cin, h, w = x_nchw.shape
    cout, cin_w, kh, kw = weight.shape
    assert cin == cin_w

    ho = h + 2 * ph - kh + 1
    wo = w + 2 * pw - kw + 1
    assert ho > 0 and wo > 0

    # ---- output-row tiling -------------------------------------------------
    if tile_h is None:
        tile_h = max(1, min(ho, 512 // max(wo, 1)))   # ~512 output pixels / tile
    tile_h = max(1, min(tile_h, ho))
    # Keep tile_h*wo a multiple of 8 (clean sublane tiling) or cover all rows.
    while (tile_h * wo) % 8 != 0 and tile_h < ho:
        tile_h += 1
    ho_pad = _round_up(ho, tile_h)
    n_row_blocks = ho_pad // tile_h
    cout_pad = _round_up(cout, 128)

    # ---- XLA pre-pass: cast to bf16 first, then cheap layout/pad -----------
    x_nhwc = jnp.transpose(x_nchw.astype(jnp.bfloat16), (0, 2, 3, 1))
    # Spatial zero pad plus extra bottom rows so the padded row blocks read
    # in-bounds zeros (their outputs are sliced off below).
    x_padded = jnp.pad(
        x_nhwc, ((0, 0), (ph, ph + (ho_pad - ho)), (pw, pw), (0, 0)))
    hp_pad = ho_pad + kh - 1
    wp = wo + kw - 1
    assert x_padded.shape == (n, hp_pad, wp, cin)

    # Weight -> (kh, kw, Cin, Cout_pad) bf16, zero-padded output channels.
    w_mat = jnp.transpose(weight, (2, 3, 1, 0)).astype(jnp.bfloat16)
    w_mat = jnp.pad(w_mat, ((0, 0), (0, 0), (0, 0), (0, cout_pad - cout)))

    b_mat = jnp.pad(bias.astype(jnp.float32).reshape(1, cout),
                    ((0, 0), (0, cout_pad - cout)))

    kernel = functools.partial(_direct_conv_kernel,
                               kh=kh, kw=kw, tile_h=tile_h, wo=wo)

    # VMEM budget: double-buffered image + resident weights/bias +
    # double-buffered output block + f32 accumulator, with headroom.
    needed = (2 * _vmem_bytes((hp_pad, wp, cin), jnp.bfloat16)
              + _vmem_bytes((kh, kw, cin, cout_pad), jnp.bfloat16)
              + _vmem_bytes((1, cout_pad), jnp.float32)
              + 3 * _vmem_bytes((tile_h * wo, cout_pad), jnp.float32))
    vmem_limit = int(min(50 * 1024 * 1024, max(8 * 1024 * 1024, 2 * needed)))

    flops = 2 * n * ho_pad * wo * kh * kw * cin * cout_pad
    bytes_accessed = int(x_padded.size * 2 + w_mat.size * 2 + b_mat.size * 4
                         + n * ho_pad * wo * cout_pad * 4)

    out_flat = pl.pallas_call(
        kernel,
        out_shape=jax.ShapeDtypeStruct((n, ho_pad * wo, cout_pad), jnp.float32),
        grid_spec=pltpu.PrefetchScalarGridSpec(
            num_scalar_prefetch=0,
            grid=(n, n_row_blocks),
            in_specs=[
                # Full padded image per batch item; block index is constant in
                # r, so it is DMA'd from HBM exactly once per batch image.
                pl.BlockSpec((1, hp_pad, wp, cin), lambda b, r: (b, 0, 0, 0)),
                # Weight / bias: constant block index -> fetched once, resident.
                pl.BlockSpec((kh, kw, cin, cout_pad), lambda b, r: (0, 0, 0, 0)),
                pl.BlockSpec((1, cout_pad), lambda b, r: (0, 0)),
            ],
            out_specs=pl.BlockSpec((1, tile_h * wo, cout_pad),
                                   lambda b, r: (b, r, 0)),
        ),
        compiler_params=pltpu.CompilerParams(
            dimension_semantics=("parallel", "parallel"),
            vmem_limit_bytes=vmem_limit,
        ),
        cost_estimate=pl.CostEstimate(flops=flops, transcendentals=0,
                                      bytes_accessed=bytes_accessed),
    )(x_padded, w_mat, b_mat)

    # Drop Ho / Cout padding, back to NHWC, then NCHW at the API boundary only.
    out = out_flat.reshape(n, ho_pad, wo, cout_pad)[:, :ho, :, :cout]
    return jnp.transpose(out, (0, 3, 1, 2))


def init_params(key, in_channels, out_channels, kh, kw):
    """PyTorch Conv2d default init: kaiming_uniform(a=sqrt(5)) -> bound 1/sqrt(fan_in)."""
    wkey, bkey = jax.random.split(key)
    fan_in = in_channels * kh * kw
    bound = 1.0 / math.sqrt(fan_in)
    weight = jax.random.uniform(
        wkey, (out_channels, in_channels, kh, kw),
        minval=-bound, maxval=bound, dtype=jnp.float32)
    bias = jax.random.uniform(
        bkey, (out_channels,), minval=-bound, maxval=bound, dtype=jnp.float32)
    return weight, bias


if __name__ == "__main__":
    key = jax.random.PRNGKey(0)
    xkey, pkey = jax.random.split(key)

    # Small shapes consistent with BasicConv2d(4, 8, kernel_size=3, padding=1)
    N, Cin, H, W = 2, 4, 16, 16
    Cout, KH, KW = 8, 3, 3

    x = jax.random.normal(xkey, (N, Cin, H, W), dtype=jnp.float32)
    weight, bias = init_params(pkey, Cin, Cout, KH, KW)

    out = jax.block_until_ready(basic_conv2d(x, weight, bias,
                                             stride=(1, 1), padding=(1, 1)))

    # Reference with the same bf16-rounded operands (f32 accumulate), so the
    # comparison isolates kernel correctness rather than bf16 quantization.
    x_r = x.astype(jnp.bfloat16).astype(jnp.float32)
    w_r = weight.astype(jnp.bfloat16).astype(jnp.float32)
    ref = jax.lax.conv_general_dilated(
        x_r, w_r, window_strides=(1, 1), padding=((1, 1), (1, 1)),
        dimension_numbers=("NCHW", "OIHW", "NCHW"))
    ref = jnp.maximum(ref + bias.reshape(1, Cout, 1, 1), 0.0)

    assert out.shape == (N, Cout, H, W)
    assert jnp.allclose(out, ref, atol=1e-2, rtol=1e-2), \
        float(jnp.max(jnp.abs(out - ref)))

    print("KERNEL_OK")
</pallas_src>

<mosaic_0001>
module attributes {stable_mosaic.version = 11 : i64} {
  func.func @_direct_conv_kernel(%arg0: i32, %arg1: i32, %arg2: memref<1x18x18x4xbf16, #tpu.memory_space<vmem>>, %arg3: memref<3x3x4x128xbf16, #tpu.memory_space<vmem>>, %arg4: memref<1x128xf32, #tpu.memory_space<vmem>>, %arg5: memref<1x256x128xf32, #tpu.memory_space<vmem>>) attributes {dimension_semantics = [#tpu.dimension_semantics<parallel>, #tpu.dimension_semantics<parallel>], iteration_bounds = array<i64: 2, 1>, scalar_prefetch = 0 : i64, scratch_operands = 0 : i64, tpu.core_type = #tpu.core_type<tc>, window_params = [{transform_indices = @transform_0, window_bounds = array<i64: 1, 18, 18, 4>}, {pipeline_mode = #tpu.pipeline_mode<synchronous>, transform_indices = @transform_1, window_bounds = array<i64: 3, 3, 4, 128>}, {pipeline_mode = #tpu.pipeline_mode<synchronous>, transform_indices = @transform_2, window_bounds = array<i64: 1, 128>}, {transform_indices = @transform_3, window_bounds = array<i64: 1, 256, 128>}]} {
    %c16_i32 = arith.constant 16 : i32
    %0 = arith.muli %arg1, %c16_i32 : i32
    %cst = arith.constant 0.000000e+00 : f32
    %1 = vector.broadcast %cst : f32 to vector<256x128xf32>
    %c0_i32 = arith.constant 0 : i32
    %2 = arith.addi %0, %c0_i32 : i32
    %c0 = arith.constant 0 : index
    %3 = arith.index_cast %2 : i32 to index
    %c0_0 = arith.constant 0 : index
    %c0_1 = arith.constant 0 : index
    %4 = vector.load %arg2[%c0, %3, %c0_0, %c0_1] : memref<1x18x18x4xbf16, #tpu.memory_space<vmem>>, vector<1x16x16x4xbf16>
    %5 = vector.shape_cast %4 : vector<1x16x16x4xbf16> to vector<16x16x4xbf16>
    %6 = vector.shape_cast %5 : vector<16x16x4xbf16> to vector<256x4xbf16>
    %c0_2 = arith.constant 0 : index
    %c0_3 = arith.constant 0 : index
    %c0_4 = arith.constant 0 : index
    %c0_5 = arith.constant 0 : index
    %7 = vector.load %arg3[%c0_2, %c0_3, %c0_4, %c0_5] : memref<3x3x4x128xbf16, #tpu.memory_space<vmem>>, vector<1x1x4x128xbf16>
    %8 = vector.shape_cast %7 : vector<1x1x4x128xbf16> to vector<4x128xbf16>
    %cst_6 = arith.constant dense<0.000000e+00> : vector<256x128xf32>
    %9 = tpu.matmul %6, %8, %cst_6 {dimension_numbers = #tpu.dot_dimension_numbers<[1], [0], [0], [1], [0, 0, 1, 1], [], []>} : vector<256x4xbf16>, vector<4x128xbf16>, vector<256x128xf32> -> vector<256x128xf32>
    %10 = arith.addf %1, %9 : vector<256x128xf32>
    %c0_i32_7 = arith.constant 0 : i32
    %11 = arith.addi %0, %c0_i32_7 : i32
    %c0_8 = arith.constant 0 : index
    %12 = arith.index_cast %11 : i32 to index
    %c1 = arith.constant 1 : index
    %c0_9 = arith.constant 0 : index
    %13 = vector.load %arg2[%c0_8, %12, %c1, %c0_9] : memref<1x18x18x4xbf16, #tpu.memory_space<vmem>>, vector<1x16x16x4xbf16>
    %14 = vector.shape_cast %13 : vector<1x16x16x4xbf16> to vector<16x16x4xbf16>
    %15 = vector.shape_cast %14 : vector<16x16x4xbf16> to vector<256x4xbf16>
    %c0_10 = arith.constant 0 : index
    %c1_11 = arith.constant 1 : index
    %c0_12 = arith.constant 0 : index
    %c0_13 = arith.constant 0 : index
    %16 = vector.load %arg3[%c0_10, %c1_11, %c0_12, %c0_13] : memref<3x3x4x128xbf16, #tpu.memory_space<vmem>>, vector<1x1x4x128xbf16>
    %17 = vector.shape_cast %16 : vector<1x1x4x128xbf16> to vector<4x128xbf16>
    %cst_14 = arith.constant dense<0.000000e+00> : vector<256x128xf32>
    %18 = tpu.matmul %15, %17, %cst_14 {dimension_numbers = #tpu.dot_dimension_numbers<[1], [0], [0], [1], [0, 0, 1, 1], [], []>} : vector<256x4xbf16>, vector<4x128xbf16>, vector<256x128xf32> -> vector<256x128xf32>
    %19 = arith.addf %10, %18 : vector<256x128xf32>
    %c0_i32_15 = arith.constant 0 : i32
    %20 = arith.addi %0, %c0_i32_15 : i32
    %c0_16 = arith.constant 0 : index
    %21 = arith.index_cast %20 : i32 to index
    %c2 = arith.constant 2 : index
    %c0_17 = arith.constant 0 : index
    %22 = vector.load %arg2[%c0_16, %21, %c2, %c0_17] : memref<1x18x18x4xbf16, #tpu.memory_space<vmem>>, vector<1x16x16x4xbf16>
    %23 = vector.shape_cast %22 : vector<1x16x16x4xbf16> to vector<16x16x4xbf16>
    %24 = vector.shape_cast %23 : vector<16x16x4xbf16> to vector<256x4xbf16>
    %c0_18 = arith.constant 0 : index
    %c2_19 = arith.constant 2 : index
    %c0_20 = arith.constant 0 : index
    %c0_21 = arith.constant 0 : index
    %25 = vector.load %arg3[%c0_18, %c2_19, %c0_20, %c0_21] : memref<3x3x4x128xbf16, #tpu.memory_space<vmem>>, vector<1x1x4x128xbf16>
    %26 = vector.shape_cast %25 : vector<1x1x4x128xbf16> to vector<4x128xbf16>
    %cst_22 = arith.constant dense<0.000000e+00> : vector<256x128xf32>
    %27 = tpu.matmul %24, %26, %cst_22 {dimension_numbers = #tpu.dot_dimension_numbers<[1], [0], [0], [1], [0, 0, 1, 1], [], []>} : vector<256x4xbf16>, vector<4x128xbf16>, vector<256x128xf32> -> vector<256x128xf32>
    %28 = arith.addf %19, %27 : vector<256x128xf32>
    %c1_i32 = arith.constant 1 : i32
    %29 = arith.addi %0, %c1_i32 : i32
    %c0_23 = arith.constant 0 : index
    %30 = arith.index_cast %29 : i32 to index
    %c0_24 = arith.constant 0 : index
    %c0_25 = arith.constant 0 : index
    %31 = vector.load %arg2[%c0_23, %30, %c0_24, %c0_25] : memref<1x18x18x4xbf16, #tpu.memory_space<vmem>>, vector<1x16x16x4xbf16>
    %32 = vector.shape_cast %31 : vector<1x16x16x4xbf16> to vector<16x16x4xbf16>
    %33 = vector.shape_cast %32 : vector<16x16x4xbf16> to vector<256x4xbf16>
    %c1_26 = arith.constant 1 : index
    %c0_27 = arith.constant 0 : index
    %c0_28 = arith.constant 0 : index
    %c0_29 = arith.constant 0 : index
    %34 = vector.load %arg3[%c1_26, %c0_27, %c0_28, %c0_29] : memref<3x3x4x128xbf16, #tpu.memory_space<vmem>>, vector<1x1x4x128xbf16>
    %35 = vector.shape_cast %34 : vector<1x1x4x128xbf16> to vector<4x128xbf16>
    %cst_30 = arith.constant dense<0.000000e+00> : vector<256x128xf32>
    %36 = tpu.matmul %33, %35, %cst_30 {dimension_numbers = #tpu.dot_dimension_numbers<[1], [0], [0], [1], [0, 0, 1, 1], [], []>} : vector<256x4xbf16>, vector<4x128xbf16>, vector<256x128xf32> -> vector<256x128xf32>
    %37 = arith.addf %28, %36 : vector<256x128xf32>
    %c1_i32_31 = arith.constant 1 : i32
    %38 = arith.addi %0, %c1_i32_31 : i32
    %c0_32 = arith.constant 0 : index
    %39 = arith.index_cast %38 : i32 to index
    %c1_33 = arith.constant 1 : index
    %c0_34 = arith.constant 0 : index
    %40 = vector.load %arg2[%c0_32, %39, %c1_33, %c0_34] : memref<1x18x18x4xbf16, #tpu.memory_space<vmem>>, vector<1x16x16x4xbf16>
    %41 = vector.shape_cast %40 : vector<1x16x16x4xbf16> to vector<16x16x4xbf16>
    %42 = vector.shape_cast %41 : vector<16x16x4xbf16> to vector<256x4xbf16>
    %c1_35 = arith.constant 1 : index
    %c1_36 = arith.constant 1 : index
    %c0_37 = arith.constant 0 : index
    %c0_38 = arith.constant 0 : index
    %43 = vector.load %arg3[%c1_35, %c1_36, %c0_37, %c0_38] : memref<3x3x4x128xbf16, #tpu.memory_space<vmem>>, vector<1x1x4x128xbf16>
    %44 = vector.shape_cast %43 : vector<1x1x4x128xbf16> to vector<4x128xbf16>
    %cst_39 = arith.constant dense<0.000000e+00> : vector<256x128xf32>
    %45 = tpu.matmul %42, %44, %cst_39 {dimension_numbers = #tpu.dot_dimension_numbers<[1], [0], [0], [1], [0, 0, 1, 1], [], []>} : vector<256x4xbf16>, vector<4x128xbf16>, vector<256x128xf32> -> vector<256x128xf32>
    %46 = arith.addf %37, %45 : vector<256x128xf32>
    %c1_i32_40 = arith.constant 1 : i32
    %47 = arith.addi %0, %c1_i32_40 : i32
    %c0_41 = arith.constant 0 : index
    %48 = arith.index_cast %47 : i32 to index
    %c2_42 = arith.constant 2 : index
    %c0_43 = arith.constant 0 : index
    %49 = vector.load %arg2[%c0_41, %48, %c2_42, %c0_43] : memref<1x18x18x4xbf16, #tpu.memory_space<vmem>>, vector<1x16x16x4xbf16>
    %50 = vector.shape_cast %49 : vector<1x16x16x4xbf16> to vector<16x16x4xbf16>
    %51 = vector.shape_cast %50 : vector<16x16x4xbf16> to vector<256x4xbf16>
    %c1_44 = arith.constant 1 : index
    %c2_45 = arith.constant 2 : index
    %c0_46 = arith.constant 0 : index
    %c0_47 = arith.constant 0 : index
    %52 = vector.load %arg3[%c1_44, %c2_45, %c0_46, %c0_47] : memref<3x3x4x128xbf16, #tpu.memory_space<vmem>>, vector<1x1x4x128xbf16>
    %53 = vector.shape_cast %52 : vector<1x1x4x128xbf16> to vector<4x128xbf16>
    %cst_48 = arith.constant dense<0.000000e+00> : vector<256x128xf32>
    %54 = tpu.matmul %51, %53, %cst_48 {dimension_numbers = #tpu.dot_dimension_numbers<[1], [0], [0], [1], [0, 0, 1, 1], [], []>} : vector<256x4xbf16>, vector<4x128xbf16>, vector<256x128xf32> -> vector<256x128xf32>
    %55 = arith.addf %46, %54 : vector<256x128xf32>
    %c2_i32 = arith.constant 2 : i32
    %56 = arith.addi %0, %c2_i32 : i32
    %c0_49 = arith.constant 0 : index
    %57 = arith.index_cast %56 : i32 to index
    %c0_50 = arith.constant 0 : index
    %c0_51 = arith.constant 0 : index
    %58 = vector.load %arg2[%c0_49, %57, %c0_50, %c0_51] : memref<1x18x18x4xbf16, #tpu.memory_space<vmem>>, vector<1x16x16x4xbf16>
    %59 = vector.shape_cast %58 : vector<1x16x16x4xbf16> to vector<16x16x4xbf16>
    %60 = vector.shape_cast %59 : vector<16x16x4xbf16> to vector<256x4xbf16>
    %c2_52 = arith.constant 2 : index
    %c0_53 = arith.constant 0 : index
    %c0_54 = arith.constant 0 : index
    %c0_55 = arith.constant 0 : index
    %61 = vector.load %arg3[%c2_52, %c0_53, %c0_54, %c0_55] : memref<3x3x4x128xbf16, #tpu.memory_space<vmem>>, vector<1x1x4x128xbf16>
    %62 = vector.shape_cast %61 : vector<1x1x4x128xbf16> to vector<4x128xbf16>
    %cst_56 = arith.constant dense<0.000000e+00> : vector<256x128xf32>
    %63 = tpu.matmul %60, %62, %cst_56 {dimension_numbers = #tpu.dot_dimension_numbers<[1], [0], [0], [1], [0, 0, 1, 1], [], []>} : vector<256x4xbf16>, vector<4x128xbf16>, vector<256x128xf32> -> vector<256x128xf32>
    %64 = arith.addf %55, %63 : vector<256x128xf32>
    %c2_i32_57 = arith.constant 2 : i32
    %65 = arith.addi %0, %c2_i32_57 : i32
    %c0_58 = arith.constant 0 : index
    %66 = arith.index_cast %65 : i32 to index
    %c1_59 = arith.constant 1 : index
    %c0_60 = arith.constant 0 : index
    %67 = vector.load %arg2[%c0_58, %66, %c1_59, %c0_60] : memref<1x18x18x4xbf16, #tpu.memory_space<vmem>>, vector<1x16x16x4xbf16>
    %68 = vector.shape_cast %67 : vector<1x16x16x4xbf16> to vector<16x16x4xbf16>
    %69 = vector.shape_cast %68 : vector<16x16x4xbf16> to vector<256x4xbf16>
    %c2_61 = arith.constant 2 : index
    %c1_62 = arith.constant 1 : index
    %c0_63 = arith.constant 0 : index
    %c0_64 = arith.constant 0 : index
    %70 = vector.load %arg3[%c2_61, %c1_62, %c0_63, %c0_64] : memref<3x3x4x128xbf16, #tpu.memory_space<vmem>>, vector<1x1x4x128xbf16>
    %71 = vector.shape_cast %70 : vector<1x1x4x128xbf16> to vector<4x128xbf16>
    %cst_65 = arith.constant dense<0.000000e+00> : vector<256x128xf32>
    %72 = tpu.matmul %69, %71, %cst_65 {dimension_numbers = #tpu.dot_dimension_numbers<[1], [0], [0], [1], [0, 0, 1, 1], [], []>} : vector<256x4xbf16>, vector<4x128xbf16>, vector<256x128xf32> -> vector<256x128xf32>
    %73 = arith.addf %64, %72 : vector<256x128xf32>
    %c2_i32_66 = arith.constant 2 : i32
    %74 = arith.addi %0, %c2_i32_66 : i32
    %c0_67 = arith.constant 0 : index
    %75 = arith.index_cast %74 : i32 to index
    %c2_68 = arith.constant 2 : index
    %c0_69 = arith.constant 0 : index
    %76 = vector.load %arg2[%c0_67, %75, %c2_68, %c0_69] : memref<1x18x18x4xbf16, #tpu.memory_space<vmem>>, vector<1x16x16x4xbf16>
    %77 = vector.shape_cast %76 : vector<1x16x16x4xbf16> to vector<16x16x4xbf16>
    %78 = vector.shape_cast %77 : vector<16x16x4xbf16> to vector<256x4xbf16>
    %c2_70 = arith.constant 2 : index
    %c2_71 = arith.constant 2 : index
    %c0_72 = arith.constant 0 : index
    %c0_73 = arith.constant 0 : index
    %79 = vector.load %arg3[%c2_70, %c2_71, %c0_72, %c0_73] : memref<3x3x4x128xbf16, #tpu.memory_space<vmem>>, vector<1x1x4x128xbf16>
    %80 = vector.shape_cast %79 : vector<1x1x4x128xbf16> to vector<4x128xbf16>
    %cst_74 = arith.constant dense<0.000000e+00> : vector<256x128xf32>
    %81 = tpu.matmul %78, %80, %cst_74 {dimension_numbers = #tpu.dot_dimension_numbers<[1], [0], [0], [1], [0, 0, 1, 1], [], []>} : vector<256x4xbf16>, vector<4x128xbf16>, vector<256x128xf32> -> vector<256x128xf32>
    %82 = arith.addf %73, %81 : vector<256x128xf32>
    %c0_75 = arith.constant 0 : index
    %c0_76 = arith.constant 0 : index
    %83 = vector.load %arg4[%c0_75, %c0_76] : memref<1x128xf32, #tpu.memory_space<vmem>>, vector<1x128xf32>
    %84 = vector.broadcast %83 : vector<1x128xf32> to vector<256x128xf32>
    %85 = arith.addf %82, %84 : vector<256x128xf32>
    %cst_77 = arith.constant 0.000000e+00 : f32
    %86 = vector.broadcast %cst_77 : f32 to vector<256x128xf32>
    %87 = arith.maximumf %85, %86 : vector<256x128xf32>
    %c0_78 = arith.constant 0 : index
    %c0_79 = arith.constant 0 : index
    %c0_80 = arith.constant 0 : index
    %88 = vector.load %arg5[%c0_78, %c0_79, %c0_80] : memref<1x256x128xf32, #tpu.memory_space<vmem>>, vector<1x256x128xf32>
    %89 = vector.shape_cast %88 : vector<1x256x128xf32> to vector<256x128xf32>
    %90 = vector.shape_cast %87 : vector<256x128xf32> to vector<1x256x128xf32>
    tpu.vector_store %arg5[%c0_78, %c0_79, %c0_80], %90 {strides = array<i32>} : memref<1x256x128xf32, #tpu.memory_space<vmem>>, vector<1x256x128xf32>,
    return
  }
  func.func @transform_0(%arg0: i32, %arg1: i32) -> (i32, i32, i32, i32) {
    %c0_i32 = arith.constant 0 : i32
    %c0_i32_0 = arith.constant 0 : i32
    %c0_i32_1 = arith.constant 0 : i32
    %c0_i32_2 = arith.constant 0 : i32
    return %arg0, %c0_i32, %c0_i32_0, %c0_i32_1 : i32, i32, i32, i32
  }
  func.func @transform_1(%arg0: i32, %arg1: i32) -> (i32, i32, i32, i32) {
    %c0_i32 = arith.constant 0 : i32
    %c0_i32_0 = arith.constant 0 : i32
    %c0_i32_1 = arith.constant 0 : i32
    %c0_i32_2 = arith.constant 0 : i32
    %c0_i32_3 = arith.constant 0 : i32
    return %c0_i32, %c0_i32_0, %c0_i32_1, %c0_i32_2 : i32, i32, i32, i32
  }
  func.func @transform_2(%arg0: i32, %arg1: i32) -> (i32, i32) {
    %c0_i32 = arith.constant 0 : i32
    %c0_i32_0 = arith.constant 0 : i32
    %c0_i32_1 = arith.constant 0 : i32
    return %c0_i32, %c0_i32_0 : i32, i32
  }
  func.func @transform_3(%arg0: i32, %arg1: i32) -> (i32, i32, i32) {
    %c0_i32 = arith.constant 0 : i32
    %c0_i32_0 = arith.constant 0 : i32
    return %arg0, %arg1, %c0_i32 : i32, i32, i32
  }
}

</mosaic_0001>

<bundles_post_ra>
// kernel: tpu_custom_call.1
= control target key start
LH: loop header
LB: loop body
LE: loop exit
PB: predicated region body
PF: predicated region fallthrough
CT: control target
= control target key end

     0   :  { %8 = vsyncpa [#allocation3], 0  ;;  %s8399_s0 = inlined_call_operand.vmem [shape: bf16[2,18,18,4], index: 0, kind: input, shape index: {}]   ;;  %s8400_s1 = inlined_call_operand.vmem [shape: bf16[3,3,4,128], index: 1, kind: input, shape index: {}]   ;;  %s8401_s2 = inlined_call_operand.vmem [shape: f32[1,128], index: 2, kind: input, shape index: {}]   ;;  %s8402_s3 = inlined_call_operand.hbm [shape: f32[2,256,128], index: 3, kind: output, shape index: {}]  }
   0x1   :  { %10 = vsyncpa [#allocation3 + $0x1], 0  ;;  %s6499_s12 = smov 0   ;;  %s6501_s13 = smov 0  }
   0x2   :  { %s6503_s14 = smov 0   ;;  %s6505_s15 = smov 0  }
   0x3   :  { %s6507_s16 = smov 0   ;;  %s6509_s17 = smov 0  }
   0x4 LB: > { %s4956_s18 = sadd.s32 4294967295, %s6474_s17   ;;  %s4957_s19 = sadd.s32 4294967294, %s6474_s17   ;;  %s6474_s17 = sphi %s6509_s17, %s16_s17   ;;  %s6470_s16 = sphi %s6507_s16, %s8476_s16   ;;  %s6466_s15 = sphi %s6505_s15, %s8475_s15   ;;  %s6462_s14 = sphi %s6503_s14, %s8474_s14   ;;  %s6458_s13 = sphi %s6501_s13, %s8473_s13   ;;  %s6454_s12 = sphi %s6499_s12, %s8472_s12  }
   0x5   : > { %s28_s20 = sadd.s32 1, %s6470_s16  ;;  %s105_s21 = sadd.s32 1, %s6462_s14 }
   0x6   : > { %p30_p0 = scmp.ge.s32.totalorder %s28_s20, 2  ;;  %p115_p1 = scmp.ne.s32.totalorder %s6462_s14, %s6458_s13 }
   0x7   : > { %p116_p2 = scmp.eq.s32.totalorder %s4956_s18, 1  ;;  %p121_p3 = scmp.ne.s32.totalorder %s6458_s13, %s6454_s12 }
   0x8   : > { %s8478_s20 = smov (%p30_p0, %s28_s20), 0  ;;  %p122_p5 = scmp.eq.s32.totalorder %s4957_s19, 1 }
   0x9   : > { %p6539_p4 = por %p116_p2, %p115_p1  ;;  %s100_s23 = ssub.s32 %s6470_s16, %s8478_s20 }
   0xa   : > { %p4960_p6 = scmp.ge.s32.totalorder %s6474_s17, 1  ;;  %p103_p7 = scmp.eq.s32.totalorder %s100_s23, 0 }
   0xb   : > { %p6546_p8 = por %p122_p5, %p121_p3  ;;  %p154_p9 = scmp.lt.s32.totalorder %s6474_s17, 3 }
   0xc   : > { %s6552_s25 = scalar_select %p103_p7, %s6462_s14, %s105_s21  }
   0xd   : > { %p155_p10 = pnand %p4960_p6, %p154_p9 }
   0xf   : > { %158 = sbr.rel (%p155_p10) target bundleno = 611 (0x263), region = 32 }
  0x16   : > { %v4963_v0 = vld [vmem:[%s8400_s1 + $0x2] sm:$0x3]  ;;  %vm724_vm0 = vcmask 1041408   ;;  %v5190_v1 = vld [vmem:[%s8400_s1 + $0x8] sm:$0x3]  ;;  %p178_p11 = scmp.lt.s32.totalorder %s6466_s15, 1 }
  0x17   : > { %6223 = vmatprep.subr.msk.bf16.mxu1 %vm724_vm0, %v4963_v0  ;;  %6227 = vmatprep.subr.msk.bf16.mxu0 %vm724_vm0, %v5190_v1  ;;  %v726_v2 = vsel %vm724_vm0, %v4963_v0, 0  ;;  %v6565_v3 = vsel %vm724_vm0, %v5190_v1, 0  ;;  %v221_v4 = vld [vmem:[%s8400_s1] sm:$0x3]  ;;  %v5255_v5 = vld [vmem:[%s8400_s1 + $0xa] sm:$0x3] }
  0x18   : > { %8418 = vst [vmem:[#allocation5_spill] sm:$0xff] %v6565_v3  ;;  %5660 = vmatpush3.bf16.msra.mxu1 %v726_v2  ;;  %5796 = vmatpush3.bf16.msra.mxu0 %v6565_v3  ;;  %s179_s30 = scalar_select %p178_p11, %s6466_s15, 1  ;;  %vm238_vm1 = vsmask.f32 3328  ;;  %vm239_vm2 = vsmask.f32 7440 }
  0x19   : > { %6224 = vmatprep.subr.msk.bf16.mxu1 %vm724_vm0, %v221_v4  ;;  %6229 = vmatprep.subr.msk.bf16.mxu0 %vm724_vm0, %v5255_v5  ;;  %vm675_vm3 = vcmask 31744   ;;  %v6593_v17 = vsel %vm724_vm0, %v221_v4, 0  ;;  %v6599_v26 = vld [vmem:[%s8400_s1 + $0xc] sm:$0x3]  ;;  %vm6606_vm4 = vmor %vm238_vm1, %vm239_vm2  ;;  %v6612_v37 = vsel %vm724_vm0, %v5255_v5, 0  ;;  %vm1229_vm5 = vcmask 1042432  }
  0x1a   : > { %s6233_s8 = smul.u32 216, %s179_s30  ;;  %v6616_v41 = vsel %vm724_vm0, %v6599_v26, 0  ;;  %vm1230_vm6 = vcmask 1046532   ;;  %s175_s9 = sand.u32 1, %s6458_s13  }
  0x1b   : > { %vm6832_vm7 = vmor %vm1229_vm5, %vm1230_vm6  ;;  %s4961_s18 = sshll.u32 %s175_s9, 8  ;;  %s5505_s21 = sshll.u32 %s6466_s15, 12 }
  0x1c   : > { %s6580_s11 = scalar_lea.vmem %s8399_s0, %s6233_s8  ;;  %s8276_s19 = scalar_lea.vmem [#allocation2], %s4961_s18 }
  0x1d   : > { %v189_v6 = vld [vmem:[%s6580_s11] sm:$0xf]  ;;  %v190_v7 = vld [vmem:[%s6580_s11 + $0x4] sm:$0xf]  ;;  %v222_v8 = vld [vmem:[%s6580_s11 + $0x8] sm:$0x1]  ;;  %s8344_s28 = scalar_lea.hbm %s8402_s3, %s5505_s21 }
  0x1e   : > { %v242_v9 = vshrl.u32 %v189_v6, 16  ;;  %v245_v10 = vshll.u32 %v189_v6, 16  ;;  %v251_v11 = vshll.u32 %v190_v7, 16  ;;  %v255_v12 = vshrl.u32 %v190_v7, 16  ;;  %v5142_v13 = vld [vmem:[%s6580_s11 + $0xc] sm:$0xf] }
  0x1f   : > { %v261_v14 = vshll.u32 %v222_v8, 16  ;;  %v6587_v15 = vld [vmem:[%s6580_s11 + $0x10] sm:$0xf]  ;;  %v6590_v16 = vld [vmem:[%s6580_s11 + $0x14] sm:$0x1]  ;;  %v2049_v23 = vshrl.u32 %v5142_v13, 16 }
  0x20   : > { %v244_v18 = vrot.slane %v242_v9, 4  ;;  %v247_v19 = vrot.slane %v245_v10, 5  ;;  %v253_v20 = vrot.slane %v251_v11, 5  ;;  %v257_v21 = vrot.slane %v255_v12, 4  ;;  %v191_v31 = vld [vmem:[%s6580_s11 + $0xc] sm:$0xf] }
  0x21   : > { %v263_v22 = vrot.slane %v261_v14, 5  ;;  %v2052_v24 = vshll.u32 %v5142_v13, 16  ;;  %v2058_v25 = vshll.u32 %v6587_v15, 16  ;;  %v2062_v29 = vshrl.u32 %v6587_v15, 16  ;;  %v192_v36 = vld [vmem:[%s6580_s11 + $0x10] sm:$0xf] }
  0x22   : > { %v248_v27 = vor.u32 %v247_v19, %v244_v18  ;;  %v258_v28 = vor.u32 %v257_v21, %v253_v20  ;;  %v2068_v30 = vshll.u32 %v6590_v16, 16  ;;  %v2051_v33 = vrot.slane %v2049_v23, 4  ;;  %v223_v44 = vld [vmem:[%s6580_s11 + $0x14] sm:$0x1]  ;;  %v5145_v55 = vld [vmem:[%s6580_s11 + $0x18] sm:$0xf] }
  0x23   : > { %v2054_v34 = vrot.slane %v2052_v24, 5  ;;  %v2060_v35 = vrot.slane %v2058_v25, 5  ;;  %v2064_v40 = vrot.slane %v2062_v29, 4  ;;  %v266_v45 = vshrl.u32 %v191_v31, 16  ;;  %v6625_v60 = vld [vmem:[%s6580_s11 + $0x1c] sm:$0xf] }
  0x24   : > { %v249_v38 = vrot.slane %v248_v27, 4  ;;  %v259_v39 = vrot.slane %v258_v28, 4  ;;  %v2070_v43 = vrot.slane %v2068_v30, 5  ;;  %v269_v46 = vshll.u32 %v191_v31, 16  ;;  %v6633_v1 = vld [vmem:[%s6580_s11 + $0x20] sm:$0x1] }
  0x25   : > { %v2055_v42 = vor.u32 %v2054_v34, %v2051_v33  ;;  %v2065_v49 = vor.u32 %v2064_v40, %v2060_v35  ;;  %v275_v50 = vshll.u32 %v192_v36, 16  ;;  %v268_v53 = vrot.slane %v266_v45, 4  ;;  %v193_v18 = vld [vmem:[%s6580_s11 + $0x18] sm:$0xf]  ;;  %v194_v23 = vld [vmem:[%s6580_s11 + $0x1c] sm:$0xf] }
  0x26   : > { %v254_v47 = vsel %vm6606_vm4, %v249_v38, %v253_v20  ;;  %v264_v48 = vsel %vm6606_vm4, %v259_v39, %v263_v22  ;;  %v271_v54 = vrot.slane %v269_v46, 5  ;;  %v279_v58 = vshrl.u32 %v192_v36, 16  ;;  %v224_v31 = vld [vmem:[%s6580_s11 + $0x20] sm:$0x1]  ;;  %v5148_v40 = vld [vmem:[%s6580_s11 + $0x24] sm:$0xf] }
  0x27   : > { %v4964_v51 = vcombine.low %v254_v47, %v264_v48  ;;  %v2056_v52 = vrot.slane %v2055_v42, 4  ;;  %v2066_v56 = vrot.slane %v2065_v49, 4  ;;  %v277_v57 = vrot.slane %v275_v50, 5  ;;  %v6656_v46 = vld [vmem:[%s6580_s11 + $0x28] sm:$0xf]  ;;  %s4873_s23 = sshll.u32 %s8276_s19, 4  ;;  %s8346_s23 = int_to_ptr.vmem [resolvable:$true] %s4873_s23 }
  0x28   : > { %v285_v59 = vshll.u32 %v223_v44, 16  ;;  %v2792_v62 = vrot.slane %v6587_v15, 5  ;;  %v2795_v63 = vrot.slane %v6590_v16, 5  ;;  %v272_v0 = vor.u32 %v271_v54, %v268_v53  ;;  %v6665_v54 = vld [vmem:[%s6580_s11 + $0x2c] sm:$0x1]  ;;  %s8353_s15 = scalar_lea.sflag [#allocation3], %s175_s9 }
  0x29   : > { %5661 = vmatprep.mubr.msk.bf16.mxu1 %vm675_vm3, %v4964_v51  ;;  %v2061_v61 = vsel %vm6606_vm4, %v2056_v52, %v2060_v35  ;;  %v2071_v2 = vsel %vm6606_vm4, %v2066_v56, %v2070_v43  ;;  %v281_v4 = vrot.slane %v279_v58, 4  ;;  %v2073_v6 = vshrl.u32 %v5145_v55, 16  ;;  %v5044_v51 = vld [vmem:[%s8400_s1 + $0x4] sm:$0x3]  ;;  %v6865_v16 = vld [vmem:[%s6580_s11 + $0x7c] sm:$0xf] }
  0x2a   : > { %v287_v5 = vrot.slane %v285_v59, 5  ;;  %v5191_v7 = vcombine.low %v2061_v61, %v2071_v2  ;;  %v273_v8 = vrot.slane %v272_v0, 4  ;;  %v2076_v9 = vshll.u32 %v5145_v55, 16  ;;  %v195_v0 = vld [vmem:[%s6580_s11 + $0x24] sm:$0xf]  ;;  %s6396_s29 = scalar_lea.vmem %s8346_s23, 4096 }
  0x2b   : > { %v2082_v10 = vshll.u32 %v6625_v60, 16  ;;  %v282_v11 = vor.u32 %v281_v4, %v277_v57  ;;  %v2075_v12 = vrot.slane %v2073_v6, 4  ;;  %v2086_v13 = vshrl.u32 %v6625_v60, 16  ;;  %p6397_p12 = scmp.ne.s32.totalorder %s8346_s23, %s6396_s29  ;;  %s6476_s30 = smov [#allocation2]  }
  0x2c   : > { %v2092_v14 = vshll.u32 %v6633_v1, 16  ;;  %5797 = vmatprep.mubr.msk.bf16.mxu0 %vm675_vm3, %v5191_v7  ;;  %v278_v19 = vsel %vm6606_vm4, %v273_v8, %v277_v57  ;;  %v2078_v20 = vrot.slane %v2076_v9, 5  ;;  %v2799_v22 = vrot.slane %v6625_v60, 5  ;;  %v196_v7 = vld [vmem:[%s6580_s11 + $0x28] sm:$0xf]  ;;  %s6400_s4 = sshll.u32 %s6476_s30, 4  ;;  %s6401_s4 = int_to_ptr.vmem [resolvable:$false] %s6400_s4 }
  0x2d   : > { %v2084_v21 = vrot.slane %v2082_v10, 5  ;;  %v283_v24 = vrot.slane %v282_v11, 4  ;;  %v2088_v25 = vrot.slane %v2086_v13, 4  ;;  %v2802_v28 = vrot.slane %v6633_v1, 5  ;;  %v225_v13 = vld [vmem:[%s6580_s11 + $0x2c] sm:$0x1]  ;;  %p6398_p13 = pnand %p6397_p12, %p6539_p4  ;;  %p6403_p1 = scmp.lt.s32.totalorder %s8346_s23, %s6401_s4 }
  0x2e   : > { %v2094_v27 = vrot.slane %v2092_v14, 5  ;;  %v2079_v29 = vor.u32 %v2078_v20, %v2075_v12  ;;  %v6649_v30 = vrot.slane %v2799_v22, 4  ;;  %v290_v33 = vshrl.u32 %v193_v18, 16  ;;  %s6402_s5 = scalar_lea.vmem %s6401_s4, 8192 }
  0x2f   : > { %v293_v34 = vshll.u32 %v193_v18, 16  ;;  %v288_v35 = vsel %vm6606_vm4, %v283_v24, %v287_v5  ;;  %v2089_v36 = vor.u32 %v2088_v25, %v2084_v21  ;;  %v299_v38 = vshll.u32 %v194_v23, 16  ;;  %v5151_v24 = vld [vmem:[%s6580_s11 + $0x30] sm:$0xf]  ;;  %p6399_p0 = pneg %p6398_p13  ;;  %p6404_p2 = scmp.lt.s32.totalorder %s6402_s5, %s6396_s29 }
  0x30   : > { %v303_v39 = vshrl.u32 %v194_v23, 16  ;;  %v4965_v42 = vcombine.low %v278_v19, %v288_v35  ;;  %v2080_v43 = vrot.slane %v2079_v29, 4  ;;  %v292_v44 = vrot.slane %v290_v33, 4  ;;  %v6685_v33 = vld [vmem:[%s6580_s11 + $0x34] sm:$0xf] }
  0x31   : > { %v295_v45 = vrot.slane %v293_v34, 5  ;;  %v2090_v47 = vrot.slane %v2089_v36, 4  ;;  %v301_v48 = vrot.slane %v299_v38, 5  ;;  %v309_v50 = vshll.u32 %v224_v31, 16  ;;  %p6405_p3 = por %p6404_p2, %p6403_p1 }
  0x32   : > { %v305_v49 = vrot.slane %v303_v39, 4  ;;  %5662 = vmatmul.mubr.msk.bf16.vlgmr.msra.gmra.mrb[0].mxu1 %vm675_vm3, %v4965_v42  ;;  %v2085_v52 = vsel %vm6606_vm4, %v2080_v43, %v2084_v21  ;;  %v2097_v55 = vshrl.u32 %v5148_v40, 16  ;;  %v2100_v56 = vshll.u32 %v5148_v40, 16  ;;  %v6693_v40 = vld [vmem:[%s6580_s11 + $0x38] sm:$0x1] }
  0x33   : > { %v296_v53 = vor.u32 %v295_v45, %v292_v44  ;;  %5694 = vmatpush3.bf16.msra.mxu1 %v6593_v17  ;;  %v2095_v57 = vsel %vm6606_vm4, %v2090_v47, %v2094_v27  ;;  %v311_v59 = vrot.slane %v309_v50, 5  ;;  %v2106_v61 = vshll.u32 %v6656_v46, 16  ;;  %p6406_p5 = pnand %p6405_p3, %p6399_p0 }
  0x34   : > { %v306_v58 = vor.u32 %v305_v49, %v301_v48  ;;  %v5192_v2 = vcombine.low %v2085_v52, %v2095_v57  ;;  %v2099_v5 = vrot.slane %v2097_v55, 4  ;;  %v2102_v6 = vrot.slane %v2100_v56, 5  ;;  %6225 = vmatprep.subr.msk.bf16.mxu1 %vm724_vm0, %v5044_v51  ;;  %v197_v52 = vld [vmem:[%s6580_s11 + $0x30] sm:$0xf] }
  0x35   : > { %v297_v4 = vrot.slane %v296_v53, 4  ;;  %v2108_v9 = vrot.slane %v2106_v61, 5  ;;  %v2110_v17 = vshrl.u32 %v6656_v46, 16  ;;  %v2116_v10 = vshll.u32 %v6665_v54, 16 }
  0x36   : > { %v307_v8 = vrot.slane %v306_v58, 4  ;;  %5798 = vmatmul.mubr.msk.bf16.vlgmr.msra.gmra.mrb[0].mxu0 %vm675_vm3, %v5192_v2  ;;  %v2103_v12 = vor.u32 %v2102_v6, %v2099_v5  ;;  %v314_v14 = vshrl.u32 %v195_v0, 16  ;;  %v317_v18 = vshll.u32 %v195_v0, 16  ;;  %v198_v58 = vld [vmem:[%s6580_s11 + $0x34] sm:$0xf] }
  0x37   : > { %v302_v11 = vsel %vm6606_vm4, %v297_v4, %v301_v48  ;;  %5830 = vmatpush3.bf16.msra.mxu0 %v6612_v37  ;;  %v2112_v20 = vrot.slane %v2110_v17, 4  ;;  %v2118_v21 = vrot.slane %v2116_v10, 5  ;;  %v323_v23 = vshll.u32 %v196_v7, 16  ;;  %v226_v4 = vld [vmem:[%s6580_s11 + $0x38] sm:$0x1] }
  0x38   : > { %v312_v19 = vsel %vm6606_vm4, %v307_v8, %v311_v59  ;;  %v2104_v27 = vrot.slane %v2103_v12, 4  ;;  %v316_v29 = vrot.slane %v314_v14, 4  ;;  %v319_v31 = vrot.slane %v317_v18, 5  ;;  %6230 = vmatprep.subr.msk.bf16.mxu0 %vm724_vm0, %v6599_v26  ;;  %v5154_v12 = vld [vmem:[%s6580_s11 + $0x3c] sm:$0xf] }
  0x39   : > { %v4966_v25 = vcombine.low %v302_v11, %v312_v19  ;;  %v2113_v34 = vor.u32 %v2112_v20, %v2108_v9  ;;  %v325_v35 = vrot.slane %v323_v23, 5  ;;  %v327_v37 = vshrl.u32 %v196_v7, 16  ;;  %v6710_v20 = vld [vmem:[%s6580_s11 + $0x40] sm:$0xf] }
  0x3a   : > { %v333_v36 = vshll.u32 %v225_v13, 16  ;;  %v2109_v38 = vsel %vm6606_vm4, %v2104_v27, %v2108_v9  ;;  %v320_v39 = vor.u32 %v319_v31, %v316_v29  ;;  %v2121_v42 = vshrl.u32 %v5151_v24, 16 }
  0x3b   : > { %5665 = vmatprep.mubr.msk.bf16.mxu1 %vm675_vm3, %v4966_v25  ;;  %v2124_v43 = vshll.u32 %v5151_v24, 16  ;;  %v2114_v44 = vrot.slane %v2113_v34, 4  ;;  %v329_v45 = vrot.slane %v327_v37, 4  ;;  %v2130_v26 = vshll.u32 %v6685_v33, 16  ;;  %v6715_v34 = vld [vmem:[%s6580_s11 + $0x44] sm:$0x1] }
  0x3c   : > { %v335_v47 = vrot.slane %v333_v36, 5  ;;  %v321_v48 = vrot.slane %v320_v39, 4  ;;  %v2123_v49 = vrot.slane %v2121_v42, 4  ;;  %v2134_v51 = vshrl.u32 %v6685_v33, 16  ;;  %v199_v42 = vld [vmem:[%s6580_s11 + $0x3c] sm:$0xf] }
  0x3d   : > { %v2126_v50 = vrot.slane %v2124_v43, 5  ;;  %v2119_v53 = vsel %vm6606_vm4, %v2114_v44, %v2118_v21  ;;  %v330_v55 = vor.u32 %v329_v45, %v325_v35  ;;  %v2132_v56 = vrot.slane %v2130_v26, 5  ;;  %v200_v26 = vld [vmem:[%s6580_s11 + $0x40] sm:$0xf] }
  0x3e   : > { %v2140_v57 = vshll.u32 %v6693_v40, 16  ;;  %v5193_v59 = vcombine.low %v2109_v38, %v2119_v53  ;;  %v326_v61 = vsel %vm6606_vm4, %v321_v48, %v325_v35  ;;  %v2136_v2 = vrot.slane %v2134_v51, 4 }
  0x3f   : > { %v2127_v0 = vor.u32 %v2126_v50, %v2123_v49  ;;  %v331_v5 = vrot.slane %v330_v55, 4  ;;  %v338_v7 = vshrl.u32 %v197_v52, 16  ;;  %v341_v8 = vshll.u32 %v197_v52, 16 }
  0x40   : > { %v2142_v6 = vrot.slane %v2140_v57, 5  ;;  %5801 = vmatprep.mubr.msk.bf16.mxu0 %vm675_vm3, %v5193_v59  ;;  %v2137_v17 = vor.u32 %v2136_v2, %v2132_v56  ;;  %v347_v10 = vshll.u32 %v198_v58, 16  ;;  %v351_v11 = vshrl.u32 %v198_v58, 16  ;;  %v5157_v2 = vld [vmem:[%s6580_s11 + $0x48] sm:$0xf] }
  0x41   : > { %v2128_v9 = vrot.slane %v2127_v0, 4  ;;  %v336_v13 = vsel %vm6606_vm4, %v331_v5, %v335_v47  ;;  %v340_v14 = vrot.slane %v338_v7, 4  ;;  %v343_v18 = vrot.slane %v341_v8, 5  ;;  %v6733_v8 = vld [vmem:[%s6580_s11 + $0x4c] sm:$0xf] }
  0x42   : > { %v357_v19 = vshll.u32 %v226_v4, 16  ;;  %v4967_v21 = vcombine.low %v326_v61, %v336_v13  ;;  %v2138_v24 = vrot.slane %v2137_v17, 4  ;;  %v349_v25 = vrot.slane %v347_v10, 5  ;;  %v227_v61 = vld [vmem:[%s6580_s11 + $0x44] sm:$0x1] }
  0x43   : > { %v2133_v23 = vsel %vm6606_vm4, %v2128_v9, %v2132_v56  ;;  %v344_v27 = vor.u32 %v343_v18, %v340_v14  ;;  %v353_v29 = vrot.slane %v351_v11, 4  ;;  %v2145_v35 = vshrl.u32 %v5154_v12, 16 }
  0x44   : > { %v359_v31 = vrot.slane %v357_v19, 5  ;;  %5666 = vmatmul.mubr.msk.bf16.gmra.mrb[4].mxu1 %vm675_vm3, %v4967_v21  ;;  %v2143_v37 = vsel %vm6606_vm4, %v2138_v24, %v2142_v6  ;;  %v2148_v36 = vshll.u32 %v5154_v12, 16  ;;  %v2154_v38 = vshll.u32 %v6710_v20, 16 }
  0x45   : > { %v2158_v39 = vshrl.u32 %v6710_v20, 16  ;;  %v5194_v43 = vcombine.low %v2133_v23, %v2143_v37  ;;  %v345_v44 = vrot.slane %v344_v27, 4  ;;  %v354_v45 = vor.u32 %v353_v29, %v349_v25  ;;  %v6741_v23 = vld [vmem:[%s6580_s11 + $0x50] sm:$0x1]  ;;  %v6745_v27 = vld [vmem:[%s6580_s11 + $0x48] sm:$0xf] }
  0x46   : > { %v2147_v47 = vrot.slane %v2145_v35, 4  ;;  %v2150_v48 = vrot.slane %v2148_v36, 5  ;;  %v2156_v49 = vrot.slane %v2154_v38, 5  ;;  %v2164_v51 = vshll.u32 %v6715_v34, 16  ;;  %v6748_v36 = vld [vmem:[%s6580_s11 + $0x4c] sm:$0xf] }
  0x47   : > { %v2160_v50 = vrot.slane %v2158_v39, 4  ;;  %5802 = vmatmul.mubr.msk.bf16.gmra.mrb[4].mxu0 %vm675_vm3, %v5194_v43  ;;  %v350_v52 = vsel %vm6606_vm4, %v345_v44, %v349_v25  ;;  %v355_v53 = vrot.slane %v354_v45, 4  ;;  %v362_v55 = vshrl.u32 %v199_v42, 16 }
  0x48   : > { %v365_v56 = vshll.u32 %v199_v42, 16  ;;  %v2151_v57 = vor.u32 %v2150_v48, %v2147_v47  ;;  %v2166_v59 = vrot.slane %v2164_v51, 5  ;;  %v371_v0 = vshll.u32 %v200_v26, 16 }
  0x49   : > { %v2161_v58 = vor.u32 %v2160_v50, %v2156_v49  ;;  %v360_v4 = vsel %vm6606_vm4, %v355_v53, %v359_v31  ;;  %v364_v5 = vrot.slane %v362_v55, 4  ;;  %v375_v7 = vshrl.u32 %v200_v26, 16  ;;  %v228_v26 = vld [vmem:[%s6580_s11 + $0x50] sm:$0x1]  ;;  %v5160_v53 = vld [vmem:[%s6580_s11 + $0x54] sm:$0xf] }
  0x4a   : > { %v367_v6 = vrot.slane %v365_v56, 5  ;;  %v4968_v9 = vcombine.low %v350_v52, %v360_v4  ;;  %v2152_v17 = vrot.slane %v2151_v57, 4  ;;  %v373_v11 = vrot.slane %v371_v0, 5  ;;  %v6764_v4 = vld [vmem:[%s6580_s11 + $0x58] sm:$0xf] }
  0x4b   : > { %v2162_v10 = vrot.slane %v2161_v58, 4  ;;  %v377_v13 = vrot.slane %v375_v7, 4  ;;  %v381_v14 = vshll.u32 %v227_v61, 16  ;;  %v2169_v18 = vshrl.u32 %v5157_v2, 16 }
  0x4c   : > { %v368_v12 = vor.u32 %v367_v6, %v364_v5  ;;  %5669 = vmatprep.mubr.msk.bf16.mxu1 %vm675_vm3, %v4968_v9  ;;  %v2157_v19 = vsel %vm6606_vm4, %v2152_v17, %v2156_v49  ;;  %v2172_v24 = vshll.u32 %v5157_v2, 16  ;;  %v2178_v25 = vshll.u32 %v6733_v8, 16 }
  0x4d   : > { %v2167_v21 = vsel %vm6606_vm4, %v2162_v10, %v2166_v59  ;;  %v378_v35 = vor.u32 %v377_v13, %v373_v11  ;;  %v383_v37 = vrot.slane %v381_v14, 5  ;;  %v2171_v38 = vrot.slane %v2169_v18, 4 }
  0x4e   : > { %v5195_v29 = vcombine.low %v2157_v19, %v2167_v21  ;;  %v369_v31 = vrot.slane %v368_v12, 4  ;;  %v2174_v39 = vrot.slane %v2172_v24, 5  ;;  %v2180_v42 = vrot.slane %v2178_v25, 5  ;;  %v6770_v12 = vld [vmem:[%s6580_s11 + $0x5c] sm:$0x1] }
  0x4f   : > { %v2182_v43 = vshrl.u32 %v6733_v8, 16  ;;  %v379_v45 = vrot.slane %v378_v35, 4  ;;  %v2188_v47 = vshll.u32 %v6741_v23, 16  ;;  %v386_v48 = vshrl.u32 %v6745_v27, 16  ;;  %v6774_v24 = vld [vmem:[%s6580_s11 + $0x54] sm:$0xf] }
  0x50   : > { %5805 = vmatprep.mubr.msk.bf16.mxu0 %vm675_vm3, %v5195_v29  ;;  %v374_v44 = vsel %vm6606_vm4, %v369_v31, %v373_v11  ;;  %v2175_v49 = vor.u32 %v2174_v39, %v2171_v38  ;;  %v389_v51 = vshll.u32 %v6745_v27, 16  ;;  %v395_v52 = vshll.u32 %v6748_v36, 16 }
  0x51   : > { %v2184_v50 = vrot.slane %v2182_v43, 4  ;;  %v384_v55 = vsel %vm6606_vm4, %v379_v45, %v383_v37  ;;  %v2190_v56 = vrot.slane %v2188_v47, 5  ;;  %v388_v57 = vrot.slane %v386_v48, 4  ;;  %v6780_v37 = vld [vmem:[%s6580_s11 + $0x58] sm:$0xf] }
  0x52   : > { %v399_v58 = vshrl.u32 %v6748_v36, 16  ;;  %v4969_v59 = vcombine.low %v374_v44, %v384_v55  ;;  %v2176_v61 = vrot.slane %v2175_v49, 4  ;;  %v391_v2 = vrot.slane %v389_v51, 5 }
  0x53   : > { %v2185_v0 = vor.u32 %v2184_v50, %v2180_v42  ;;  %v397_v5 = vrot.slane %v395_v52, 5  ;;  %v405_v7 = vshll.u32 %v228_v26, 16  ;;  %v2193_v9 = vshrl.u32 %v5160_v53, 16  ;;  %v229_v26 = vld [vmem:[%s6580_s11 + $0x5c] sm:$0x1] }
  0x54   : > { %v401_v6 = vrot.slane %v399_v58, 4  ;;  %5670 = vmatmul.mubr.msk.bf16.gmra.mrb[8].mxu1 %vm675_vm3, %v4969_v59  ;;  %v2181_v17 = vsel %vm6606_vm4, %v2176_v61, %v2180_v42  ;;  %v392_v11 = vor.u32 %v391_v2, %v388_v57  ;;  %v2196_v13 = vshll.u32 %v5160_v53, 16  ;;  %v5163_v53 = vld [vmem:[%s6580_s11 + $0x60] sm:$0xf]  ;;  %v6794_v59 = vld [vmem:[%s6580_s11 + $0x64] sm:$0xf] }
  0x55   : > { %v2186_v10 = vrot.slane %v2185_v0, 4  ;;  %v407_v18 = vrot.slane %v405_v7, 5  ;;  %v2195_v19 = vrot.slane %v2193_v9, 4  ;;  %v2202_v21 = vshll.u32 %v6764_v4, 16  ;;  %v6801_v9 = vld [vmem:[%s6580_s11 + $0x68] sm:$0x1] }
  0x56   : > { %v402_v14 = vor.u32 %v401_v6, %v397_v5  ;;  %v393_v29 = vrot.slane %v392_v11, 4  ;;  %v2198_v31 = vrot.slane %v2196_v13, 5  ;;  %v2206_v35 = vshrl.u32 %v6764_v4, 16 }
  0x57   : > { %v2191_v25 = vsel %vm6606_vm4, %v2186_v10, %v2190_v56  ;;  %v2204_v42 = vrot.slane %v2202_v21, 5  ;;  %v2212_v43 = vshll.u32 %v6770_v12, 16  ;;  %v410_v48 = vshrl.u32 %v6774_v24, 16 }
  0x58   : > { %v5196_v38 = vcombine.low %v2181_v17, %v2191_v25  ;;  %v403_v39 = vrot.slane %v402_v14, 4  ;;  %v398_v44 = vsel %vm6606_vm4, %v393_v29, %v397_v5  ;;  %v2199_v45 = vor.u32 %v2198_v31, %v2195_v19  ;;  %v6805_v19 = vld [vmem:[%s6580_s11 + $0x60] sm:$0xf] }
  0x59   : > { %v2208_v47 = vrot.slane %v2206_v35, 4  ;;  %v2214_v50 = vrot.slane %v2212_v43, 5  ;;  %v413_v51 = vshll.u32 %v6774_v24, 16  ;;  %v419_v52 = vshll.u32 %v6780_v37, 16  ;;  %v6811_v35 = vld [vmem:[%s6580_s11 + $0x64] sm:$0xf] }
  0x5a   : > { %5806 = vmatmul.mubr.msk.bf16.gmra.mrb[8].mxu0 %vm675_vm3, %v5196_v38  ;;  %v408_v49 = vsel %vm6606_vm4, %v403_v39, %v407_v18  ;;  %v2200_v56 = vrot.slane %v2199_v45, 4  ;;  %v412_v58 = vrot.slane %v410_v48, 4  ;;  %v423_v2 = vshrl.u32 %v6780_v37, 16 }
  0x5b   : > { %v4970_v55 = vcombine.low %v398_v44, %v408_v49  ;;  %v2209_v57 = vor.u32 %v2208_v47, %v2204_v42  ;;  %v415_v61 = vrot.slane %v413_v51, 5  ;;  %v421_v0 = vrot.slane %v419_v52, 5 }
  0x5c   : > { %v429_v5 = vshll.u32 %v229_v26, 16  ;;  %v2205_v6 = vsel %vm6606_vm4, %v2200_v56, %v2204_v42  ;;  %v2217_v17 = vshrl.u32 %v5163_v53, 16  ;;  %v2220_v10 = vshll.u32 %v5163_v53, 16 }
  0x5d   : > { %5673 = vmatprep.mubr.msk.bf16.mxu1 %vm675_vm3, %v4970_v55  ;;  %v2210_v7 = vrot.slane %v2209_v57, 4  ;;  %v416_v11 = vor.u32 %v415_v61, %v412_v58  ;;  %v425_v13 = vrot.slane %v423_v2, 4  ;;  %v2226_v18 = vshll.u32 %v6794_v59, 16  ;;  %v5223_v58 = vld [vmem:[%s6580_s11 + $0xc] sm:$0xe] }
  0x5e   : > { %v431_v14 = vrot.slane %v429_v5, 5  ;;  %v2219_v25 = vrot.slane %v2217_v17, 4  ;;  %v2222_v29 = vrot.slane %v2220_v10, 5  ;;  %v2230_v31 = vshrl.u32 %v6794_v59, 16 }
  0x5f   : > { %v2215_v21 = vsel %vm6606_vm4, %v2210_v7, %v2214_v50  ;;  %v417_v39 = vrot.slane %v416_v11, 4  ;;  %v426_v42 = vor.u32 %v425_v13, %v421_v0  ;;  %v2228_v43 = vrot.slane %v2226_v18, 5  ;;  %v230_v50 = vld [vmem:[%s6580_s11 + $0x68] sm:$0x1] }
  0x60   : > { %v5197_v38 = vcombine.low %v2205_v6, %v2215_v21  ;;  %v2223_v44 = vor.u32 %v2222_v29, %v2219_v25  ;;  %v2232_v45 = vrot.slane %v2230_v31, 4  ;;  %v2236_v47 = vshll.u32 %v6801_v9, 16  ;;  %v6839_v29 = vld [vmem:[%s6580_s11 + $0x70] sm:$0xf] }
  0x61   : > { %v434_v26 = vshrl.u32 %v6805_v19, 16  ;;  %v422_v48 = vsel %vm6606_vm4, %v417_v39, %v421_v0  ;;  %v427_v49 = vrot.slane %v426_v42, 4  ;;  %v437_v51 = vshll.u32 %v6805_v19, 16  ;;  %v6826_v0 = vld [vmem:[%s6580_s11 + $0x6c] sm:$0xf] }
  0x62   : > { %5809 = vmatprep.mubr.msk.bf16.mxu0 %vm675_vm3, %v5197_v38  ;;  %v443_v52 = vshll.u32 %v6811_v35, 16  ;;  %v2224_v53 = vrot.slane %v2223_v44, 4  ;;  %v2233_v55 = vor.u32 %v2232_v45, %v2228_v43  ;;  %v2238_v56 = vrot.slane %v2236_v47, 5 }
  0x63   : > { %v436_v57 = vrot.slane %v434_v26, 4  ;;  %v432_v61 = vsel %vm6606_vm4, %v427_v49, %v431_v14  ;;  %v439_v2 = vrot.slane %v437_v51, 5  ;;  %v447_v6 = vshrl.u32 %v6811_v35, 16  ;;  %v231_v26 = vld [vmem:[%s6580_s11 + $0x74] sm:$0x1] }
  0x64   : > { %v445_v5 = vrot.slane %v443_v52, 5  ;;  %v4971_v7 = vcombine.low %v422_v48, %v432_v61  ;;  %v2229_v17 = vsel %vm6606_vm4, %v2224_v53, %v2228_v43  ;;  %v2234_v10 = vrot.slane %v2233_v55, 4  ;;  %v5224_v48 = vld [vmem:[%s6580_s11 + $0x18] sm:$0xe] }
  0x65   : > { %v453_v11 = vshll.u32 %v230_v50, 16  ;;  %v440_v14 = vor.u32 %v439_v2, %v436_v57  ;;  %v449_v18 = vrot.slane %v447_v6, 4  ;;  %v5239_v21 = vrot.slane %v5223_v58, 9  ;;  %v6858_v53 = vld [vmem:[%s6580_s11 + $0x78] sm:$0xf] }
  0x66   : > { %v2794_v25 = vrot.slane %v2792_v62, 4  ;;  %5674 = vmatmul.mubr.msk.bf16.gmra.mrb[12].mxu1 %vm675_vm3, %v4971_v7  ;;  %v2239_v31 = vsel %vm6606_vm4, %v2234_v10, %v2238_v56  ;;  %v458_v39 = vshrl.u32 %v6826_v0, 16  ;;  %v461_v42 = vshll.u32 %v6826_v0, 16  ;;  %v232_v57 = vld [vmem:[%s6580_s11 + $0x80] sm:$0x1] }
  0x67   : > { %v455_v38 = vrot.slane %v453_v11, 5  ;;  %v5198_v43 = vcombine.low %v2229_v17, %v2239_v31  ;;  %v441_v44 = vrot.slane %v440_v14, 4  ;;  %v450_v45 = vor.u32 %v449_v18, %v445_v5  ;;  %v5225_v10 = vld [vmem:[%s6580_s11 + $0x24] sm:$0xe] }
  0x68   : > { %v2793_v47 = vsel %vm6832_vm7, %v5239_v21, %v2792_v62  ;;  %v2796_v49 = vsel %vm6832_vm7, %v2794_v25, %v2795_v63  ;;  %v460_v50 = vrot.slane %v458_v39, 4  ;;  %v463_v51 = vrot.slane %v461_v42, 5  ;;  %v6884_v39 = vld [vmem:[%s6580_s11 + $0x84] sm:$0xf] }
  0x69   : > { %v467_v52 = vshll.u32 %v6839_v29, 16  ;;  %5810 = vmatmul.mubr.msk.bf16.gmra.mrb[12].mxu0 %vm675_vm3, %v5198_v43  ;;  %v446_v15 = vsel %vm6606_vm4, %v441_v44, %v445_v5  ;;  %v451_v62 = vrot.slane %v450_v45, 4  ;;  %v5256_v55 = vcombine.low %v2793_v47, %v2796_v49  ;;  %v6892_v43 = vld [vmem:[%s6580_s11 + $0x88] sm:$0xf] }
  0x6a   : > { %v471_v56 = vshrl.u32 %v6839_v29, 16  ;;  %v464_v63 = vor.u32 %v463_v51, %v460_v50  ;;  %v477_v61 = vshll.u32 %v231_v26, 16  ;;  %v5240_v2 = vrot.slane %v5224_v48, 9 }
  0x6b   : > { %v469_v58 = vrot.slane %v467_v52, 5  ;;  %v456_v6 = vsel %vm6606_vm4, %v451_v62, %v455_v38  ;;  %5831 = vmatprep.mubr.msk.bf16.mxu0 %vm675_vm3, %v5256_v55  ;;  %v2803_v5 = vsel %vm6832_vm7, %v6649_v30, %v2802_v28  ;;  %v482_v17 = vshrl.u32 %v6858_v53, 16  ;;  %v233_v52 = vld [vmem:[%s6580_s11 + $0x8c] sm:$0x1] }
  0x6c   : > { %v473_v7 = vrot.slane %v471_v56, 4  ;;  %v4972_v11 = vcombine.low %v446_v15, %v456_v6  ;;  %v465_v14 = vrot.slane %v464_v63, 4  ;;  %v479_v18 = vrot.slane %v477_v61, 5 }
  0x6d   : > { %v2800_v21 = vsel %vm6832_vm7, %v5240_v2, %v2799_v22  ;;  %v484_v38 = vrot.slane %v482_v17, 4  ;;  %v485_v1 = vshll.u32 %v6858_v53, 16  ;;  %v491_v30 = vshll.u32 %v6865_v16, 16  ;;  %v6897_v22 = vld [vmem:[%s8400_s1 + $0xe] sm:$0x3] }
  0x6e   : > { %v474_v25 = vor.u32 %v473_v7, %v469_v58  ;;  %v5257_v31 = vcombine.low %v2800_v21, %v2803_v5  ;;  %5677 = vmatprep.mubr.msk.bf16.mxu1 %vm675_vm3, %v4972_v11  ;;  %v470_v28 = vsel %vm6606_vm4, %v465_v14, %v469_v58  ;;  %v495_v60 = vshrl.u32 %v6865_v16, 16  ;;  %v6916_v5 = vld [vmem:[%s6580_s11 + $0x90] sm:$0xf] }
  0x6f   : > { %v501_v42 = vshll.u32 %v232_v57, 16  ;;  %v487_v45 = vrot.slane %v485_v1, 5  ;;  %v5241_v47 = vrot.slane %v5225_v10, 9  ;;  %v2806_v26 = vrot.slane %v6656_v46, 5  ;;  %v5226_v57 = vld [vmem:[%s6580_s11 + $0x30] sm:$0xe] }
  0x70   : > { %v475_v44 = vrot.slane %v474_v25, 4  ;;  %v493_v48 = vrot.slane %v491_v30, 5  ;;  %v497_v49 = vrot.slane %v495_v60, 4  ;;  %v2809_v51 = vrot.slane %v6665_v54, 5  ;;  %v6928_v30 = vld [vmem:[%s6580_s11 + $0x94] sm:$0xf] }
  0x71   : > { %v503_v50 = vrot.slane %v501_v42, 5  ;;  %5832 = vmatmul.mubr.msk.bf16.vlgmr.msra.gmra.mrb[0].mxu0 %vm675_vm3, %v5257_v31  ;;  %v488_v62 = vor.u32 %v487_v45, %v484_v38  ;;  %v2807_v55 = vsel %vm6832_vm7, %v5241_v47, %v2806_v26  ;;  %v2808_v56 = vrot.slane %v2806_v26, 4  ;;  %v234_v60 = vld [vmem:[%s6580_s11 + $0x98] sm:$0x1]  ;;  %v5227_v26 = vld [vmem:[%s6580_s11 + $0x3c] sm:$0xe] }
  0x72   : > { %v480_v15 = vsel %vm6606_vm4, %v475_v44, %v479_v18  ;;  %5864 = vmatpush3.bf16.msra.mxu0 %v6616_v41  ;;  %v498_v46 = vor.u32 %v497_v49, %v493_v48  ;;  %v506_v58 = vshrl.u32 %v6884_v39, 16  ;;  %v509_v54 = vshll.u32 %v6884_v39, 16 }
  0x73   : > { %v4973_v63 = vcombine.low %v470_v28, %v480_v15  ;;  %v489_v61 = vrot.slane %v488_v62, 4  ;;  %v2810_v2 = vsel %vm6832_vm7, %v2808_v56, %v2809_v51  ;;  %v515_v6 = vshll.u32 %v6892_v43, 16  ;;  %6231 = vmatprep.subr.msk.bf16.mxu0 %vm724_vm0, %v6897_v22 }
  0x74   : > { %v519_v7 = vshrl.u32 %v6892_v43, 16  ;;  %v499_v41 = vrot.slane %v498_v46, 4  ;;  %v5258_v17 = vcombine.low %v2807_v55, %v2810_v2  ;;  %v508_v10 = vrot.slane %v506_v58, 4  ;;  %v6948_v46 = vld [vmem:[%s6580_s11 + $0xa0] sm:$0xf] }
  0x75   : > { %5678 = vmatmul.mubr.msk.bf16.gmra.mrb[16].mxu1 %vm675_vm3, %v4973_v63  ;;  %v511_v11 = vrot.slane %v509_v54, 5  ;;  %v494_v14 = vsel %vm6606_vm4, %v489_v61, %v493_v48  ;;  %v517_v18 = vrot.slane %v515_v6, 5  ;;  %v525_v25 = vshll.u32 %v233_v52, 16  ;;  %v6937_v52 = vld [vmem:[%s6580_s11 + $0x9c] sm:$0xf] }
  0x76   : > { %v521_v21 = vrot.slane %v519_v7, 4  ;;  %v504_v31 = vsel %vm6606_vm4, %v499_v41, %v503_v50  ;;  %5835 = vmatprep.mubr.msk.bf16.mxu0 %vm675_vm3, %v5258_v17  ;;  %v5242_v1 = vrot.slane %v5226_v57, 9  ;;  %v2813_v28 = vrot.slane %v6685_v33, 5 }
  0x77   : > { %v512_v38 = vor.u32 %v511_v11, %v508_v10  ;;  %v4974_v42 = vcombine.low %v494_v14, %v504_v31  ;;  %v527_v45 = vrot.slane %v525_v25, 5  ;;  %v2816_v47 = vrot.slane %v6693_v40, 5  ;;  %v235_v10 = vld [vmem:[%s6580_s11 + $0xa4] sm:$0x1]  ;;  %v5228_v11 = vld [vmem:[%s6580_s11 + $0x48] sm:$0xe] }
  0x78   : > { %v522_v44 = vor.u32 %v521_v21, %v517_v18  ;;  %v2814_v49 = vsel %vm6832_vm7, %v5242_v1, %v2813_v28  ;;  %v2815_v50 = vrot.slane %v2813_v28, 4  ;;  %v530_v51 = vshrl.u32 %v6916_v5, 16 }
  0x79   : > { %v513_v48 = vrot.slane %v512_v38, 4  ;;  %5681 = vmatprep.mubr.msk.bf16.mxu1 %vm675_vm3, %v4974_v42  ;;  %v533_v15 = vshll.u32 %v6916_v5, 16  ;;  %v539_v62 = vshll.u32 %v6928_v30, 16  ;;  %v543_v40 = vshrl.u32 %v6928_v30, 16 }
  0x7a   : > { %v523_v33 = vrot.slane %v522_v44, 4  ;;  %v2817_v56 = vsel %vm6832_vm7, %v2815_v50, %v2816_v47  ;;  %v532_v57 = vrot.slane %v530_v51, 4  ;;  %v549_v63 = vshll.u32 %v234_v60, 16 }
  0x7b   : > { %v518_v55 = vsel %vm6606_vm4, %v513_v48, %v517_v18  ;;  %v5259_v54 = vcombine.low %v2814_v49, %v2817_v56  ;;  %v535_v61 = vrot.slane %v533_v15, 5  ;;  %v541_v2 = vrot.slane %v539_v62, 5  ;;  %v6974_v56 = vld [vmem:[%s6580_s11 + $0xac] sm:$0xf] }
  0x7c   : > { %v528_v58 = vsel %vm6606_vm4, %v523_v33, %v527_v45  ;;  %v545_v7 = vrot.slane %v543_v40, 4  ;;  %v551_v41 = vrot.slane %v549_v63, 5  ;;  %v5243_v17 = vrot.slane %v5227_v26, 9  ;;  %v6969_v33 = vld [vmem:[%s6580_s11 + $0xa8] sm:$0xf] }
  0x7d   : > { %v4975_v6 = vcombine.low %v518_v55, %v528_v58  ;;  %5836 = vmatmul.mubr.msk.bf16.gmra.mrb[4].mxu0 %vm675_vm3, %v5259_v54  ;;  %v536_v14 = vor.u32 %v535_v61, %v532_v57  ;;  %v2820_v18 = vrot.slane %v6710_v20, 5  ;;  %v2823_v21 = vrot.slane %v6715_v34, 5  ;;  %v236_v61 = vld [vmem:[%s6580_s11 + $0xb0] sm:$0x1] }
  0x7e   : > { %v554_v25 = vshrl.u32 %v6937_v52, 16  ;;  %v546_v31 = vor.u32 %v545_v7, %v541_v2  ;;  %v557_v38 = vshll.u32 %v6937_v52, 16  ;;  %v563_v1 = vshll.u32 %v6948_v46, 16 }
  0x7f   : > { %5682 = vmatmul.mubr.msk.bf16.gmra.mrb[20].mxu1 %vm675_vm3, %v4975_v6  ;;  %v567_v28 = vshrl.u32 %v6948_v46, 16  ;;  %v537_v60 = vrot.slane %v536_v14, 4  ;;  %v2821_v42 = vsel %vm6832_vm7, %v5243_v17, %v2820_v18  ;;  %v2822_v20 = vrot.slane %v2820_v18, 4  ;;  %v6989_v14 = vld [vmem:[%s6580_s11 + $0xb4] sm:$0xf] }
  0x80   : > { %v556_v44 = vrot.slane %v554_v25, 4  ;;  %v547_v34 = vrot.slane %v546_v31, 4  ;;  %v559_v45 = vrot.slane %v557_v38, 5  ;;  %v565_v47 = vrot.slane %v563_v1, 5 }
  0x81   : > { %v569_v26 = vrot.slane %v567_v28, 4  ;;  %v542_v48 = vsel %vm6606_vm4, %v537_v60, %v541_v2  ;;  %v2824_v49 = vsel %vm6832_vm7, %v2822_v20, %v2823_v21  ;;  %v573_v50 = vshll.u32 %v235_v10, 16  ;;  %v5229_v2 = vld [vmem:[%s6580_s11 + $0x54] sm:$0xe] }
  0x82   : > { %v5244_v51 = vrot.slane %v5228_v11, 9  ;;  %v552_v15 = vsel %vm6606_vm4, %v547_v34, %v551_v41  ;;  %v5260_v62 = vcombine.low %v2821_v42, %v2824_v49  ;;  %v560_v40 = vor.u32 %v559_v45, %v556_v44  ;;  %v6998_v42 = vld [vmem:[%s6580_s11 + $0xb8] sm:$0xf]  ;;  %v237_v49 = vld [vmem:[%s6580_s11 + $0xbc] sm:$0x1] }
  0x83   : > { %v570_v55 = vor.u32 %v569_v26, %v565_v47  ;;  %v4976_v57 = vcombine.low %v542_v48, %v552_v15  ;;  %v575_v63 = vrot.slane %v573_v50, 5  ;;  %v2827_v58 = vrot.slane %v6733_v8, 5 }
  0x84   : > { %v2830_v54 = vrot.slane %v6741_v23, 5  ;;  %5839 = vmatprep.mubr.msk.bf16.mxu0 %vm675_vm3, %v5260_v62  ;;  %v561_v6 = vrot.slane %v560_v40, 4  ;;  %v578_v41 = vshrl.u32 %v6969_v33, 16  ;;  %v581_v17 = vshll.u32 %v6969_v33, 16 }
  0x85   : > { %v571_v7 = vrot.slane %v570_v55, 4  ;;  %5685 = vmatprep.mubr.msk.bf16.mxu1 %vm675_vm3, %v4976_v57  ;;  %v2828_v10 = vsel %vm6832_vm7, %v5244_v51, %v2827_v58  ;;  %v2829_v11 = vrot.slane %v2827_v58, 4  ;;  %v587_v8 = vshll.u32 %v6974_v56, 16  ;;  %v5230_v55 = vld [vmem:[%s6580_s11 + $0x60] sm:$0xe] }
  0x86   : > { %v591_v23 = vshrl.u32 %v6974_v56, 16  ;;  %v566_v18 = vsel %vm6606_vm4, %v561_v6, %v565_v47  ;;  %v580_v25 = vrot.slane %v578_v41, 4  ;;  %v583_v31 = vrot.slane %v581_v17, 5  ;;  %v5231_v6 = vld [vmem:[%s6580_s11 + $0x6c] sm:$0xe] }
  0x87   : > { %v576_v21 = vsel %vm6606_vm4, %v571_v7, %v575_v63  ;;  %v2831_v1 = vsel %vm6832_vm7, %v2829_v11, %v2830_v54  ;;  %v589_v28 = vrot.slane %v587_v8, 5  ;;  %v597_v34 = vshll.u32 %v236_v61, 16  ;;  %v5167_v11 = vld [vmem:[%s6580_s11 + $0x70] sm:$0xf]  ;;  %v5168_v8 = vld [vmem:[%s6580_s11 + $0x74] sm:$0x1] }
  0x88   : > { %v4977_v38 = vcombine.low %v566_v18, %v576_v21  ;;  %v593_v60 = vrot.slane %v591_v23, 4  ;;  %v5261_v20 = vcombine.low %v2828_v10, %v2831_v1  ;;  %v584_v44 = vor.u32 %v583_v31, %v580_v25 }
  0x89   : > { %v5245_v45 = vrot.slane %v5229_v2, 9  ;;  %v2834_v26 = vrot.slane %v6764_v4, 5  ;;  %v2837_v48 = vrot.slane %v6770_v12, 5  ;;  %v602_v50 = vshrl.u32 %v6989_v14, 16 }
  0x8a   : > { %5686 = vmatmul.mubr.msk.bf16.gmra.mrb[24].mxu1 %vm675_vm3, %v4977_v38  ;;  %v594_v47 = vor.u32 %v593_v60, %v589_v28  ;;  %5840 = vmatmul.mubr.msk.bf16.gmra.mrb[8].mxu0 %vm675_vm3, %v5261_v20  ;;  %v585_v51 = vrot.slane %v584_v44, 4  ;;  %v599_v15 = vrot.slane %v597_v34, 5  ;;  %v605_v62 = vshll.u32 %v6989_v14, 16 }
  0x8b   : > { %v611_v40 = vshll.u32 %v6998_v42, 16  ;;  %v2835_v4 = vsel %vm6832_vm7, %v5245_v45, %v2834_v26  ;;  %v2836_v12 = vrot.slane %v2834_v26, 4  ;;  %v604_v63 = vrot.slane %v602_v50, 4 }
  0x8c   : > { %v595_v57 = vrot.slane %v594_v47, 4  ;;  %v590_v58 = vsel %vm6606_vm4, %v585_v51, %v589_v28  ;;  %v607_v54 = vrot.slane %v605_v62, 5  ;;  %v615_v2 = vshrl.u32 %v6998_v42, 16  ;;  %v5232_v47 = vld [vmem:[%s6580_s11 + $0x78] sm:$0xe] }
  0x8d   : > { %v613_v61 = vrot.slane %v611_v40, 5  ;;  %v2838_v41 = vsel %vm6832_vm7, %v2836_v12, %v2837_v48  ;;  %v621_v17 = vshll.u32 %v237_v49, 16  ;;  %v5246_v10 = vrot.slane %v5230_v55, 9  ;;  %v6339_v51 = vld [vmem:[%s6580_s11] sm:$0xf] }
  0x8e   : > { %v600_v7 = vsel %vm6606_vm4, %v595_v57, %v599_v15  ;;  %v5262_v18 = vcombine.low %v2835_v4, %v2838_v41  ;;  %v608_v21 = vor.u32 %v607_v54, %v604_v63  ;;  %v617_v25 = vrot.slane %v615_v2, 4  ;;  %v7036_v15 = vld [vmem:[%s6580_s11 + $0x4] sm:$0xf]  ;;  %v7040_v40 = vld [vmem:[%s6580_s11 + $0x7c] sm:$0xf] }
  0x8f   : > { %v4978_v23 = vcombine.low %v590_v58, %v600_v7  ;;  %v623_v31 = vrot.slane %v621_v17, 5  ;;  %v2841_v38 = vrot.slane %v6794_v59, 5  ;;  %v2844_v1 = vrot.slane %v6801_v9, 5  ;;  %v7043_v55 = vld [vmem:[%s6580_s11 + $0x80] sm:$0x1] }
  0x90   : > { %v5247_v28 = vrot.slane %v5231_v6, 9  ;;  %5843 = vmatprep.mubr.msk.bf16.mxu0 %vm675_vm3, %v5262_v18  ;;  %v609_v60 = vrot.slane %v608_v21, 4  ;;  %v618_v20 = vor.u32 %v617_v25, %v613_v61  ;;  %v2848_v44 = vrot.slane %v5167_v11, 5  ;;  %v5173_v57 = vld [vmem:[%s6580_s11 + $0x88] sm:$0xf] }
  0x91   : > { %5689 = vmatprep.mubr.msk.bf16.mxu1 %vm675_vm3, %v4978_v23  ;;  %v2851_v34 = vrot.slane %v5168_v8, 5  ;;  %v2842_v45 = vsel %vm6832_vm7, %v5246_v10, %v2841_v38  ;;  %v2843_v59 = vrot.slane %v2841_v38, 4  ;;  %v4996_v62 = vcombine.low %v6339_v51, %v7036_v15  ;;  %v5174_v54 = vld [vmem:[%s6580_s11 + $0x8c] sm:$0x1]  ;;  %v5176_v17 = vld [vmem:[%s6580_s11 + $0x94] sm:$0xf] }
  0x92   : > { %v614_v9 = vsel %vm6606_vm4, %v609_v60, %v613_v61  ;;  %v619_v26 = vrot.slane %v618_v20, 4  ;;  %v2849_v48 = vsel %vm6832_vm7, %v5247_v28, %v2848_v44  ;;  %v2850_v49 = vrot.slane %v2848_v44, 4  ;;  %v5233_v61 = vld [vmem:[%s6580_s11 + $0x84] sm:$0xe]  ;;  %v5234_v23 = vld [vmem:[%s6580_s11 + $0x90] sm:$0xe] }
  0x93   : > { %v2845_v50 = vsel %vm6832_vm7, %v2843_v59, %v2844_v1  ;;  %v5248_v58 = vrot.slane %v5232_v47, 9  ;;  %v2855_v7 = vrot.slane %v7040_v40, 5  ;;  %v2858_v41 = vrot.slane %v7043_v55, 5  ;;  %v5177_v25 = vld [vmem:[%s6580_s11 + $0x98] sm:$0x1] }
  0x94   : > { %v624_v4 = vsel %vm6606_vm4, %v619_v26, %v623_v31  ;;  %v5263_v12 = vcombine.low %v2842_v45, %v2845_v50  ;;  %v2852_v63 = vsel %vm6832_vm7, %v2850_v49, %v2851_v34  ;;  %v5249_v10 = vrot.slane %v5233_v61, 9  ;;  %v5179_v31 = vld [vmem:[%s6580_s11 + $0xa0] sm:$0xf]  ;;  %v5180_v60 = vld [vmem:[%s6580_s11 + $0xa4] sm:$0x1] }
  0x95   : > { %v4979_v2 = vcombine.low %v614_v9, %v624_v4  ;;  %v5264_v6 = vcombine.low %v2849_v48, %v2852_v63  ;;  %v2862_v11 = vrot.slane %v5173_v57, 5  ;;  %v2865_v8 = vrot.slane %v5174_v54, 5  ;;  %v5235_v20 = vld [vmem:[%s6580_s11 + $0x9c] sm:$0xe]  ;;  %v6341_v44 = vld [vmem:[%s6580_s11 + $0xc] sm:$0xf] }
  0x96   : > { %5844 = vmatmul.mubr.msk.bf16.gmra.mrb[12].mxu0 %vm675_vm3, %v5263_v12  ;;  %v2856_v18 = vsel %vm6832_vm7, %v5248_v58, %v2855_v7  ;;  %v2857_v21 = vrot.slane %v2855_v7, 4  ;;  %v2869_v28 = vrot.slane %v5176_v17, 5  ;;  %v7070_v34 = vld [vmem:[%s6580_s11 + $0x10] sm:$0xf]  ;;  %v6343_v47 = vld [vmem:[%s6580_s11 + $0x18] sm:$0xf] }
  0x97   : > { %5690 = vmatmul.mubr.msk.bf16.gmra.mrb[28].mxu1 %vm675_vm3, %v4979_v2  ;;  %5847 = vmatprep.mubr.msk.bf16.mxu0 %vm675_vm3, %v5264_v6  ;;  %v2863_v38 = vsel %vm6832_vm7, %v5249_v10, %v2862_v11  ;;  %v2864_v1 = vrot.slane %v2862_v11, 4  ;;  %v4997_v45 = vcombine.low %v6341_v44, %v7070_v34  ;;  %v7077_v9 = vld [vmem:[%s6580_s11 + $0x1c] sm:$0xf]  ;;  %v5250_v48 = vrot.slane %v5234_v23, 9  ;;  %v5182_v57 = vld [vmem:[%s6580_s11 + $0xac] sm:$0xf] }
  0x98   : > { %5695 = vmatprep.mubr.msk.bf16.mxu1 %vm675_vm3, %v4996_v62  ;;  %v2859_v59 = vsel %vm6832_vm7, %v2857_v21, %v2858_v41  ;;  %v4998_v26 = vcombine.low %v6343_v47, %v7077_v9  ;;  %v2871_v51 = vrot.slane %v2869_v28, 4  ;;  %v2872_v62 = vrot.slane %v5177_v25, 5  ;;  %v6345_v54 = vld [vmem:[%s8400_s1 + $0x4] sm:$0x3]  ;;  %v5185_v2 = vld [vmem:[%s6580_s11 + $0xb8] sm:$0xf] }
  0x99   : > { %v5265_v49 = vcombine.low %v2856_v18, %v2859_v59  ;;  %v2866_v50 = vsel %vm6832_vm7, %v2864_v1, %v2865_v8  ;;  %v5251_v12 = vrot.slane %v5235_v20, 9  ;;  %v2876_v63 = vrot.slane %v5179_v31, 5  ;;  %v7092_v7 = vld [vmem:[%s8400_s1 + $0x6] sm:$0x3]  ;;  %v5183_v10 = vld [vmem:[%s6580_s11 + $0xb0] sm:$0x1] }
  0x9a   : > { %v5266_v4 = vcombine.low %v2863_v38, %v2866_v50  ;;  %v2879_v58 = vrot.slane %v5180_v60, 5  ;;  %v1443_v61 = vsel %vm724_vm0, %v6345_v54, 0  ;;  %v2870_v41 = vsel %vm6832_vm7, %v5250_v48, %v2869_v28  ;;  %v5236_v11 = vld [vmem:[%s6580_s11 + $0xa8] sm:$0xe]  ;;  %v5186_v25 = vld [vmem:[%s6580_s11 + $0xbc] sm:$0x1] }
  0x9b   : > { %v2878_v6 = vrot.slane %v2876_v63, 4  ;;  %v2873_v17 = vsel %vm6832_vm7, %v2871_v51, %v2872_v62  ;;  %v2883_v8 = vrot.slane %v5182_v57, 5  ;;  %v2877_v23 = vsel %vm6832_vm7, %v5251_v12, %v2876_v63  ;;  %v5237_v31 = vld [vmem:[%s6580_s11 + $0xb4] sm:$0xe]  ;;  %v6346_v38 = vld [vmem:[%s6580_s11 + $0x24] sm:$0xf] }
  0x9c   : > { %v2890_v21 = vrot.slane %v5185_v2, 5  ;;  %v7113_v1 = vld [vmem:[%s6580_s11 + $0x28] sm:$0xf]  ;;  %v5267_v60 = vcombine.low %v2870_v41, %v2873_v17  ;;  %v5252_v44 = vrot.slane %v5236_v11, 9  ;;  %v2886_v59 = vrot.slane %v5183_v10, 5 }
  0x9d   : > { %v2880_v18 = vsel %vm6832_vm7, %v2878_v6, %v2879_v58  ;;  %v4999_v28 = vcombine.low %v6346_v38, %v7113_v1  ;;  %v6348_v47 = vld [vmem:[%s6580_s11 + $0x30] sm:$0xf]  ;;  %v2893_v51 = vrot.slane %v5186_v25, 5  ;;  %v5188_v62 = vld [vmem:[%s6580_s11 + $0xc4] sm:$0xf]  ;;  %v2278_v25 = vshrl.u32 %v7040_v40, 16 }
  0x9e   : > { %5848 = vmatmul.mubr.msk.bf16.gmra.mrb[16].mxu0 %vm675_vm3, %v5265_v49  ;;  %v5268_v20 = vcombine.low %v2877_v23, %v2880_v18  ;;  %v5253_v49 = vrot.slane %v5237_v31, 9  ;;  %v2892_v50 = vrot.slane %v2890_v21, 4  ;;  %v2884_v57 = vsel %vm6832_vm7, %v5252_v44, %v2883_v8  ;;  %v5238_v12 = vld [vmem:[%s6580_s11 + $0xc0] sm:$0xe]  ;;  %v6350_v41 = vld [vmem:[%s6580_s11 + $0x3c] sm:$0xf] }
  0x9f   : > { %5696 = vmatmul.mubr.msk.bf16.vlgmr.msra.gmra.mrb[0].mxu1 %vm675_vm3, %v4997_v45  ;;  %5851 = vmatprep.mubr.msk.bf16.mxu0 %vm675_vm3, %v5266_v4  ;;  %v2885_v45 = vrot.slane %v2883_v8, 4  ;;  %v2897_v63 = vrot.slane %v5188_v62, 5  ;;  %v5254_v6 = vrot.slane %v5238_v12, 9  ;;  %v7138_v17 = vld [vmem:[%s6580_s11 + $0x40] sm:$0xf]  ;;  %v5002_v18 = vcombine.low %v6745_v27, %v6748_v36  ;;  %v6302_v62 = vld [vmem:[%s6580_s11 + $0x24] sm:$0xff]  }
  0xa0   : > { %5728 = vmatpush3.bf16.msra.mxu1 %v1443_v61  ;;  %5699 = vmatprep.mubr.msk.bf16.mxu1 %vm675_vm3, %v4998_v26  ;;  %v7118_v26 = vld [vmem:[%s6580_s11 + $0x34] sm:$0xf]  ;;  %v2891_v58 = vsel %vm6832_vm7, %v5253_v49, %v2890_v21  ;;  %v2894_v54 = vsel %vm6832_vm7, %v2892_v50, %v2893_v51  ;;  %v5189_v61 = vld [vmem:[%s6580_s11 + $0xc8] sm:$0x1]  ;;  %v5001_v10 = vcombine.low %v6350_v41, %v7138_v17  ;;  %v2274_v21 = vshll.u32 %v7040_v40, 16 }
  0xa1   : > { %6226 = vmatprep.subr.msk.bf16.mxu1 %vm724_vm0, %v7092_v7  ;;  %v5000_v48 = vcombine.low %v6348_v47, %v7118_v26  ;;  %v2887_v4 = vsel %vm6832_vm7, %v2885_v45, %v2886_v59  ;;  %v5270_v11 = vcombine.low %v2891_v58, %v2894_v54  ;;  %v2899_v8 = vrot.slane %v2897_v63, 4  ;;  %v1181_v45 = vld [vmem:[%s6580_s11] sm:$0xe]  ;;  %v1182_v59 = vld [vmem:[%s6580_s11 + $0xc] sm:$0xe] }
  0xa2   : > { %v5269_v2 = vcombine.low %v2884_v57, %v2887_v4  ;;  %v2900_v23 = vrot.slane %v5189_v61, 5  ;;  %v2898_v31 = vsel %vm6832_vm7, %v5254_v6, %v2897_v63  ;;  %v7153_v27 = vrot.slane %v2274_v21, 5  ;;  %v1185_v41 = vld [vmem:[%s6580_s11 + $0x30] sm:$0xe] }
  0xa3   : > { %v2280_v36 = vrot.slane %v2278_v25, 4  ;;  %v5004_v44 = vcombine.low %v6805_v19, %v6811_v35  ;;  %v2284_v47 = vshll.u32 %v7043_v55, 16  ;;  %v5028_v19 = vrot.slane %v1181_v45, 9 }
  0xa4   : > { %v2901_v38 = vsel %vm6832_vm7, %v2899_v8, %v2900_v23  ;;  %8423 = vst [vmem:[#allocation6_spill] sm:$0xff] %v7153_v27  ;;  %v5029_v35 = vrot.slane %v1182_v59, 9  ;;  %v1248_v4 = vrot.slane %v7077_v9, 5  ;;  %v1255_v12 = vrot.slane %v7113_v1, 5  ;;  %v1186_v8 = vld [vmem:[%s6580_s11 + $0x3c] sm:$0xe] }
  0xa5   : > { %v5271_v40 = vcombine.low %v2898_v31, %v2901_v38  ;;  %v2281_v49 = vor.u32 %v2280_v36, %v7153_v27  ;;  %v7173_v51 = vrot.slane %v2284_v47, 5  ;;  %v5005_v58 = vcombine.low %v6826_v0, %v6839_v29  ;;  %v1187_v31 = vld [vmem:[%s6580_s11 + $0x48] sm:$0xe]  ;;  %v6356_v59 = vld [vmem:[%s6580_s11 + $0x38] sm:$0x1] }
  0xa6   : > { %5852 = vmatmul.mubr.msk.bf16.gmra.mrb[20].mxu0 %vm675_vm3, %v5267_v60  ;;  %v5003_v60 = vcombine.low %v6774_v24, %v6780_v37  ;;  %v6353_v24 = vld [vmem:[%s6580_s11 + $0x14] sm:$0x1]  ;;  %v4089_v54 = vsel %vm724_vm0, %v6897_v22, 0  ;;  %v5006_v61 = vcombine.low %v6858_v53, %v6865_v16  ;;  %v5007_v6 = vcombine.low %v6884_v39, %v6892_v43  ;;  %v6354_v16 = vld [vmem:[%s6580_s11 + $0x20] sm:$0x1] }
  0xa7   : > { %5700 = vmatmul.mubr.msk.bf16.gmra.mrb[4].mxu1 %vm675_vm3, %v4999_v28  ;;  %5855 = vmatprep.mubr.msk.bf16.mxu0 %vm675_vm3, %v5268_v20  ;;  %v1241_v28 = vrot.slane %v7070_v34, 5  ;;  %v6300_v20 = vld [vmem:[%s6580_s11 + $0x18] sm:$0xff]   ;;  %v6352_v34 = vld [vmem:[%s6580_s11 + $0x8] sm:$0x1]  ;;  %v1244_v37 = vrot.slane %v6353_v24, 5  ;;  %8424 = vst [vmem:[#allocation7_spill] sm:$0xff] %v7173_v51  ;;  %v5008_v9 = vcombine.low %v6916_v5, %v6928_v30 }
  0xa8   : > { %5703 = vmatprep.mubr.msk.bf16.mxu1 %vm675_vm3, %v5000_v48  ;;  %v1234_v48 = vrot.slane %v7036_v15, 5  ;;  %v1237_v50 = vrot.slane %v6352_v34, 5  ;;  %v1183_v15 = vld [vmem:[%s6580_s11 + $0x18] sm:$0xe]  ;;  %v7178_v63 = vrot.slane %v2281_v49, 4  ;;  %v1251_v22 = vrot.slane %v6354_v16, 5 }
  0xa9   : > { %v1243_v55 = vrot.slane %v1241_v28, 4  ;;  %v5030_v1 = vrot.slane %v1183_v15, 9  ;;  %v7200_v29 = vsel %vm6832_vm7, %v5029_v35, %v1241_v28  ;;  %v1257_v25 = vrot.slane %v1255_v12, 4  ;;  %v5353_v24 = vld [vmem:[%s6580_s11 + $0x18] sm:$0xf] }
  0xaa   : > { %v1236_v57 = vrot.slane %v1234_v48, 4  ;;  %8425 = vst [vmem:[#allocation8_spill] sm:$0xff] %v7178_v63  ;;  %v7196_v0 = vsel %vm6832_vm7, %v5028_v19, %v1234_v48  ;;  %v1265_v47 = vrot.slane %v6356_v59, 5  ;;  %v7237_v49 = vsel %vm724_vm0, %v7092_v7, 0  ;;  %v5354_v7 = vld [vmem:[%s6580_s11 + $0x1c] sm:$0xf] }
  0xab   : > { %v7204_v53 = vsel %vm6832_vm7, %v1243_v55, %v1244_v37  ;;  %v7241_v34 = vsel %vm6832_vm7, %v5030_v1, %v1248_v4  ;;  %v6306_v37 = vld [vmem:[%s6580_s11 + $0x3c] sm:$0xff]   ;;  %v5033_v35 = vrot.slane %v1186_v8, 9  ;;  %v6357_v55 = vld [vmem:[%s6580_s11 + $0x44] sm:$0x1]  ;;  %v3610_v8 = vshll.u32 %v5353_v24, 16 }
  0xac   : > { %v7215_v23 = vsel %vm6832_vm7, %v1236_v57, %v1237_v50  ;;  %v1188_v50 = vld [vmem:[%s6580_s11 + $0x54] sm:$0xe]  ;;  %v1272_v15 = vrot.slane %v6357_v55, 5  ;;  %v5357_v39 = vld [vmem:[%s6580_s11 + $0x28] sm:$0xf] }
  0xad   : > { %v6364_v5 = vld [vmem:[%s6580_s11 + $0x70] sm:$0xf] }
  0xae   : > { %5856 = vmatmul.mubr.msk.bf16.gmra.mrb[24].mxu0 %vm675_vm3, %v5269_v2  ;;  %v1184_v2 = vld [vmem:[%s6580_s11 + $0x24] sm:$0xe]  ;;  %v1297_v30 = vrot.slane %v6364_v5, 5 }
  0xaf   : > { %5704 = vmatmul.mubr.msk.bf16.gmra.mrb[8].mxu1 %vm675_vm3, %v5001_v10  ;;  %5859 = vmatprep.mubr.msk.bf16.mxu0 %vm675_vm3, %v5270_v11  ;;  %v1262_v10 = vrot.slane %v7118_v26, 5  ;;  %v6304_v11 = vld [vmem:[%s6580_s11 + $0x30] sm:$0xff]   ;;  %v5031_v21 = vrot.slane %v1184_v2, 9 }
  0xb0   : > { %5707 = vmatprep.mubr.msk.bf16.mxu1 %vm675_vm3, %v5002_v18  ;;  %v7211_v26 = vld [vmem:[%s8400_s1 + $0x10] sm:$0x3]  ;;  %v1250_v18 = vrot.slane %v1248_v4, 4  ;;  %v1299_v48 = vrot.slane %v1297_v30, 4 }
  0xb1   : > { %v1264_v45 = vrot.slane %v1262_v10, 4  ;;  %v7248_v19 = vsel %vm6832_vm7, %v5031_v21, %v1255_v12  ;;  %v3620_v21 = vshrl.u32 %v5354_v7, 16 }
  0xb2   : > { %v7257_v4 = vsel %vm6832_vm7, %v1250_v18, %v1251_v22  ;;  %v3607_v22 = vshrl.u32 %v5353_v24, 16  ;;  %v3616_v18 = vshll.u32 %v5354_v7, 16  ;;  %v5356_v24 = vld [vmem:[%s6580_s11 + $0x24] sm:$0xf] }
  0xb3   : > { %v7270_v1 = vsel %vm6832_vm7, %v1264_v45, %v1265_v47 }
  0xb4   : > { %v3609_v43 = vrot.slane %v3607_v22, 4  ;;  %v7312_v7 = vrot.slane %v3616_v18, 5  ;;  %v3634_v22 = vshll.u32 %v5356_v24, 16  ;;  %v3644_v18 = vshrl.u32 %v5357_v39, 16 }
  0xb6   : > { %5860 = vmatmul.mubr.msk.bf16.gmra.mrb[28].mxu0 %vm675_vm3, %v5271_v40  ;;  %v6355_v40 = vld [vmem:[%s6580_s11 + $0x2c] sm:$0x1]  ;;  %v3636_v27 = vrot.slane %v3634_v22, 5 }
  0xb7   : > { %5708 = vmatmul.mubr.msk.bf16.gmra.mrb[12].mxu1 %vm675_vm3, %v5003_v60  ;;  %5865 = vmatprep.mubr.msk.bf16.mxu0 %vm675_vm3, %v6300_v20  ;;  %v1258_v28 = vrot.slane %v6355_v40, 5  ;;  %v1269_v60 = vrot.slane %v7138_v17, 5  ;;  %v6360_v40 = vld [vmem:[%s6580_s11 + $0x50] sm:$0x1]  ;;  %v6365_v17 = vld [vmem:[%s6580_s11 + $0x74] sm:$0x1] }
  0xb8   : > { %5711 = vmatprep.mubr.msk.bf16.mxu1 %vm675_vm3, %v5004_v44  ;;  %v5032_v44 = vrot.slane %v1185_v41, 9  ;;  %v5035_v41 = vrot.slane %v1188_v50, 9  ;;  %v1189_v50 = vld [vmem:[%s6580_s11 + $0x60] sm:$0xe]  ;;  %v5358_v20 = vld [vmem:[%s6580_s11 + $0x2c] sm:$0x1] }
  0xb9   : > { %v1271_v12 = vrot.slane %v1269_v60, 4  ;;  %v7283_v45 = vsel %vm6832_vm7, %v5033_v35, %v1269_v60  ;;  %v6361_v35 = vld [vmem:[%s6580_s11 + $0x5c] sm:$0x1] }
  0xba   : > { %v7266_v2 = vsel %vm6832_vm7, %v5032_v44, %v1262_v10  ;;  %v1286_v55 = vrot.slane %v6361_v35, 5  ;;  %v1190_v35 = vld [vmem:[%s6580_s11 + $0x6c] sm:$0xe] }
  0xbb   : > { %v7287_v59 = vsel %vm6832_vm7, %v1271_v12, %v1272_v15  ;;  %v6362_v15 = vld [vmem:[%s6580_s11 + $0x64] sm:$0xf]  ;;  %v3622_v12 = vrot.slane %v3620_v21, 4  ;;  %v5037_v5 = vrot.slane %v1190_v35, 9 }
  0xbc   : > { %v6312_v21 = vld [vmem:[%s6580_s11 + $0x60] sm:$0xff]  }
  0xbe   : > { %5866 = vmatmul.mubr.msk.bf16.vlgmr.msra.gmra.mrb[0].mxu0 %vm675_vm3, %v6302_v62  ;;  %v6358_v62 = vld [vmem:[%s6580_s11 + $0x4c] sm:$0xf] }
  0xbf   : > { %5712 = vmatmul.mubr.msk.bf16.gmra.mrb[16].mxu1 %vm675_vm3, %v5005_v58  ;;  %5898 = vmatpush3.bf16.msra.mxu0 %v4089_v54  ;;  %v1276_v57 = vrot.slane %v6358_v62, 5  ;;  %v7261_v58 = vsel %vm6832_vm7, %v1257_v25, %v1258_v28  ;;  %v5034_v54 = vrot.slane %v1187_v31, 9  ;;  %v1279_v28 = vrot.slane %v6360_v40, 5 }
  0xc0   : > { %5715 = vmatprep.mubr.msk.bf16.mxu1 %vm675_vm3, %v5006_v61  ;;  %5869 = vmatprep.mubr.msk.bf16.mxu0 %vm675_vm3, %v6304_v11  ;;  %v6308_v61 = vld [vmem:[%s6580_s11 + $0x48] sm:$0xff]   ;;  %v6359_v11 = vld [vmem:[%s6580_s11 + $0x58] sm:$0xf]  ;;  %v1290_v62 = vrot.slane %v6362_v15, 5  ;;  %v5360_v15 = vld [vmem:[%s6580_s11 + $0x34] sm:$0xf] }
  0xc1   : > { %6232 = vmatprep.subr.msk.bf16.mxu0 %vm724_vm0, %v7211_v26  ;;  %v1283_v16 = vrot.slane %v6359_v11, 5  ;;  %v1278_v31 = vrot.slane %v1276_v57, 4  ;;  %v7291_v47 = vsel %vm6832_vm7, %v5034_v54, %v1276_v57  ;;  %v5355_v57 = vld [vmem:[%s6580_s11 + $0x20] sm:$0x1]  ;;  %v5359_v54 = vld [vmem:[%s6580_s11 + $0x30] sm:$0xf] }
  0xc2   : > { %v5036_v11 = vrot.slane %v1189_v50, 9  ;;  %v3658_v50 = vshll.u32 %v5359_v54, 16  ;;  %v3626_v25 = vshll.u32 %v5355_v57, 16  ;;  %v3664_v36 = vshll.u32 %v5360_v15, 16 }
  0xc3   : > { %v7302_v60 = vsel %vm6832_vm7, %v5035_v41, %v1283_v16  ;;  %v7318_v41 = vsel %vm6832_vm7, %v1278_v31, %v1279_v28  ;;  %v1292_v31 = vrot.slane %v1290_v62, 4  ;;  %v3655_v28 = vshrl.u32 %v5359_v54, 16 }
  0xc4   : > { %v7360_v35 = vrot.slane %v3664_v36, 5 }
  0xc6   : > { %5870 = vmatmul.mubr.msk.bf16.gmra.mrb[4].mxu0 %vm675_vm3, %v6306_v37  ;;  %v1285_v37 = vrot.slane %v1283_v16, 4  ;;  %v6363_v16 = vld [vmem:[%s6580_s11 + $0x68] sm:$0x1] }
  0xc7   : > { %5716 = vmatmul.mubr.msk.bf16.gmra.mrb[20].mxu1 %vm675_vm3, %v5007_v6  ;;  %5873 = vmatprep.mubr.msk.bf16.mxu0 %vm675_vm3, %v6308_v61  ;;  %v3612_v6 = vrot.slane %v3610_v8, 5  ;;  %v6310_v61 = vld [vmem:[%s6580_s11 + $0x54] sm:$0xff]   ;;  %v1293_v40 = vrot.slane %v6363_v16, 5  ;;  %v3640_v8 = vshll.u32 %v5357_v39, 16  ;;  %v3623_v16 = vor.u32 %v3622_v12, %v7312_v7 }
  0xc8   : > { %5719 = vmatprep.mubr.msk.bf16.mxu1 %vm675_vm3, %v5008_v9  ;;  %v3631_v9 = vshrl.u32 %v5356_v24, 16  ;;  %v7327_v44 = vsel %vm6832_vm7, %v1285_v37, %v1286_v55  ;;  %v1300_v24 = vrot.slane %v6365_v17, 5  ;;  %v3668_v39 = vshrl.u32 %v5360_v15, 16 }
  0xc9   : > { %v3613_v10 = vor.u32 %v3612_v6, %v3609_v43  ;;  %v7333_v37 = vrot.slane %v3640_v8, 5  ;;  %v3646_v55 = vrot.slane %v3644_v18, 4  ;;  %v8426_v43 = vcombine.low %v6937_v52, %v6948_v46  ;;  %v6366_v8 = vld [vmem:[%s6580_s11 + $0x7c] sm:$0xf]  ;;  %v7369_v18 = vld [vmem:[%s6580_s11 + $0x38] sm:$0x1] }
  0xca   : > { %v3633_v38 = vrot.slane %v3631_v9, 4  ;;  %v7342_v17 = vsel %vm6832_vm7, %v5036_v11, %v1290_v62  ;;  %v7346_v57 = vsel %vm6832_vm7, %v1292_v31, %v1293_v40  ;;  %v3657_v6 = vrot.slane %v3655_v28, 4  ;;  %8428 = vst [vmem:[#allocation9_spill] sm:$0xff] %v7369_v18 }
  0xcb   : > { %v3660_v12 = vrot.slane %v3658_v50, 5  ;;  %v8427_v52 = vcombine.low %v6969_v33, %v6974_v56  ;;  %v3614_v46 = vrot.slane %v3613_v10, 4  ;;  %v3624_v54 = vrot.slane %v3623_v16, 4  ;;  %v6314_v33 = vld [vmem:[%s6580_s11 + $0x6c] sm:$0xff]   ;;  %v1192_v16 = vld [vmem:[%s6580_s11 + $0x84] sm:$0xe] }
  0xcc   : > { %v3650_v62 = vshll.u32 %v5358_v20, 16  ;;  %v7354_v11 = vsel %vm6832_vm7, %v5037_v5, %v1297_v30  ;;  %v7358_v40 = vsel %vm6832_vm7, %v1299_v48, %v1300_v24  ;;  %v3670_v9 = vrot.slane %v3668_v39, 4  ;;  %v6315_v48 = vld [vmem:[%s6580_s11 + $0x78] sm:$0xff]  }
  0xcd   : > { %v3637_v10 = vor.u32 %v3636_v27, %v3633_v38  ;;  %v3647_v20 = vor.u32 %v3646_v55, %v7333_v37  ;;  %v1304_v30 = vrot.slane %v6366_v8, 5  ;;  %v3661_v38 = vor.u32 %v3660_v12, %v3657_v6  ;;  %v5362_v5 = vld [vmem:[%s6580_s11 + $0x3c] sm:$0xf] }
  0xce   : > { %5874 = vmatmul.mubr.msk.bf16.gmra.mrb[8].mxu0 %vm675_vm3, %v6310_v61  ;;  %v3628_v61 = vrot.slane %v3626_v25, 5  ;;  %v1191_v25 = vld [vmem:[%s6580_s11 + $0x78] sm:$0xe]  ;;  %v7385_v50 = vrot.slane %v3650_v62, 5  ;;  %v3671_v39 = vor.u32 %v3670_v9, %v7360_v35  ;;  %v3674_v55 = vshll.u32 %v7369_v18, 16 }
  0xcf   : > { %5720 = vmatmul.mubr.msk.bf16.gmra.mrb[24].mxu1 %vm675_vm3, %v8426_v43  ;;  %5877 = vmatprep.mubr.msk.bf16.mxu0 %vm675_vm3, %v6312_v21  ;;  %v3619_v21 = vsel %vm6606_vm4, %v3614_v46, %v7312_v7  ;;  %v5038_v24 = vrot.slane %v1191_v25, 9  ;;  %v6367_v43 = vld [vmem:[%s6580_s11 + $0x88] sm:$0xf]  ;;  %v7393_v7 = vld [vmem:[%s6580_s11 + $0x40] sm:$0xf]  ;;  %v3638_v12 = vrot.slane %v3637_v10, 4  ;;  %v8430_v62 = vcombine.low %v6989_v14, %v6998_v42 }
  0xd0   : > { %5723 = vmatprep.mubr.msk.bf16.mxu1 %vm675_vm3, %v8427_v52  ;;  %v3629_v31 = vsel %vm6606_vm4, %v3624_v54, %v3628_v61  ;;  %v1311_v6 = vrot.slane %v6367_v43, 5  ;;  %8429 = vst [vmem:[#allocation10_spill] sm:$0xff] %v7393_v7  ;;  %v3648_v52 = vrot.slane %v3647_v20, 4  ;;  %v1306_v46 = vrot.slane %v1304_v30, 4  ;;  %v6368_v54 = vld [vmem:[%s6580_s11 + $0x80] sm:$0x1] }
  0xd1   : > { %v1307_v61 = vrot.slane %v6368_v54, 5  ;;  %v3662_v9 = vrot.slane %v3661_v38, 4  ;;  %v5039_v25 = vrot.slane %v1192_v16, 9  ;;  %v3679_v8 = vshrl.u32 %v5362_v5, 16  ;;  %v6316_v10 = vld [vmem:[%s6580_s11 + $0x84] sm:$0xff]  }
  0xd2   : > { %v3682_v43 = vshll.u32 %v5362_v5, 16  ;;  %v7407_v20 = vcombine.low %v3619_v21, %v3629_v31  ;;  %v7411_v14 = vsel %vm724_vm0, %v7211_v26, 0  ;;  %v3692_v38 = vshrl.u32 %v7393_v7, 16  ;;  %v6317_v21 = vld [vmem:[%s6580_s11 + $0x90] sm:$0xff]   ;;  %v6373_v18 = vld [vmem:[%s6580_s11 + $0xa0] sm:$0xf] }
  0xd3   : > { %v3672_v16 = vrot.slane %v3671_v39, 4  ;;  %v3676_v5 = vrot.slane %v3674_v55, 5  ;;  %v1313_v54 = vrot.slane %v1311_v6, 4  ;;  %v3643_v31 = vsel %vm6606_vm4, %v3638_v12, %v7333_v37 }
  0xd4   : > { %v3653_v26 = vsel %vm6606_vm4, %v3648_v52, %v7385_v50  ;;  %v7426_v39 = vsel %vm6832_vm7, %v5038_v24, %v1304_v30  ;;  %v7430_v55 = vsel %vm6832_vm7, %v1306_v46, %v1307_v61  ;;  %v3667_v37 = vsel %vm6606_vm4, %v3662_v9, %v7360_v35  ;;  %v5368_v30 = vld [vmem:[%s6580_s11 + $0x54] sm:$0xf]  ;;  %v7447_v24 = vld [vmem:[%s6580_s11 + $0x58] sm:$0xf]  ;;  %v7452_v61 = vld [vmem:[%s6580_s11 + $0x90] sm:$0xe] }
  0xd5   : > { %v7443_v12 = vsel %vm6832_vm7, %v5039_v25, %v1311_v6  ;;  %v3681_v50 = vrot.slane %v3679_v8, 4  ;;  %v3684_v52 = vrot.slane %v3682_v43, 5  ;;  %v3694_v46 = vrot.slane %v3692_v38, 4 }
  0xd6   : > { %5878 = vmatmul.mubr.msk.bf16.gmra.mrb[12].mxu0 %vm675_vm3, %v6314_v33  ;;  %v8431_v33 = vcombine.low %v7196_v0, %v7215_v23  ;;  %v6369_v0 = vld [vmem:[%s6580_s11 + $0x8c] sm:$0x1]  ;;  %v3677_v36 = vsel %vm6606_vm4, %v3672_v16, %v3676_v5  ;;  %v3727_v25 = vshrl.u32 %v5368_v30, 16  ;;  %v3730_v8 = vshll.u32 %v5368_v30, 16 }
  0xd7   : > { %5724 = vmatmul.mubr.msk.bf16.gmra.mrb[28].mxu1 %vm675_vm3, %v8430_v62  ;;  %5881 = vmatprep.mubr.msk.bf16.mxu0 %vm675_vm3, %v6315_v48  ;;  %v3688_v48 = vshll.u32 %v7393_v7, 16  ;;  %v1314_v23 = vrot.slane %v6369_v0, 5  ;;  %v5365_v62 = vld [vmem:[%s6580_s11 + $0x48] sm:$0xf]  ;;  %v7436_v0 = vld [vmem:[%s6580_s11 + $0x4c] sm:$0xf]  ;;  %v8433_v38 = vcombine.low %v7200_v29, %v7204_v53  ;;  %v7470_v16 = vcombine.low %v3643_v31, %v3653_v26 }
  0xd8   : > { %5729 = vmatprep.mubr.msk.bf16.mxu1 %vm675_vm3, %v8431_v33  ;;  %v7433_v33 = vld [vmem:[%s6580_s11 + $0x44] sm:$0x1]  ;;  %v3703_v27 = vshrl.u32 %v5365_v62, 16  ;;  %v3706_v15 = vshll.u32 %v5365_v62, 16  ;;  %v3712_v6 = vshll.u32 %v7436_v0, 16  ;;  %v3716_v9 = vshrl.u32 %v7436_v0, 16 }
  0xd9   : > { %8432 = vst [vmem:[#allocation11_spill] sm:$0xff] %v7433_v33  ;;  %v7449_v28 = vrot.slane %v3688_v48, 5  ;;  %v7458_v35 = vsel %vm6832_vm7, %v1313_v54, %v1314_v23  ;;  %v3736_v43 = vshll.u32 %v7447_v24, 16  ;;  %v3740_v48 = vshrl.u32 %v7447_v24, 16  ;;  %v5371_v31 = vld [vmem:[%s6580_s11 + $0x60] sm:$0xf] }
  0xda   : > { %v3698_v5 = vshll.u32 %v7433_v33, 16  ;;  %v5040_v54 = vrot.slane %v7452_v61, 9  ;;  %v8434_v23 = vcombine.low %v7241_v34, %v7257_v4  ;;  %v7481_v29 = vcombine.low %v3667_v37, %v3677_v36  ;;  %v6318_v26 = vld [vmem:[%s6580_s11 + $0x9c] sm:$0xff]   ;;  %v6319_v30 = vld [vmem:[%s6580_s11 + $0xa8] sm:$0xff]  }
  0xdb   : > { %v3685_v53 = vor.u32 %v3684_v52, %v3681_v50  ;;  %v3705_v62 = vrot.slane %v3703_v27, 4  ;;  %v7492_v34 = vrot.slane %v3712_v6, 5  ;;  %v3718_v4 = vrot.slane %v3716_v9, 4  ;;  %v6370_v36 = vld [vmem:[%s8400_s1 + $0x8] sm:$0x3] }
  0xdc   : > { %v3729_v27 = vrot.slane %v3727_v25, 4  ;;  %v3732_v37 = vrot.slane %v3730_v8, 5  ;;  %v7501_v50 = vrot.slane %v3736_v43, 5  ;;  %v3742_v52 = vrot.slane %v3740_v48, 4  ;;  %v6371_v6 = vld [vmem:[%s6580_s11 + $0x94] sm:$0xf] }
  0xdd   : > { %v7507_v9 = vld [vmem:[%s6580_s11 + $0x64] sm:$0xf]  ;;  %v3751_v61 = vshrl.u32 %v5371_v31, 16  ;;  %v7509_v22 = vrot.slane %v3685_v53, 4  ;;  %v1325_v25 = vrot.slane %v6373_v18, 5  ;;  %v3719_v43 = vor.u32 %v3718_v4, %v7492_v34 }
  0xde   : > { %5882 = vmatmul.mubr.msk.bf16.gmra.mrb[16].mxu0 %vm675_vm3, %v6316_v10  ;;  %8435 = vst [vmem:[#allocation12_spill] sm:$0xff] %v7507_v9  ;;  %v3754_v10 = vshll.u32 %v5371_v31, 16  ;;  %v3733_v31 = vor.u32 %v3732_v37, %v3729_v27  ;;  %v3743_v53 = vor.u32 %v3742_v52, %v7501_v50  ;;  %v8436_v18 = vcombine.low %v7248_v19, %v7261_v58  ;;  %v6320_v37 = vld [vmem:[%s6580_s11 + $0xb4] sm:$0xff]  }
  0xdf   : > { %5730 = vmatmul.mubr.msk.bf16.vlgmr.msra.gmra.mrb[0].mxu1 %vm675_vm3, %v8433_v38  ;;  %5885 = vmatprep.mubr.msk.bf16.mxu0 %vm675_vm3, %v6317_v21  ;;  %v3708_v21 = vrot.slane %v3706_v15, 5  ;;  %v7490_v38 = vld [vmem:[%s6580_s11 + $0x50] sm:$0x1]  ;;  %v7499_v15 = vld [vmem:[%s6580_s11 + $0x5c] sm:$0x1]  ;;  %v8437_v27 = vcombine.low %v7266_v2, %v7270_v1  ;;  %v1327_v52 = vrot.slane %v1325_v25, 4 }
  0xe0   : > { %5762 = vmatpush3.bf16.msra.mxu1 %v7237_v49  ;;  %5733 = vmatprep.mubr.msk.bf16.mxu1 %vm675_vm3, %v8434_v23  ;;  %v3695_v49 = vor.u32 %v3694_v46, %v7449_v28  ;;  %v7503_v46 = vrot.slane %v3698_v5, 5  ;;  %v1318_v23 = vrot.slane %v6371_v6, 5  ;;  %v3722_v48 = vshll.u32 %v7490_v38, 16  ;;  %v1194_v5 = vld [vmem:[%s6580_s11 + $0x9c] sm:$0xe] }
  0xe1   : > { %6228 = vmatprep.subr.msk.bf16.mxu1 %vm724_vm0, %v6370_v36  ;;  %v6372_v36 = vld [vmem:[%s6580_s11 + $0x98] sm:$0x1]  ;;  %v3709_v7 = vor.u32 %v3708_v21, %v3705_v62  ;;  %v3746_v6 = vshll.u32 %v7499_v15, 16  ;;  %v3764_v62 = vshrl.u32 %v7507_v9, 16  ;;  %v3756_v4 = vrot.slane %v3754_v10, 5 }
  0xe2   : > { %v1321_v33 = vrot.slane %v6372_v36, 5  ;;  %v3696_v8 = vrot.slane %v3695_v49, 4  ;;  %v3760_v36 = vshll.u32 %v7507_v9, 16  ;;  %v7528_v21 = vsel %vm6832_vm7, %v5040_v54, %v1318_v23  ;;  %v7539_v2 = vld [vmem:[%s6580_s11 + $0x68] sm:$0x1] }
  0xe3   : > { %v3753_v49 = vrot.slane %v3751_v61, 4  ;;  %v3710_v19 = vrot.slane %v3709_v7, 4  ;;  %v5041_v58 = vrot.slane %v1194_v5, 9  ;;  %v3720_v3 = vrot.slane %v3719_v43, 4  ;;  %8438 = vst [vmem:[#allocation13_spill] sm:$0xff] %v7539_v2  ;;  %v6321_v5 = vld [vmem:[%s6580_s11 + $0xc0] sm:$0xff]  }
  0xe4   : > { %v3724_v54 = vrot.slane %v3722_v48, 5  ;;  %v3748_v63 = vrot.slane %v3746_v6, 5  ;;  %v1332_v61 = vrot.slane %v6974_v56, 5  ;;  %v3734_v10 = vrot.slane %v3733_v31, 4  ;;  %v1196_v31 = vld [vmem:[%s6580_s11 + $0xb4] sm:$0xe] }
  0xe5   : > { %v3744_v51 = vrot.slane %v3743_v53, 4  ;;  %v7541_v1 = vrot.slane %v3760_v36, 5  ;;  %v3766_v7 = vrot.slane %v3764_v62, 4  ;;  %v3691_v43 = vsel %vm6606_vm4, %v7509_v22, %v7449_v28  ;;  %v6375_v62 = vld [vmem:[%s6580_s11 + $0xb0] sm:$0x1] }
  0xe6   : > { %5886 = vmatmul.mubr.msk.bf16.gmra.mrb[20].mxu0 %vm675_vm3, %v6318_v26  ;;  %v1320_v26 = vrot.slane %v1318_v23, 4  ;;  %v1195_v23 = vld [vmem:[%s6580_s11 + $0xa8] sm:$0xe]  ;;  %v3701_v48 = vsel %vm6606_vm4, %v3696_v8, %v7503_v46  ;;  %v3757_v6 = vor.u32 %v3756_v4, %v3753_v49  ;;  %v3715_v53 = vsel %vm6606_vm4, %v3710_v19, %v7492_v34  ;;  %v5374_v46 = vld [vmem:[%s6580_s11 + $0x6c] sm:$0xf] }
  0xe7   : > { %5734 = vmatmul.mubr.msk.bf16.gmra.mrb[4].mxu1 %vm675_vm3, %v8436_v18  ;;  %5889 = vmatprep.mubr.msk.bf16.mxu0 %vm675_vm3, %v6319_v30  ;;  %v6374_v18 = vld [vmem:[%s6580_s11 + $0xa4] sm:$0x1]  ;;  %v7561_v36 = vsel %vm6832_vm7, %v5041_v58, %v1325_v25  ;;  %v5042_v28 = vrot.slane %v1195_v23, 9  ;;  %v1334_v8 = vrot.slane %v1332_v61, 4  ;;  %v3770_v49 = vshll.u32 %v7539_v2, 16 }
  0xe8   : > { %5737 = vmatprep.mubr.msk.bf16.mxu1 %vm675_vm3, %v8437_v27  ;;  %v1328_v30 = vrot.slane %v6374_v18, 5  ;;  %v7553_v56 = vsel %vm6832_vm7, %v1320_v26, %v1321_v33  ;;  %v3725_v33 = vsel %vm6606_vm4, %v3720_v3, %v3724_v54  ;;  %v1335_v26 = vrot.slane %v6375_v62, 5  ;;  %v5377_v18 = vld [vmem:[%s6580_s11 + $0x78] sm:$0xf]  ;;  %v7616_v54 = vld [vmem:[%s6580_s11 + $0xbc] sm:$0x1] }
  0xe9   : > { %v3739_v34 = vsel %vm6606_vm4, %v3734_v10, %v7501_v50  ;;  %v3749_v25 = vsel %vm6606_vm4, %v3744_v51, %v3748_v63  ;;  %v3767_v4 = vor.u32 %v3766_v7, %v7541_v1  ;;  %v5043_v27 = vrot.slane %v1196_v31, 9  ;;  %v7590_v51 = vld [vmem:[%s6580_s11 + $0x70] sm:$0xf]  ;;  %v7620_v10 = vld [vmem:[%s6580_s11 + $0x7c] sm:$0xf] }
  0xea   : > { %v7565_v22 = vsel %vm6832_vm7, %v1327_v52, %v1328_v30  ;;  %v8440_v3 = vcombine.low %v7283_v45, %v7287_v59  ;;  %v7586_v19 = vrot.slane %v3757_v6, 4  ;;  %v1339_v50 = vrot.slane %v6998_v42, 5  ;;  %8441 = vst [vmem:[#allocation15_spill] sm:$0xff] %v7590_v51  ;;  %8443 = vst [vmem:[#allocation16_spill] sm:$0xff] %v7620_v10  ;;  %v5380_v7 = vld [vmem:[%s6580_s11 + $0x84] sm:$0xf] }
  0xeb   : > { %8439 = vst [vmem:[#allocation14_spill] sm:$0xff] %v7565_v22  ;;  %v3775_v63 = vshrl.u32 %v5374_v46, 16  ;;  %v8442_v45 = vcombine.low %v7291_v47, %v7318_v41  ;;  %v7598_v58 = vcombine.low %v3715_v53, %v3725_v33  ;;  %v7604_v42 = vsel %vm6832_vm7, %v5042_v28, %v1332_v61  ;;  %v6322_v61 = vld [vmem:[%s6580_s11 + $0xcc] sm:$0xff]   ;;  %v7632_v31 = vld [vmem:[%s6580_s11 + $0x88] sm:$0xf] }
  0xec   : > { %v7607_v30 = vcombine.low %v3739_v34, %v3749_v25  ;;  %v7611_v47 = vsel %vm6832_vm7, %v1334_v8, %v1335_v26  ;;  %v7613_v41 = vrot.slane %v3770_v49, 5  ;;  %v3784_v6 = vshll.u32 %v7590_v51, 16  ;;  %8444 = vst [vmem:[#allocation17_spill] sm:$0xff] %v7632_v31  ;;  %v5383_v62 = vld [vmem:[%s6580_s11 + $0x90] sm:$0xf] }
  0xed   : > { %v7638_v28 = vrot.slane %v1339_v50, 4  ;;  %v7640_v33 = vrot.slane %v3775_v63, 4  ;;  %v3788_v8 = vshrl.u32 %v7590_v51, 16  ;;  %v3799_v26 = vshrl.u32 %v5377_v18, 16  ;;  %v7647_v25 = vld [vmem:[%s6580_s11 + $0x94] sm:$0xf] }
  0xee   : > { %5890 = vmatmul.mubr.msk.bf16.gmra.mrb[24].mxu0 %vm675_vm3, %v6320_v37  ;;  %v7584_v37 = vcombine.low %v3691_v43, %v3701_v48  ;;  %v7628_v43 = vsel %vm6832_vm7, %v5043_v27, %v1339_v50  ;;  %v3778_v48 = vshll.u32 %v5374_v46, 16  ;;  %v3802_v49 = vshll.u32 %v5377_v18, 16  ;;  %8445 = vst [vmem:[#allocation18_spill] sm:$0xff] %v7647_v25  ;;  %v7685_v2 = vld [vmem:[%s6580_s11 + $0x8c] sm:$0x1] }
  0xef   : > { %5738 = vmatmul.mubr.msk.bf16.gmra.mrb[8].mxu1 %vm675_vm3, %v8440_v3  ;;  %5893 = vmatprep.mubr.msk.bf16.mxu0 %vm675_vm3, %v6321_v5  ;;  %v7624_v5 = vrot.slane %v3767_v4, 4  ;;  %v3808_v46 = vshll.u32 %v7620_v10, 16  ;;  %v3812_v34 = vshrl.u32 %v7620_v10, 16  ;;  %v3823_v4 = vshrl.u32 %v5380_v7, 16 }
  0xf0   : > { %5741 = vmatprep.mubr.msk.bf16.mxu1 %vm675_vm3, %v8442_v45  ;;  %v3826_v27 = vshll.u32 %v5380_v7, 16  ;;  %v3832_v3 = vshll.u32 %v7632_v31, 16  ;;  %v3836_v50 = vshrl.u32 %v7632_v31, 16  ;;  %v7657_v45 = vld [vmem:[%s6580_s11 + $0x74] sm:$0x1]  ;;  %v3780_v18 = vrot.slane %v3778_v48, 5 }
  0xf1   : > { %v3847_v52 = vshrl.u32 %v5383_v62, 16  ;;  %v3850_v53 = vshll.u32 %v5383_v62, 16  ;;  %v8446_v7 = vcombine.low %v7302_v60, %v7327_v44  ;;  %v3790_v59 = vrot.slane %v3788_v8, 4  ;;  %v5386_v48 = vld [vmem:[%s6580_s11 + $0x9c] sm:$0xf] }
  0xf2   : > { %v3856_v63 = vshll.u32 %v7647_v25, 16  ;;  %v3860_v23 = vshrl.u32 %v7647_v25, 16  ;;  %v8447_v62 = vcombine.low %v7342_v17, %v7346_v57  ;;  %v7675_v44 = vld [vmem:[%s6580_s11 + $0x80] sm:$0x1]  ;;  %v3801_v60 = vrot.slane %v3799_v26, 4 }
  0xf3   : > { %8448 = vst [vmem:[#allocation19_spill] sm:$0xff] %v7675_v44  ;;  %v3825_v31 = vrot.slane %v3823_v4, 4  ;;  %v3828_v8 = vrot.slane %v3826_v27, 5  ;;  %v7679_v10 = vrot.slane %v3832_v3, 5  ;;  %v3838_v51 = vrot.slane %v3836_v50, 4 }
  0xf4   : > { %v7682_v25 = vld [vmem:[%s6580_s11 + $0xa0] sm:$0xf]  ;;  %v3849_v17 = vrot.slane %v3847_v52, 4  ;;  %v3852_v57 = vrot.slane %v3850_v53, 5  ;;  %v3874_v9 = vshll.u32 %v5386_v48, 16  ;;  %v3781_v26 = vor.u32 %v3780_v18, %v7640_v33 }
  0xf5   : > { %v3818_v27 = vshll.u32 %v7675_v44, 16  ;;  %v7694_v3 = vld [vmem:[%s6580_s11 + $0x98] sm:$0x1]  ;;  %v3880_v50 = vshll.u32 %v7682_v25, 16  ;;  %v3884_v52 = vshrl.u32 %v7682_v25, 16  ;;  %v3829_v22 = vor.u32 %v3828_v8, %v3825_v31 }
  0xf6   : > { %5894 = vmatmul.mubr.msk.bf16.gmra.mrb[28].mxu0 %vm675_vm3, %v6322_v61  ;;  %v7665_v61 = vrot.slane %v3784_v6, 5  ;;  %v3814_v6 = vrot.slane %v3812_v34, 4  ;;  %v3862_v34 = vrot.slane %v3860_v23, 4  ;;  %v3842_v33 = vshll.u32 %v7685_v2, 16 }
  0xf7   : > { %5742 = vmatmul.mubr.msk.bf16.gmra.mrb[12].mxu1 %vm675_vm3, %v8446_v7  ;;  %5899 = vmatprep.mubr.msk.bf16.mxu0 %vm675_vm3, %v7407_v20  ;;  %v3804_v7 = vrot.slane %v3802_v49, 5  ;;  %v7677_v20 = vrot.slane %v3808_v46, 5  ;;  %v3794_v49 = vshll.u32 %v7657_v45, 16  ;;  %v7689_v46 = vrot.slane %v3856_v63, 5 }
  0xf8   : > { %5745 = vmatprep.mubr.msk.bf16.mxu1 %vm675_vm3, %v8447_v62  ;;  %v3871_v62 = vshrl.u32 %v5386_v48, 16  ;;  %v3791_v4 = vor.u32 %v3790_v59, %v7665_v61  ;;  %v3839_v23 = vor.u32 %v3838_v51, %v7679_v10  ;;  %v3853_v59 = vor.u32 %v3852_v57, %v3849_v17  ;;  %v7727_v57 = vld [vmem:[%s6580_s11 + $0xa4] sm:$0x1] }
  0xf9   : > { %v3805_v53 = vor.u32 %v3804_v7, %v3801_v60  ;;  %v3815_v48 = vor.u32 %v3814_v6, %v7677_v20  ;;  %v3876_v18 = vrot.slane %v3874_v9, 5  ;;  %v8449_v44 = vcombine.low %v7354_v11, %v7358_v40 }
  0xfa   : > { %v3873_v63 = vrot.slane %v3871_v62, 4  ;;  %v8450_v31 = vrot.slane %v7616_v54, 5  ;;  %v3796_v51 = vrot.slane %v3794_v49, 5  ;;  %v3863_v60 = vor.u32 %v3862_v34, %v7689_v46  ;;  %v7730_v34 = vld [vmem:[%s6580_s11 + $0xac] sm:$0xf] }
  0xfb   : > { %v3866_v9 = vshll.u32 %v7694_v3, 16  ;;  %v8451_v11 = vcombine.low %v7426_v39, %v7430_v55  ;;  %v3782_v40 = vrot.slane %v3781_v26, 4  ;;  %v7723_v54 = vrot.slane %v3880_v50, 5 }
  0xfc   : > { %v3806_v7 = vrot.slane %v3805_v53, 4  ;;  %v3816_v6 = vrot.slane %v3815_v48, 4  ;;  %v3820_v8 = vrot.slane %v3818_v27, 5  ;;  %v3844_v17 = vrot.slane %v3842_v33, 5  ;;  %v7740_v48 = vld [vmem:[%s6580_s11 + $0xb0] sm:$0x1] }
  0xfd   : > { %v3830_v39 = vrot.slane %v3829_v22, 4  ;;  %v3840_v55 = vrot.slane %v3839_v23, 4  ;;  %v3854_v62 = vrot.slane %v3853_v59, 4  ;;  %v3877_v49 = vor.u32 %v3876_v18, %v3873_v63 }
  0xfe   : > { %5900 = vmatmul.mubr.msk.bf16.vlgmr.msra.gmra.mrb[0].mxu0 %vm675_vm3, %v7470_v16  ;;  %v7713_v16 = vsel %vm6832_vm7, %v7638_v28, %v8450_v31  ;;  %v3886_v28 = vrot.slane %v3884_v52, 4  ;;  %v3868_v26 = vrot.slane %v3866_v9, 5  ;;  %v3787_v52 = vsel %vm6606_vm4, %v3782_v40, %v7665_v61 }
  0xff   : > { %5746 = vmatmul.mubr.msk.bf16.gmra.mrb[16].mxu1 %vm675_vm3, %v8449_v44  ;;  %5932 = vmatpush3.bf16.msra.mxu0 %v7411_v14  ;;  %v3792_v14 = vrot.slane %v3791_v4, 4  ;;  %v5389_v44 = vld [vmem:[%s6580_s11 + $0xa8] sm:$0xf]  ;;  %v3890_v22 = vshll.u32 %v7727_v57, 16  ;;  %v3811_v33 = vsel %vm6606_vm4, %v3806_v7, %v7677_v20  ;;  %v3821_v23 = vsel %vm6606_vm4, %v3816_v6, %v3820_v8 }
 0x100   : > { %5749 = vmatprep.mubr.msk.bf16.mxu1 %vm675_vm3, %v8451_v11  ;;  %5903 = vmatprep.mubr.msk.bf16.mxu0 %vm675_vm3, %v7481_v29  ;;  %v3864_v29 = vrot.slane %v3863_v60, 4  ;;  %v3895_v4 = vshrl.u32 %v5389_v44, 16  ;;  %v3898_v50 = vshll.u32 %v5389_v44, 16  ;;  %v3887_v53 = vor.u32 %v3886_v28, %v7723_v54  ;;  %v5438_v11 = vld [vmem:[%s6580_s11 + $0x48] sm:$0xe] }
 0x101   : > { %v3797_v27 = vsel %vm6606_vm4, %v3792_v14, %v3796_v51  ;;  %v3904_v59 = vshll.u32 %v7730_v34, 16  ;;  %v3908_v61 = vshrl.u32 %v7730_v34, 16  ;;  %v3835_v63 = vsel %vm6606_vm4, %v3830_v39, %v7679_v10  ;;  %v7805_v39 = vld [vmem:[%s6580_s11 + $0xb8] sm:$0xf] }
 0x102   : > { %v3845_v18 = vsel %vm6606_vm4, %v3840_v55, %v3844_v17  ;;  %v3859_v20 = vsel %vm6606_vm4, %v3854_v62, %v7689_v46  ;;  %v3878_v31 = vrot.slane %v3877_v49, 4  ;;  %v8452_v51 = vcombine.low %v7443_v12, %v7458_v35 }
 0x103   : > { %v3897_v10 = vrot.slane %v3895_v4, 4  ;;  %v3900_v60 = vrot.slane %v3898_v50, 5  ;;  %v3914_v9 = vshll.u32 %v7740_v48, 16  ;;  %v8453_v46 = vcombine.low %v7528_v21, %v7553_v56  ;;  %v5392_v21 = vld [vmem:[%s6580_s11 + $0xb4] sm:$0xf] }
 0x104   : > { %v5059_v12 = vcombine.low %v7604_v42, %v7611_v47  ;;  %v8454_v35 = vsel %vm6606_vm4, %v7624_v5, %v7613_v41  ;;  %v3888_v14 = vrot.slane %v3887_v53, 4  ;;  %v3892_v28 = vrot.slane %v3890_v22, 5  ;;  %v5440_v4 = vld [vmem:[%s6580_s11 + $0x60] sm:$0xe]  ;;  %v5441_v53 = vld [vmem:[%s6580_s11 + $0x6c] sm:$0xe] }
 0x105   : > { %v5060_v56 = vcombine.low %v7628_v43, %v7713_v16  ;;  %v7788_v44 = vcombine.low %v3787_v52, %v3797_v27  ;;  %v7790_v42 = vrot.slane %v3904_v59, 5  ;;  %v3910_v47 = vrot.slane %v3908_v61, 4  ;;  %v8463_v16 = vld [vmem:[#allocation7_spill] sm:$0xff] }
 0x106   : > { %5904 = vmatmul.mubr.msk.bf16.gmra.mrb[4].mxu0 %vm675_vm3, %v7584_v37  ;;  %v3869_v37 = vsel %vm6606_vm4, %v3864_v29, %v3868_v26  ;;  %v7792_v41 = vcombine.low %v3811_v33, %v3821_v23  ;;  %v7794_v5 = vcombine.low %v3835_v63, %v3845_v18  ;;  %v3883_v6 = vsel %vm6606_vm4, %v3878_v31, %v7723_v54  ;;  %v8456_v23 = vld [vmem:[#allocation14_spill] sm:$0xff]  ;;  %v5395_v63 = vld [vmem:[%s6580_s11 + $0xc0] sm:$0xf]  ;;  %v8458_v18 = vld [vmem:[#allocation12_spill] sm:$0xff] }
 0x107   : > { %5750 = vmatmul.mubr.msk.bf16.gmra.mrb[20].mxu1 %vm675_vm3, %v8452_v51  ;;  %5907 = vmatprep.mubr.msk.bf16.mxu0 %vm675_vm3, %v7598_v58  ;;  %v8455_v58 = vsel %vm6606_vm4, %v7586_v19, %v7541_v1  ;;  %v7796_v7 = vcombine.low %v3859_v20, %v3869_v37  ;;  %v5454_v1 = vrot.slane %v5438_v11, 9  ;;  %v5439_v19 = vld [vmem:[%s6580_s11 + $0x54] sm:$0xe]  ;;  %v3901_v8 = vor.u32 %v3900_v60, %v3897_v10 }
 0x108   : > { %5753 = vmatprep.mubr.msk.bf16.mxu1 %vm675_vm3, %v8453_v46  ;;  %v5408_v40 = vcombine.low %v8455_v58, %v8454_v35  ;;  %v7802_v17 = vrot.slane %v3914_v9, 5  ;;  %v3919_v55 = vshrl.u32 %v5392_v21, 16  ;;  %v3893_v62 = vsel %vm6606_vm4, %v3888_v14, %v3892_v28  ;;  %v8459_v31 = vld [vmem:[#allocation13_spill] sm:$0xff]  ;;  %v8460_v9 = vld [vmem:[#allocation15_spill] sm:$0xff]  ;;  %v7854_v35 = vld [vmem:[%s6580_s11 + $0xbc] sm:$0x1] }
 0x109   : > { %v3922_v49 = vshll.u32 %v5392_v21, 16  ;;  %v4378_v29 = vrot.slane %v7436_v0, 5  ;;  %v4381_v26 = vrot.slane %v7490_v38, 5  ;;  %v3911_v50 = vor.u32 %v3910_v47, %v7790_v42  ;;  %v7857_v58 = vld [vmem:[%s6580_s11 + $0xc4] sm:$0xf] }
 0x10a   : > { %v5455_v52 = vrot.slane %v5439_v19, 9  ;;  %v4385_v54 = vrot.slane %v7447_v24, 5  ;;  %v4388_v27 = vrot.slane %v7499_v15, 5  ;;  %v3928_v22 = vshll.u32 %v7805_v39, 16  ;;  %v5442_v19 = vld [vmem:[%s6580_s11 + $0x78] sm:$0xe] }
 0x10b   : > { %v3932_v33 = vshrl.u32 %v7805_v39, 16  ;;  %v7822_v0 = vsel %vm6832_vm7, %v5454_v1, %v4378_v29  ;;  %v4380_v38 = vrot.slane %v4378_v29, 4  ;;  %v8457_v59 = vcombine.low %v7561_v36, %v8456_v23  ;;  %v8461_v23 = vld [vmem:[#allocation16_spill] sm:$0xff] }
 0x10c   : > { %v7829_v24 = vcombine.low %v3883_v6, %v3893_v62  ;;  %v7833_v15 = vsel %vm6832_vm7, %v5455_v52, %v4385_v54  ;;  %v5456_v61 = vrot.slane %v5440_v4, 9  ;;  %v4392_v20 = vrot.slane %v8458_v18, 5  ;;  %v6323_v6 = vld [vmem:[%s6580_s11 + $0xc] sm:$0xff]  }
 0x10d   : > { %v7839_v36 = vsel %vm6832_vm7, %v4380_v38, %v4381_v26  ;;  %v4395_v51 = vrot.slane %v8459_v31, 5  ;;  %v5457_v37 = vrot.slane %v5441_v53, 9  ;;  %v4399_v11 = vrot.slane %v8460_v9, 5 }
 0x10e   : > { %5908 = vmatmul.mubr.msk.bf16.gmra.mrb[8].mxu0 %vm675_vm3, %v7607_v30  ;;  %v4387_v30 = vrot.slane %v4385_v54, 4  ;;  %v5471_v10 = vcombine.low %v7822_v0, %v7839_v36  ;;  %v4402_v46 = vrot.slane %v7657_v45, 5  ;;  %v7863_v14 = vsel %vm6832_vm7, %v5456_v61, %v4392_v20 }
 0x10f   : > { %5754 = vmatmul.mubr.msk.bf16.gmra.mrb[24].mxu1 %vm675_vm3, %v8457_v59  ;;  %5911 = vmatprep.mubr.msk.bf16.mxu0 %vm675_vm3, %v5408_v40  ;;  %v4394_v28 = vrot.slane %v4392_v20, 4  ;;  %v7865_v21 = vrot.slane %v3919_v55, 4  ;;  %v3943_v47 = vshrl.u32 %v5395_v63, 16  ;;  %v7869_v45 = vsel %vm6832_vm7, %v5457_v37, %v4399_v11  ;;  %v5169_v55 = vld [vmem:[%s6580_s11 + $0x78] sm:$0xf]  ;;  %v8462_v59 = vld [vmem:[#allocation19_spill] sm:$0xff] }
 0x110   : > { %5757 = vmatprep.mubr.msk.bf16.mxu1 %vm675_vm3, %v5059_v12  ;;  %v7847_v60 = vsel %vm6832_vm7, %v4387_v30, %v4388_v27  ;;  %v7851_v12 = vrot.slane %v3901_v8, 4  ;;  %v4401_v1 = vrot.slane %v4399_v11, 4  ;;  %v7873_v8 = vrot.slane %v3911_v50, 4 }
 0x111   : > { %v5472_v40 = vcombine.low %v7833_v15, %v7847_v60  ;;  %v7875_v62 = vrot.slane %v3922_v49, 5  ;;  %v3946_v29 = vshll.u32 %v5395_v63, 16  ;;  %v7879_v26 = vsel %vm6832_vm7, %v4394_v28, %v4395_v51  ;;  %v8465_v28 = vld [vmem:[#allocation17_spill] sm:$0xff]  ;;  %v6386_v60 = vld [vmem:[%s6580_s11 + $0xa0] sm:$0xf] }
 0x112   : > { %v7882_v4 = vrot.slane %v3928_v22, 5  ;;  %v7884_v52 = vrot.slane %v3932_v33, 4  ;;  %v5473_v54 = vcombine.low %v7863_v14, %v7879_v26  ;;  %v7890_v27 = vsel %vm6832_vm7, %v4401_v1, %v4402_v46  ;;  %v5443_v33 = vld [vmem:[%s6580_s11 + $0x84] sm:$0xe]  ;;  %v6324_v1 = vld [vmem:[%s6580_s11 + $0x18] sm:$0xff]  }
 0x113   : > { %v3938_v49 = vshll.u32 %v7854_v35, 16  ;;  %v3952_v50 = vshll.u32 %v7857_v58, 16  ;;  %v5474_v53 = vcombine.low %v7869_v45, %v7890_v27  ;;  %v5458_v22 = vrot.slane %v5442_v19, 9  ;;  %v6390_v27 = vld [vmem:[%s6580_s11 + $0xac] sm:$0xf] }
 0x114   : > { %v3945_v38 = vrot.slane %v3943_v47, 4  ;;  %v4409_v30 = vrot.slane %v8462_v59, 5  ;;  %v2265_v61 = vshrl.u32 %v5169_v55, 16  ;;  %v3948_v63 = vrot.slane %v3946_v29, 5  ;;  %v5398_v29 = vld [vmem:[%s6580_s11 + $0xcc] sm:$0xf] }
 0x115   : > { %v3956_v18 = vshrl.u32 %v7857_v58, 16  ;;  %v2268_v43 = vshll.u32 %v5169_v55, 16  ;;  %v5459_v37 = vrot.slane %v5443_v33, 9  ;;  %v3907_v9 = vsel %vm6606_vm4, %v7851_v12, %v7790_v42  ;;  %v7933_v55 = vld [vmem:[%s6580_s11 + $0xd0] sm:$0xf] }
 0x116   : > { %5912 = vmatmul.mubr.msk.bf16.gmra.mrb[12].mxu0 %vm675_vm3, %v7788_v44  ;;  %v4406_v44 = vrot.slane %v8461_v23, 5  ;;  %v2267_v51 = vrot.slane %v2265_v61, 4  ;;  %v3925_v11 = vor.u32 %v7875_v62, %v7865_v21  ;;  %v4413_v47 = vrot.slane %v8465_v28, 5  ;;  %v6325_v21 = vld [vmem:[%s6580_s11 + $0x24] sm:$0xff]  }
 0x117   : > { %5758 = vmatmul.mubr.msk.bf16.gmra.mrb[28].mxu1 %vm675_vm3, %v5060_v56  ;;  %5915 = vmatprep.mubr.msk.bf16.mxu0 %vm675_vm3, %v7792_v41  ;;  %v8464_v56 = vld [vmem:[#allocation8_spill] sm:$0xff]  ;;  %v2270_v46 = vrot.slane %v2268_v43, 5  ;;  %v3917_v19 = vsel %vm6606_vm4, %v7873_v8, %v7802_v17  ;;  %v4416_v12 = vrot.slane %v7685_v2, 5  ;;  %v7941_v62 = vrot.slane %v3952_v50, 5  ;;  %v5444_v8 = vld [vmem:[%s6580_s11 + $0x90] sm:$0xe] }
 0x118   : > { %5763 = vmatprep.mubr.msk.bf16.mxu1 %vm675_vm3, %v6323_v6  ;;  %v2287_v41 = vsel %vm6606_vm4, %v8464_v56, %v8463_v16  ;;  %v7915_v20 = vsel %vm6832_vm7, %v5458_v22, %v4406_v44  ;;  %v4408_v31 = vrot.slane %v4406_v44, 4  ;;  %v3935_v6 = vor.u32 %v7884_v52, %v7882_v4  ;;  %v7947_v52 = vld [vmem:[%s6580_s11 + $0xc8] sm:$0x1]  ;;  %v8467_v16 = vld [vmem:[#allocation5_spill] sm:$0xff] }
 0x119   : > { %v3958_v22 = vrot.slane %v3956_v18, 4  ;;  %v2271_v17 = vor.u32 %v2270_v46, %v2267_v51  ;;  %v3940_v23 = vrot.slane %v3938_v49, 5  ;;  %v3949_v44 = vor.u32 %v3948_v63, %v3945_v38  ;;  %v8468_v51 = vld [vmem:[#allocation6_spill] sm:$0xff] }
 0x11a   : > { %v7937_v42 = vsel %vm6832_vm7, %v4408_v31, %v4409_v30  ;;  %v7951_v59 = vsel %vm6832_vm7, %v5459_v37, %v4413_v47  ;;  %v4415_v30 = vrot.slane %v4413_v47, 4  ;;  %v3967_v2 = vshrl.u32 %v5398_v29, 16 }
 0x11b   : > { %v5475_v33 = vcombine.low %v7915_v20, %v7937_v42  ;;  %v3970_v50 = vshll.u32 %v5398_v29, 16  ;;  %v3976_v61 = vshll.u32 %v7933_v55, 16  ;;  %v2272_v18 = vrot.slane %v2271_v17, 4  ;;  %v6326_v29 = vld [vmem:[%s6580_s11 + $0x30] sm:$0xff]  }
 0x11c   : > { %v3980_v49 = vshrl.u32 %v7933_v55, 16  ;;  %v7962_v38 = vsel %vm6832_vm7, %v4415_v30, %v4416_v12  ;;  %v5460_v63 = vrot.slane %v5444_v8, 9  ;;  %v3959_v56 = vor.u32 %v3958_v22, %v7941_v62 }
 0x11d   : > { %v3962_v31 = vshll.u32 %v7947_v52, 16  ;;  %v5476_v37 = vcombine.low %v7951_v59, %v7962_v38  ;;  %v5414_v46 = vcombine.low %v3907_v9, %v3917_v19  ;;  %v3926_v28 = vrot.slane %v3925_v11, 4  ;;  %v5445_v11 = vld [vmem:[%s6580_s11 + $0x9c] sm:$0xe] }
 0x11e   : > { %5916 = vmatmul.mubr.msk.bf16.gmra.mrb[16].mxu0 %vm675_vm3, %v7794_v5  ;;  %v8466_v5 = vld [vmem:[#allocation18_spill] sm:$0xff]  ;;  %v3936_v47 = vrot.slane %v3935_v6, 4  ;;  %v3950_v12 = vrot.slane %v3949_v44, 4  ;;  %v4423_v8 = vrot.slane %v7694_v3, 5  ;;  %v3969_v30 = vrot.slane %v3967_v2, 4 }
 0x11f   : > { %5764 = vmatmul.mubr.msk.bf16.vlgmr.msra.gmra.mrb[0].mxu1 %vm675_vm3, %v6324_v1  ;;  %5919 = vmatprep.mubr.msk.bf16.mxu0 %vm675_vm3, %v7796_v7  ;;  %v4420_v43 = vrot.slane %v8466_v5, 5  ;;  %v2277_v7 = vsel %vm6606_vm4, %v2272_v18, %v8468_v51  ;;  %v3972_v18 = vrot.slane %v3970_v50, 5  ;;  %v7985_v5 = vrot.slane %v3976_v61, 5  ;;  %v6327_v19 = vld [vmem:[%s6580_s11 + $0x3c] sm:$0xff]  }
 0x120   : > { %5966 = vmatpush3.bf16.msra.mxu1 %v8467_v16  ;;  %5767 = vmatprep.mubr.msk.bf16.mxu1 %vm675_vm3, %v6325_v21  ;;  %v7974_v1 = vcombine.low %v2277_v7, %v2287_v41  ;;  %v7978_v21 = vld [vmem:[%s6580_s11 + $0xd4] sm:$0x1]  ;;  %v3982_v9 = vrot.slane %v3980_v49, 4  ;;  %v3960_v41 = vrot.slane %v3959_v56, 4  ;;  %v3964_v6 = vrot.slane %v3962_v31, 5 }
 0x121   : > { %v7982_v22 = vsel %vm6832_vm7, %v5460_v63, %v4420_v43  ;;  %v4422_v17 = vrot.slane %v4420_v43, 4  ;;  %v3931_v63 = vsel %vm6606_vm4, %v3926_v28, %v7882_v4  ;;  %v3941_v2 = vsel %vm6606_vm4, %v3936_v47, %v3940_v23  ;;  %v6377_v16 = vld [vmem:[%s6580_s11 + $0x1c] sm:$0xf]  ;;  %v5446_v28 = vld [vmem:[%s6580_s11 + $0xa8] sm:$0xe] }
 0x122   : > { %v3986_v50 = vshll.u32 %v7978_v21, 16  ;;  %v5461_v61 = vrot.slane %v5445_v11, 9  ;;  %v4427_v49 = vrot.slane %v7682_v25, 5  ;;  %v3955_v4 = vsel %vm6606_vm4, %v3950_v12, %v7941_v62  ;;  %v5434_v62 = vld [vmem:[%s6580_s11 + $0x18] sm:$0xe]  ;;  %v6328_v47 = vld [vmem:[%s6580_s11 + $0x48] sm:$0xff]  }
 0x123   : > { %v7991_v44 = vsel %vm6832_vm7, %v4422_v17, %v4423_v8  ;;  %v3983_v43 = vor.u32 %v3982_v9, %v7985_v5  ;;  %v4430_v23 = vrot.slane %v7727_v57, 5  ;;  %v3965_v25 = vsel %vm6606_vm4, %v3960_v41, %v3964_v6  ;;  %v6378_v11 = vld [vmem:[%s6580_s11 + $0x20] sm:$0x1] }
 0x124   : > { %v5477_v3 = vcombine.low %v7982_v22, %v7991_v44  ;;  %v4350_v56 = vrot.slane %v6377_v16, 5  ;;  %v8017_v31 = vsel %vm6832_vm7, %v5461_v61, %v4427_v49  ;;  %v4429_v51 = vrot.slane %v4427_v49, 4  ;;  %v5447_v49 = vld [vmem:[%s6580_s11 + $0xb4] sm:$0xe] }
 0x125   : > { %v5415_v7 = vcombine.low %v3931_v63, %v3941_v2  ;;  %v3984_v17 = vrot.slane %v3983_v43, 4  ;;  %v5462_v41 = vrot.slane %v5446_v28, 9  ;;  %v4434_v6 = vrot.slane %v7730_v34, 5  ;;  %v5435_v2 = vld [vmem:[%s6580_s11 + $0x24] sm:$0xe] }
 0x126   : > { %5920 = vmatmul.mubr.msk.bf16.gmra.mrb[20].mxu0 %vm675_vm3, %v7829_v24  ;;  %v3973_v24 = vor.u32 %v3972_v18, %v3969_v30  ;;  %v8022_v57 = vsel %vm6832_vm7, %v4429_v51, %v4430_v23  ;;  %v6329_v30 = vld [vmem:[%s6580_s11 + $0x54] sm:$0xff]   ;;  %v5450_v18 = vrot.slane %v5434_v62, 9  ;;  %v4352_v9 = vrot.slane %v4350_v56, 4  ;;  %v6381_v28 = vld [vmem:[%s6580_s11 + $0x2c] sm:$0x1] }
 0x127   : > { %5768 = vmatmul.mubr.msk.bf16.gmra.mrb[4].mxu1 %vm675_vm3, %v6326_v29  ;;  %5923 = vmatprep.mubr.msk.bf16.mxu0 %vm675_vm3, %v5414_v46  ;;  %v3988_v46 = vrot.slane %v3986_v50, 5  ;;  %v5416_v29 = vcombine.low %v3955_v4, %v3965_v25  ;;  %v5478_v8 = vcombine.low %v8017_v31, %v8022_v57  ;;  %v4437_v63 = vrot.slane %v7740_v48, 5  ;;  %v6379_v50 = vld [vmem:[%s6580_s11 + $0x28] sm:$0xf]  ;;  %v5436_v25 = vld [vmem:[%s6580_s11 + $0x30] sm:$0xe] }
 0x128   : > { %5771 = vmatprep.mubr.msk.bf16.mxu1 %vm675_vm3, %v6327_v19  ;;  %v3974_v12 = vrot.slane %v3973_v24, 4  ;;  %v4353_v19 = vrot.slane %v6378_v11, 5  ;;  %v4357_v61 = vrot.slane %v6379_v50, 5  ;;  %v8045_v48 = vsel %vm6832_vm7, %v5462_v41, %v4434_v6  ;;  %v6331_v11 = vld [vmem:[%s6580_s11 + $0x6c] sm:$0xff]   ;;  %v5448_v50 = vld [vmem:[%s6580_s11 + $0xc0] sm:$0xe] }
 0x129   : > { %v3989_v34 = vsel %vm6606_vm4, %v3984_v17, %v3988_v46  ;;  %v4436_v24 = vrot.slane %v4434_v6, 4  ;;  %v4351_v43 = vsel %vm6832_vm7, %v5450_v18, %v4350_v56  ;;  %v5451_v51 = vrot.slane %v5435_v2, 9  ;;  %v8469_v41 = vld [vmem:[#allocation9_spill] sm:$0xff]  ;;  %v6395_v31 = vld [vmem:[%s6580_s11 + $0xc8] sm:$0x1] }
 0x12a   : > { %v3979_v4 = vsel %vm6606_vm4, %v3974_v12, %v7985_v5  ;;  %v4354_v23 = vsel %vm6832_vm7, %v4352_v9, %v4353_v19  ;;  %v6380_v5 = vld [vmem:[%s6580_s11 + $0x34] sm:$0xf]  ;;  %v6330_v12 = vld [vmem:[%s6580_s11 + $0x60] sm:$0xff]   ;;  %v5452_v18 = vrot.slane %v5436_v25, 9  ;;  %v4444_v9 = vrot.slane %v7854_v35, 5 }
 0x12b   : > { %v4364_v16 = vrot.slane %v6380_v5, 5  ;;  %v8056_v62 = vsel %vm6832_vm7, %v4436_v24, %v4437_v63  ;;  %v5417_v46 = vcombine.low %v3979_v4, %v3989_v34  ;;  %v5467_v17 = vcombine.low %v4351_v43, %v4354_v23  ;;  %v5437_v24 = vld [vmem:[%s6580_s11 + $0x3c] sm:$0xe] }
 0x12c   : > { %v5479_v56 = vcombine.low %v8045_v48, %v8056_v62  ;;  %v4367_v6 = vrot.slane %v8469_v41, 5  ;;  %v4358_v35 = vsel %vm6832_vm7, %v5451_v51, %v4357_v61  ;;  %v5464_v5 = vrot.slane %v5448_v50, 9 }
 0x12d   : > { %v4366_v19 = vrot.slane %v4364_v16, 4  ;;  %v4365_v23 = vsel %vm6832_vm7, %v5452_v18, %v4364_v16  ;;  %v4451_v51 = vrot.slane %v7947_v52, 5  ;;  %v2428_v57 = vshll.u32 %v6395_v31, 16 }
 0x12e   : > { %5924 = vmatmul.mubr.msk.bf16.gmra.mrb[24].mxu0 %vm675_vm3, %v5415_v7  ;;  %v5463_v7 = vrot.slane %v5447_v49, 9 }
 0x12f   : > { %5772 = vmatmul.mubr.msk.bf16.gmra.mrb[8].mxu1 %vm675_vm3, %v6328_v47  ;;  %5927 = vmatprep.mubr.msk.bf16.mxu0 %vm675_vm3, %v5416_v29  ;;  %v4360_v47 = vrot.slane %v6381_v28, 5  ;;  %v4441_v29 = vrot.slane %v7805_v39, 5  ;;  %v8470_v39 = vld [vmem:[#allocation10_spill] sm:$0xff]  ;;  %v4368_v25 = vsel %vm6832_vm7, %v4366_v19, %v4367_v6  ;;  %v5453_v28 = vrot.slane %v5437_v24, 9 }
 0x130   : > { %5775 = vmatprep.mubr.msk.bf16.mxu1 %vm675_vm3, %v6329_v30  ;;  %v4359_v30 = vrot.slane %v4357_v61, 4  ;;  %v4371_v49 = vrot.slane %v8470_v39, 5  ;;  %v4448_v61 = vrot.slane %v7857_v58, 5  ;;  %v6382_v39 = vld [vmem:[%s6580_s11 + $0x70] sm:$0xf]  ;;  %v4455_v24 = vrot.slane %v7933_v55, 5 }
 0x131   : > { %v8068_v63 = vsel %vm6832_vm7, %v5463_v7, %v4441_v29  ;;  %v4443_v2 = vrot.slane %v4441_v29, 4  ;;  %v5166_v7 = vld [vmem:[%s6580_s11 + $0x6c] sm:$0xf]  ;;  %v8471_v29 = vld [vmem:[#allocation11_spill] sm:$0xff] }
 0x132   : > { %v4361_v34 = vsel %vm6832_vm7, %v4359_v30, %v4360_v47  ;;  %v4373_v47 = vrot.slane %v4371_v49, 4  ;;  %v6332_v30 = vld [vmem:[%s6580_s11 + $0x78] sm:$0xff]   ;;  %v8099_v16 = vsel %vm6832_vm7, %v5464_v5, %v4448_v61  ;;  %v4450_v18 = vrot.slane %v4448_v61, 4 }
 0x133   : > { %v8075_v4 = vsel %vm6832_vm7, %v4443_v2, %v4444_v9  ;;  %v5469_v9 = vcombine.low %v4365_v23, %v4368_v25  ;;  %v2241_v19 = vshrl.u32 %v5166_v7, 16  ;;  %v2244_v41 = vshll.u32 %v5166_v7, 16 }
 0x134   : > { %v5480_v43 = vcombine.low %v8068_v63, %v8075_v4  ;;  %v8104_v58 = vsel %vm6832_vm7, %v4450_v18, %v4451_v51  ;;  %v4372_v6 = vsel %vm6832_vm7, %v5453_v28, %v4371_v49  ;;  %v4458_v49 = vrot.slane %v7978_v21, 5  ;;  %v6334_v51 = vld [vmem:[%s6580_s11 + $0x90] sm:$0xff]   ;;  %v6335_v21 = vld [vmem:[%s6580_s11 + $0x9c] sm:$0xff]  }
 0x135   : > { %v5481_v50 = vcombine.low %v8099_v16, %v8104_v58  ;;  %v2243_v23 = vrot.slane %v2241_v19, 4  ;;  %v2246_v25 = vrot.slane %v2244_v41, 5  ;;  %v4457_v7 = vrot.slane %v4455_v24, 4 }
 0x136   : > { %5928 = vmatmul.mubr.msk.bf16.gmra.mrb[28].mxu0 %vm675_vm3, %v5417_v46  ;;  %v5468_v46 = vcombine.low %v4358_v35, %v4361_v34  ;;  %v2250_v35 = vshll.u32 %v6382_v39, 16  ;;  %v2254_v34 = vshrl.u32 %v6382_v39, 16 }
 0x137   : > { %5776 = vmatmul.mubr.msk.bf16.gmra.mrb[12].mxu1 %vm675_vm3, %v6330_v12  ;;  %5933 = vmatprep.mubr.msk.bf16.mxu0 %vm675_vm3, %v5467_v17  ;;  %v4374_v12 = vrot.slane %v8471_v29, 5  ;;  %v5449_v17 = vld [vmem:[%s6580_s11 + $0xcc] sm:$0xe]  ;;  %v8126_v55 = vsel %vm6832_vm7, %v4457_v7, %v4458_v49 }
 0x138   : > { %5779 = vmatprep.mubr.msk.bf16.mxu1 %vm675_vm3, %v6331_v11  ;;  %v6333_v11 = vld [vmem:[%s6580_s11 + $0x84] sm:$0xff]   ;;  %v5465_v52 = vrot.slane %v5449_v17, 9  ;;  %v2256_v28 = vrot.slane %v2254_v34, 4  ;;  %v6383_v17 = vld [vmem:[%s6580_s11 + $0x74] sm:$0x1] }
 0x139   : > { %v4375_v2 = vsel %vm6832_vm7, %v4373_v47, %v4374_v12  ;;  %v5172_v47 = vld [vmem:[%s6580_s11 + $0x84] sm:$0xf]  ;;  %v2247_v12 = vor.u32 %v2246_v25, %v2243_v23  ;;  %v6337_v34 = vld [vmem:[%s6580_s11 + $0xb4] sm:$0xff]  }
 0x13a   : > { %v8121_v5 = vsel %vm6832_vm7, %v5465_v52, %v4455_v24  ;;  %v5470_v61 = vcombine.low %v4372_v6, %v4375_v2  ;;  %v2292_v18 = vshll.u32 %v5172_v47, 16  ;;  %v5175_v6 = vld [vmem:[%s6580_s11 + $0x90] sm:$0xf]  ;;  %v6336_v2 = vld [vmem:[%s6580_s11 + $0xa8] sm:$0xff]  }
 0x13b   : > { %v5482_v29 = vcombine.low %v8121_v5, %v8126_v55  ;;  %v2248_v52 = vrot.slane %v2247_v12, 4  ;;  %v2313_v23 = vshrl.u32 %v5175_v6, 16  ;;  %v2316_v25 = vshll.u32 %v5175_v6, 16 }
 0x13c   : > { %v2346_v12 = vshll.u32 %v6386_v60, 16 }
 0x13d   : > { %v2318_v14 = vrot.slane %v2316_v25, 5  ;;  %v6389_v25 = vld [vmem:[%s6580_s11 + $0xa4] sm:$0x1] }
 0x13e   : > { %5934 = vmatmul.mubr.msk.bf16.vlgmr.msra.gmra.mrb[0].mxu0 %vm675_vm3, %v5468_v46  ;;  %v2252_v46 = vrot.slane %v2250_v35, 5  ;;  %v5178_v35 = vld [vmem:[%s6580_s11 + $0x9c] sm:$0xf]  ;;  %v8168_v6 = vrot.slane %v2346_v12, 5 }
 0x13f   : > { %5780 = vmatmul.mubr.msk.bf16.gmra.mrb[16].mxu1 %vm675_vm3, %v6332_v30  ;;  %5937 = vmatprep.mubr.msk.bf16.mxu0 %vm675_vm3, %v5469_v9  ;;  %v2260_v30 = vshll.u32 %v6383_v17, 16  ;;  %v2289_v9 = vshrl.u32 %v5172_v47, 16  ;;  %v2340_v47 = vshll.u32 %v5178_v35, 16  ;;  %v6387_v17 = vld [vmem:[%s6580_s11 + $0x8c] sm:$0x1] }
 0x140   : > { %5783 = vmatprep.mubr.msk.bf16.mxu1 %vm675_vm3, %v6333_v11  ;;  %v2257_v13 = vor.u32 %v2256_v28, %v2252_v46  ;;  %v6384_v11 = vld [vmem:[%s6580_s11 + $0x88] sm:$0xf]  ;;  %v2253_v7 = vsel %vm6606_vm4, %v2248_v52, %v2252_v46 }
 0x141   : > { %v2298_v19 = vshll.u32 %v6384_v11, 16  ;;  %v2302_v41 = vshrl.u32 %v6384_v11, 16  ;;  %v2262_v0 = vrot.slane %v2260_v30, 5  ;;  %v2291_v36 = vrot.slane %v2289_v9, 4 }
 0x142   : > { %v2258_v39 = vrot.slane %v2257_v13, 4  ;;  %v2308_v30 = vshll.u32 %v6387_v17, 16  ;;  %v2315_v9 = vrot.slane %v2313_v23, 4  ;;  %v2342_v11 = vrot.slane %v2340_v47, 5 }
 0x143   : > { %v8145_v24 = vrot.slane %v2298_v19, 5  ;;  %v2304_v49 = vrot.slane %v2302_v41, 4  ;;  %v6338_v19 = vld [vmem:[%s6580_s11 + $0xc0] sm:$0xff]  }
 0x144   : > { %v2263_v46 = vsel %vm6606_vm4, %v2258_v39, %v2262_v0  ;;  %v5181_v39 = vld [vmem:[%s6580_s11 + $0xa8] sm:$0xf] }
 0x145   : > { %v2305_v13 = vor.u32 %v2304_v49, %v8145_v24  ;;  %v5199_v41 = vcombine.low %v2253_v7, %v2263_v46  ;;  %v2356_v7 = vshll.u32 %v6389_v25, 16  ;;  %v2364_v45 = vshll.u32 %v5181_v39, 16 }
 0x146   : > { %5938 = vmatmul.mubr.msk.bf16.gmra.mrb[4].mxu0 %vm675_vm3, %v5470_v61  ;;  %v6385_v61 = vld [vmem:[%s6580_s11 + $0x94] sm:$0xf] }
 0x147   : > { %5784 = vmatmul.mubr.msk.bf16.gmra.mrb[20].mxu1 %vm675_vm3, %v6334_v51  ;;  %5941 = vmatprep.mubr.msk.bf16.mxu0 %vm675_vm3, %v5471_v10  ;;  %v2294_v10 = vrot.slane %v2292_v18, 5  ;;  %v2322_v51 = vshll.u32 %v6385_v61, 16  ;;  %v2326_v28 = vshrl.u32 %v6385_v61, 16  ;;  %v2306_v0 = vrot.slane %v2305_v13, 4 }
 0x148   : > { %5787 = vmatprep.mubr.msk.bf16.mxu1 %vm675_vm3, %v6335_v21  ;;  %v2337_v21 = vshrl.u32 %v5178_v35, 16  ;;  %v6388_v35 = vld [vmem:[%s6580_s11 + $0x98] sm:$0x1]  ;;  %v2361_v61 = vshrl.u32 %v5181_v39, 16  ;;  %v5187_v39 = vld [vmem:[%s6580_s11 + $0xc0] sm:$0xf] }
 0x149   : > { %v2295_v15 = vor.u32 %v2294_v10, %v2291_v36  ;;  %v8165_v26 = vrot.slane %v2322_v51, 5  ;;  %v2310_v36 = vrot.slane %v2308_v30, 5  ;;  %v2319_v10 = vor.u32 %v2318_v14, %v2315_v9  ;;  %v5184_v51 = vld [vmem:[%s6580_s11 + $0xb4] sm:$0xf] }
 0x14a   : > { %v2339_v18 = vrot.slane %v2337_v21, 4  ;;  %v2374_v21 = vshrl.u32 %v6390_v27, 16  ;;  %v2385_v20 = vshrl.u32 %v5184_v51, 16  ;;  %v2388_v42 = vshll.u32 %v5184_v51, 16 }
 0x14b   : > { %v2296_v52 = vrot.slane %v2295_v15, 4  ;;  %v2311_v46 = vsel %vm6606_vm4, %v2306_v0, %v2310_v36  ;;  %v2320_v15 = vrot.slane %v2319_v10, 4  ;;  %v2358_v30 = vrot.slane %v2356_v7, 5 }
 0x14c   : > { %v2343_v23 = vor.u32 %v2342_v11, %v2339_v18  ;;  %v2363_v9 = vrot.slane %v2361_v61, 4  ;;  %v2376_v11 = vrot.slane %v2374_v21, 4  ;;  %v6394_v61 = vld [vmem:[%s6580_s11 + $0xbc] sm:$0x1] }
 0x14d   : > { %v2301_v47 = vsel %vm6606_vm4, %v2296_v52, %v8145_v24  ;;  %v2325_v0 = vsel %vm6606_vm4, %v2320_v15, %v8165_v26  ;;  %v2404_v22 = vshll.u32 %v6394_v61, 16 }
 0x14e   : > { %5942 = vmatmul.mubr.msk.bf16.gmra.mrb[8].mxu0 %vm675_vm3, %v5472_v40  ;;  %v2350_v40 = vshrl.u32 %v6386_v60, 16  ;;  %v2344_v17 = vrot.slane %v2343_v23, 4  ;;  %v5201_v24 = vcombine.low %v2301_v47, %v2311_v46 }
 0x14f   : > { %5788 = vmatmul.mubr.msk.bf16.gmra.mrb[24].mxu1 %vm675_vm3, %v6336_v2  ;;  %5945 = vmatprep.mubr.msk.bf16.mxu0 %vm675_vm3, %v5473_v54  ;;  %v2328_v54 = vrot.slane %v2326_v28, 4 }
 0x150   : > { %5791 = vmatprep.mubr.msk.bf16.mxu1 %vm675_vm3, %v6337_v34  ;;  %v2352_v2 = vrot.slane %v2350_v40, 4  ;;  %v2332_v34 = vshll.u32 %v6388_v35, 16  ;;  %v2349_v10 = vsel %vm6606_vm4, %v2344_v17, %v8168_v6  ;;  %v2430_v17 = vrot.slane %v2428_v57, 5 }
 0x151   : > { %v2329_v49 = vor.u32 %v2328_v54, %v8165_v26  ;;  %v2366_v54 = vrot.slane %v2364_v45, 5  ;;  %v6392_v26 = vld [vmem:[%s6580_s11 + $0xb0] sm:$0x1] }
 0x152   : > { %v2353_v28 = vor.u32 %v2352_v2, %v8168_v6  ;;  %v2334_v60 = vrot.slane %v2332_v34, 5  ;;  %v2380_v35 = vshll.u32 %v6392_v26, 16  ;;  %v2409_v34 = vshrl.u32 %v5187_v39, 16 }
 0x153   : > { %v2330_v13 = vrot.slane %v2329_v49, 4  ;;  %v2367_v38 = vor.u32 %v2366_v54, %v2363_v9  ;;  %v2412_v6 = vshll.u32 %v5187_v39, 16  ;;  %v6393_v49 = vld [vmem:[%s6580_s11 + $0xc4] sm:$0xf] }
 0x154   : > { %v2354_v14 = vrot.slane %v2353_v28, 4  ;;  %v2418_v23 = vshll.u32 %v6393_v49, 16  ;;  %v2422_v25 = vshrl.u32 %v6393_v49, 16  ;;  %v2382_v45 = vrot.slane %v2380_v35, 5 }
 0x155   : > { %v2335_v36 = vsel %vm6606_vm4, %v2330_v13, %v2334_v60  ;;  %v2368_v51 = vrot.slane %v2367_v38, 4  ;;  %v2406_v60 = vrot.slane %v2404_v22, 5 }
 0x156   : > { %5946 = vmatmul.mubr.msk.bf16.gmra.mrb[12].mxu0 %vm675_vm3, %v5474_v53  ;;  %v2370_v53 = vshll.u32 %v6390_v27, 16  ;;  %v2359_v59 = vsel %vm6606_vm4, %v2354_v14, %v2358_v30  ;;  %v5202_v44 = vcombine.low %v2325_v0, %v2335_v36  ;;  %v2411_v27 = vrot.slane %v2409_v34, 4 }
 0x157   : > { %5792 = vmatmul.mubr.msk.bf16.gmra.mrb[28].mxu1 %vm675_vm3, %v6338_v19  ;;  %5949 = vmatprep.mubr.msk.bf16.mxu0 %vm675_vm3, %v5475_v33  ;;  %v6391_v33 = vld [vmem:[%s6580_s11 + $0xb8] sm:$0xf]  ;;  %v2387_v19 = vrot.slane %v2385_v20, 4  ;;  %v2420_v21 = vrot.slane %v2418_v23, 5  ;;  %v2424_v47 = vrot.slane %v2422_v25, 4 }
 0x158   : > { %5813 = vmatprep.mubr.msk.bf16.mxu1 %vm675_vm3, %v5199_v41  ;;  %v2394_v12 = vshll.u32 %v6391_v33, 16  ;;  %v2398_v40 = vshrl.u32 %v6391_v33, 16  ;;  %v2372_v18 = vrot.slane %v2370_v53, 5  ;;  %v2390_v41 = vrot.slane %v2388_v42, 5 }
 0x159   : > { %v2414_v53 = vrot.slane %v2412_v6, 5 }
 0x15a   : > { %v2396_v52 = vrot.slane %v2394_v12, 5  ;;  %v2400_v2 = vrot.slane %v2398_v40, 4  ;;  %v2373_v20 = vsel %vm6606_vm4, %v2368_v51, %v2372_v18  ;;  %v2425_v12 = vor.u32 %v2424_v47, %v2420_v21 }
 0x15b   : > { %v2415_v33 = vor.u32 %v2414_v53, %v2411_v27 }
 0x15c   : > { %v2401_v7 = vor.u32 %v2400_v2, %v2396_v52  ;;  %v2426_v13 = vrot.slane %v2425_v12, 4  ;;  %v8268_v2 = vld [vmem:[%s8401_s2] ss:$0 sm:$0xff] }
 0x15d   : > { %v2416_v40 = vrot.slane %v2415_v33, 4 }
 0x15e   : > { %5950 = vmatmul.mubr.msk.bf16.gmra.mrb[16].mxu0 %vm675_vm3, %v5476_v37  ;;  %v2377_v37 = vor.u32 %v2376_v11, %v2372_v18  ;;  %v2402_v15 = vrot.slane %v2401_v7, 4  ;;  %v2431_v9 = vsel %vm6606_vm4, %v2426_v13, %v2430_v17 }
 0x15f   : > { %5814 = vmatmul.mubr.msk.bf16.vlgmr.msra.gmra.mrb[16].mxu1 %vm675_vm3, %v7974_v1  ;;  %5953 = vmatprep.mubr.msk.bf16.mxu0 %vm675_vm3, %v5477_v3  ;;  %v2391_v1 = vor.u32 %v2390_v41, %v2387_v19  ;;  %v5203_v3 = vcombine.low %v2349_v10, %v2359_v59  ;;  %v2421_v30 = vsel %vm6606_vm4, %v2416_v40, %v2420_v21 }
 0x160   : > { %5817 = vmatprep.mubr.msk.bf16.mxu1 %vm675_vm3, %v5201_v24  ;;  %v2378_v28 = vrot.slane %v2377_v37, 4  ;;  %v2407_v48 = vsel %vm6606_vm4, %v2402_v15, %v2406_v60  ;;  %v5206_v14 = vcombine.low %v2421_v30, %v2431_v9 }
 0x161   : > { %v2392_v46 = vrot.slane %v2391_v1, 4 }
 0x162   : > { %v2383_v42 = vsel %vm6606_vm4, %v2378_v28, %v2382_v45 }
 0x163   : > { %v5204_v62 = vcombine.low %v2373_v20, %v2383_v42 }
 0x166   : > { %5954 = vmatmul.mubr.msk.bf16.gmra.mrb[20].mxu0 %vm675_vm3, %v5478_v8  ;;  %v2397_v8 = vsel %vm6606_vm4, %v2392_v46, %v2396_v52 }
 0x167   : > { %5818 = vmatmul.mubr.msk.bf16.gmra.mrb[20].mxu1 %vm675_vm3, %v5202_v44  ;;  %5957 = vmatprep.mubr.msk.bf16.mxu0 %vm675_vm3, %v5479_v56  ;;  %v5205_v56 = vcombine.low %v2397_v8, %v2407_v48 }
 0x168   : > { %5821 = vmatprep.mubr.msk.bf16.mxu1 %vm675_vm3, %v5203_v3 }
 0x16e   : > { %5958 = vmatmul.mubr.msk.bf16.gmra.mrb[24].mxu0 %vm675_vm3, %v5480_v43 }
 0x16f   : > { %5822 = vmatmul.mubr.msk.bf16.gmra.mrb[24].mxu1 %vm675_vm3, %v5204_v62  ;;  %5961 = vmatprep.mubr.msk.bf16.mxu0 %vm675_vm3, %v5481_v50 }
 0x170   : > { %5825 = vmatprep.mubr.msk.bf16.mxu1 %vm675_vm3, %v5205_v56 }
 0x176   : > { %5962 = vmatmul.mubr.msk.bf16.gmra.mrb[28].mxu0 %vm675_vm3, %v5482_v29 }
 0x177   : > { %5826 = vmatmul.mubr.msk.bf16.gmra.mrb[28].mxu1 %vm675_vm3, %v5206_v14 }
 0x1f2   : > { %v5765_v63 = vpop.f32.mrb[0].mxu1 }
 0x1f3   : > { %v1841_v4 = vpop.f32.mrb[1].mxu1 }
 0x1f4   : > { %v5766_v43 = vpop.f32.mrb[2].mxu1 }
 0x1f5   : > { %v1844_v16 = vpop.f32.mrb[3].mxu1 }
 0x1fa   : > { %v5769_v58 = vpop.f32.mrb[4].mxu1 }
 0x1fb   : > { %v1857_v50 = vpop.f32.mrb[5].mxu1 }
 0x1fc   : > { %v5770_v54 = vpop.f32.mrb[6].mxu1 }
 0x1fd   : > { %v1860_v18 = vpop.f32.mrb[7].mxu1 }
 0x202   : > { %v5773_v32 = vpop.f32.mrb[8].mxu1 }
 0x203   : > { %v1873_v11 = vpop.f32.mrb[9].mxu1 }
 0x204   : > { %v5774_v24 = vpop.f32.mrb[10].mxu1 }
 0x205   : > { %v1876_v19 = vpop.f32.mrb[11].mxu1 }
 0x20a   : > { %v8256_v41 = vpop.f32.mrb[12].mxu1 }
 0x20b   : > { %v8258_v5 = vpop.f32.mrb[13].mxu1 }
 0x20c   : > { %v8260_v55 = vpop.f32.mrb[14].mxu1 }
 0x20d   : > { %v8262_v29 = vpop.f32.mrb[15].mxu1 }
 0x211   : > { %v5935_v52 = vpop.f32.mrb[0].mxu0 }
 0x212   : > { %v5967_v39 = vadd.f32 %v5935_v52, %v5765_v63  ;;  %v4595_v0 = vpop.f32.mrb[1].mxu0 }
 0x213   : > { %v5968_v36 = vadd.f32 %v4595_v0, %v1841_v4  ;;  %v5936_v10 = vpop.f32.mrb[2].mxu0 }
 0x214   : > { %v4763_v59 = vadd.f32 %v5967_v39, %v8268_v2  ;;  %v5969_v38 = vadd.f32 %v5936_v10, %v5766_v43  ;;  %v4598_v37 = vpop.f32.mrb[3].mxu0 }
 0x215   : > { %v4761_v26 = vadd.f32 %v5968_v36, %v8268_v2  ;;  %v5970_v35 = vadd.f32 %v4598_v37, %v1844_v16 }
 0x216   : > { %v4795_v34 = vmax.f32 %v4763_v59, 0.0  ;;  %v4764_v6 = vadd.f32 %v5969_v38, %v8268_v2 }
 0x217   : > { %v4793_v49 = vmax.f32 %v4761_v26, 0.0  ;;  %v4762_v23 = vadd.f32 %v5970_v35, %v8268_v2 }
 0x218   : > { %4827 = vst [vmem:[%s8276_s19 + $0x10] sm:$0xff] %v4795_v34  ;;  %v4796_v25 = vmax.f32 %v4764_v6, 0.0 }
 0x219   : > { %4825 = vst [vmem:[%s8276_s19] sm:$0xff] %v4793_v49  ;;  %v4794_v1 = vmax.f32 %v4762_v23, 0.0  ;;  %v5939_v7 = vpop.f32.mrb[4].mxu0 }
 0x21a   : > { %4828 = vst [vmem:[%s8276_s19 + $0x18] sm:$0xff] %v4796_v25  ;;  %v5971_v61 = vadd.f32 %v5939_v7, %v5769_v58  ;;  %v4611_v22 = vpop.f32.mrb[5].mxu0 }
 0x21b   : > { %4826 = vst [vmem:[%s8276_s19 + $0x8] sm:$0xff] %v4794_v1  ;;  %v5972_v44 = vadd.f32 %v4611_v22, %v1857_v50  ;;  %v5940_v3 = vpop.f32.mrb[6].mxu0 }
 0x21c   : > { %v4767_v51 = vadd.f32 %v5971_v61, %v8268_v2  ;;  %v5973_v28 = vadd.f32 %v5940_v3, %v5770_v54  ;;  %v4614_v45 = vpop.f32.mrb[7].mxu0 }
 0x21d   : > { %v4765_v27 = vadd.f32 %v5972_v44, %v8268_v2  ;;  %v5974_v53 = vadd.f32 %v4614_v45, %v1860_v18 }
 0x21e   : > { %v4799_v21 = vmax.f32 %v4767_v51, 0.0  ;;  %v4768_v47 = vadd.f32 %v5973_v28, %v8268_v2 }
 0x21f   : > { %v4797_v46 = vmax.f32 %v4765_v27, 0.0  ;;  %v4766_v15 = vadd.f32 %v5974_v53, %v8268_v2 }
 0x220   : > { %4831 = vst [vmem:[%s8276_s19 + $0x30] sm:$0xff] %v4799_v21  ;;  %v4800_v60 = vmax.f32 %v4768_v47, 0.0 }
 0x221   : > { %4829 = vst [vmem:[%s8276_s19 + $0x20] sm:$0xff] %v4797_v46  ;;  %v4798_v20 = vmax.f32 %v4766_v15, 0.0  ;;  %v5943_v42 = vpop.f32.mrb[8].mxu0 }
 0x222   : > { %4832 = vst [vmem:[%s8276_s19 + $0x38] sm:$0xff] %v4800_v60  ;;  %v5975_v33 = vadd.f32 %v5943_v42, %v5773_v32  ;;  %v4627_v12 = vpop.f32.mrb[9].mxu0 }
 0x223   : > { %4830 = vst [vmem:[%s8276_s19 + $0x28] sm:$0xff] %v4798_v20  ;;  %v5976_v31 = vadd.f32 %v4627_v12, %v1873_v11  ;;  %v5944_v57 = vpop.f32.mrb[10].mxu0 }
 0x224   : > { %v4771_v8 = vadd.f32 %v5975_v33, %v8268_v2  ;;  %v5977_v48 = vadd.f32 %v5944_v57, %v5774_v24  ;;  %v4630_v62 = vpop.f32.mrb[11].mxu0 }
 0x225   : > { %v4769_v56 = vadd.f32 %v5976_v31, %v8268_v2  ;;  %v5978_v40 = vadd.f32 %v4630_v62, %v1876_v19 }
 0x226   : > { %v4803_v13 = vmax.f32 %v4771_v8, 0.0  ;;  %v4772_v17 = vadd.f32 %v5977_v48, %v8268_v2 }
 0x227   : > { %v4801_v30 = vmax.f32 %v4769_v56, 0.0  ;;  %v4770_v9 = vadd.f32 %v5978_v40, %v8268_v2 }
 0x228   : > { %4835 = vst [vmem:[%s8276_s19 + $0x50] sm:$0xff] %v4803_v13  ;;  %v4804_v14 = vmax.f32 %v4772_v17, 0.0 }
 0x229   : > { %4833 = vst [vmem:[%s8276_s19 + $0x40] sm:$0xff] %v4801_v30  ;;  %v4802_v63 = vmax.f32 %v4770_v9, 0.0  ;;  %v5947_v4 = vpop.f32.mrb[12].mxu0 }
 0x22a   : > { %4836 = vst [vmem:[%s8276_s19 + $0x58] sm:$0xff] %v4804_v14  ;;  %v5979_v43 = vadd.f32 %v5947_v4, %v8256_v41  ;;  %v4643_v16 = vpop.f32.mrb[13].mxu0 }
 0x22b   : > { %4834 = vst [vmem:[%s8276_s19 + $0x48] sm:$0xff] %v4802_v63  ;;  %v5980_v58 = vadd.f32 %v4643_v16, %v8258_v5  ;;  %v5948_v50 = vpop.f32.mrb[14].mxu0 }
 0x22c   : > { %v4775_v54 = vadd.f32 %v5979_v43, %v8268_v2  ;;  %v5981_v18 = vadd.f32 %v5948_v50, %v8260_v55  ;;  %v4646_v32 = vpop.f32.mrb[15].mxu0 }
 0x22d   : > { %v4773_v11 = vadd.f32 %v5980_v58, %v8268_v2  ;;  %v5982_v24 = vadd.f32 %v4646_v32, %v8262_v29 }
 0x22e   : > { %v4807_v19 = vmax.f32 %v4775_v54, 0.0  ;;  %v4776_v41 = vadd.f32 %v5981_v18, %v8268_v2 }
 0x22f   : > { %v4805_v52 = vmax.f32 %v4773_v11, 0.0  ;;  %v4774_v39 = vadd.f32 %v5982_v24, %v8268_v2 }
 0x230   : > { %4839 = vst [vmem:[%s8276_s19 + $0x70] sm:$0xff] %v4807_v19  ;;  %v4808_v5 = vmax.f32 %v4776_v41, 0.0 }
 0x231   : > { %4837 = vst [vmem:[%s8276_s19 + $0x60] sm:$0xff] %v4805_v52  ;;  %v4806_v0 = vmax.f32 %v4774_v39, 0.0  ;;  %v5951_v36 = vpop.f32.mrb[16].mxu0 }
 0x232   : > { %4840 = vst [vmem:[%s8276_s19 + $0x78] sm:$0xff] %v4808_v5  ;;  %v5815_v10 = vpop.f32.mrb[16].mxu1  ;;  %v4659_v55 = vpop.f32.mrb[17].mxu0 }
 0x233   : > { %4838 = vst [vmem:[%s8276_s19 + $0x68] sm:$0xff] %v4806_v0  ;;  %v5983_v59 = vadd.f32 %v5951_v36, %v5815_v10  ;;  %v2631_v38 = vpop.f32.mrb[17].mxu1  ;;  %v5952_v37 = vpop.f32.mrb[18].mxu0 }
 0x234   : > { %v5984_v29 = vadd.f32 %v4659_v55, %v2631_v38  ;;  %v5816_v26 = vpop.f32.mrb[18].mxu1  ;;  %v4662_v35 = vpop.f32.mrb[19].mxu0 }
 0x235   : > { %v4779_v34 = vadd.f32 %v5983_v59, %v8268_v2  ;;  %v5985_v6 = vadd.f32 %v5952_v37, %v5816_v26  ;;  %v2634_v49 = vpop.f32.mrb[19].mxu1 }
 0x236   : > { %v4777_v23 = vadd.f32 %v5984_v29, %v8268_v2  ;;  %v5986_v25 = vadd.f32 %v4662_v35, %v2634_v49 }
 0x237   : > { %v4811_v1 = vmax.f32 %v4779_v34, 0.0  ;;  %v4780_v7 = vadd.f32 %v5985_v6, %v8268_v2 }
 0x238   : > { %v4809_v61 = vmax.f32 %v4777_v23, 0.0  ;;  %v4778_v22 = vadd.f32 %v5986_v25, %v8268_v2 }
 0x239   : > { %4843 = vst [vmem:[%s8276_s19 + $0x90] sm:$0xff] %v4811_v1  ;;  %v4812_v44 = vmax.f32 %v4780_v7, 0.0  ;;  %v5955_v3 = vpop.f32.mrb[20].mxu0 }
 0x23a   : > { %4841 = vst [vmem:[%s8276_s19 + $0x80] sm:$0xff] %v4809_v61  ;;  %v4810_v51 = vmax.f32 %v4778_v22, 0.0  ;;  %v5819_v28 = vpop.f32.mrb[20].mxu1  ;;  %v4675_v45 = vpop.f32.mrb[21].mxu0 }
 0x23b   : > { %4844 = vst [vmem:[%s8276_s19 + $0x98] sm:$0xff] %v4812_v44  ;;  %v5987_v27 = vadd.f32 %v5955_v3, %v5819_v28  ;;  %v2647_v53 = vpop.f32.mrb[21].mxu1  ;;  %v5956_v21 = vpop.f32.mrb[22].mxu0 }
 0x23c   : > { %4842 = vst [vmem:[%s8276_s19 + $0x88] sm:$0xff] %v4810_v51  ;;  %v5988_v47 = vadd.f32 %v4675_v45, %v2647_v53  ;;  %v5820_v46 = vpop.f32.mrb[22].mxu1  ;;  %v4678_v15 = vpop.f32.mrb[23].mxu0 }
 0x23d   : > { %v4783_v60 = vadd.f32 %v5987_v27, %v8268_v2  ;;  %v5989_v20 = vadd.f32 %v5956_v21, %v5820_v46  ;;  %v2650_v42 = vpop.f32.mrb[23].mxu1 }
 0x23e   : > { %v4781_v33 = vadd.f32 %v5988_v47, %v8268_v2  ;;  %v5990_v12 = vadd.f32 %v4678_v15, %v2650_v42 }
 0x23f   : > { %v4815_v31 = vmax.f32 %v4783_v60, 0.0  ;;  %v4784_v57 = vadd.f32 %v5989_v20, %v8268_v2 }
 0x240   : > { %v4813_v8 = vmax.f32 %v4781_v33, 0.0  ;;  %v4782_v48 = vadd.f32 %v5990_v12, %v8268_v2 }
 0x241   : > { %4847 = vst [vmem:[%s8276_s19 + $0xb0] sm:$0xff] %v4815_v31  ;;  %v4816_v62 = vmax.f32 %v4784_v57, 0.0  ;;  %v5959_v56 = vpop.f32.mrb[24].mxu0 }
 0x242   : > { %4845 = vst [vmem:[%s8276_s19 + $0xa0] sm:$0xff] %v4813_v8  ;;  %v4814_v40 = vmax.f32 %v4782_v48, 0.0  ;;  %v5823_v13 = vpop.f32.mrb[24].mxu1  ;;  %v4691_v17 = vpop.f32.mrb[25].mxu0 }
 0x243   : > { %4848 = vst [vmem:[%s8276_s19 + $0xb8] sm:$0xff] %v4816_v62  ;;  %v5991_v30 = vadd.f32 %v5959_v56, %v5823_v13  ;;  %v2663_v9 = vpop.f32.mrb[25].mxu1  ;;  %v5960_v14 = vpop.f32.mrb[26].mxu0 }
 0x244   : > { %4846 = vst [vmem:[%s8276_s19 + $0xa8] sm:$0xff] %v4814_v40  ;;  %v5992_v63 = vadd.f32 %v4691_v17, %v2663_v9  ;;  %v5824_v4 = vpop.f32.mrb[26].mxu1  ;;  %v4694_v43 = vpop.f32.mrb[27].mxu0 }
 0x245   : > { %v4787_v16 = vadd.f32 %v5991_v30, %v8268_v2  ;;  %v5993_v58 = vadd.f32 %v5960_v14, %v5824_v4  ;;  %v2666_v50 = vpop.f32.mrb[27].mxu1 }
 0x246   : > { %v4785_v54 = vadd.f32 %v5992_v63, %v8268_v2  ;;  %v5994_v18 = vadd.f32 %v4694_v43, %v2666_v50 }
 0x247   : > { %v4819_v32 = vmax.f32 %v4787_v16, 0.0  ;;  %v4788_v11 = vadd.f32 %v5993_v58, %v8268_v2 }
 0x248   : > { %v4817_v24 = vmax.f32 %v4785_v54, 0.0  ;;  %v4786_v19 = vadd.f32 %v5994_v18, %v8268_v2 }
 0x249   : > { %4851 = vst [vmem:[%s8276_s19 + $0xd0] sm:$0xff] %v4819_v32  ;;  %v4820_v41 = vmax.f32 %v4788_v11, 0.0  ;;  %v5963_v52 = vpop.f32.mrb[28].mxu0 }
 0x24a   : > { %4849 = vst [vmem:[%s8276_s19 + $0xc0] sm:$0xff] %v4817_v24  ;;  %v4818_v39 = vmax.f32 %v4786_v19, 0.0  ;;  %v5827_v5 = vpop.f32.mrb[28].mxu1  ;;  %v4707_v0 = vpop.f32.mrb[29].mxu0 }
 0x24b   : > { %4852 = vst [vmem:[%s8276_s19 + $0xd8] sm:$0xff] %v4820_v41  ;;  %v5995_v36 = vadd.f32 %v5963_v52, %v5827_v5  ;;  %v2679_v10 = vpop.f32.mrb[29].mxu1  ;;  %v5964_v55 = vpop.f32.mrb[30].mxu0 }
 0x24c   : > { %4850 = vst [vmem:[%s8276_s19 + $0xc8] sm:$0xff] %v4818_v39  ;;  %v5996_v59 = vadd.f32 %v4707_v0, %v2679_v10  ;;  %v5828_v38 = vpop.f32.mrb[30].mxu1  ;;  %v4710_v37 = vpop.f32.mrb[31].mxu0 }
 0x24d   : > { %v4791_v29 = vadd.f32 %v5995_v36, %v8268_v2  ;;  %v5997_v26 = vadd.f32 %v5964_v55, %v5828_v38  ;;  %v2682_v35 = vpop.f32.mrb[31].mxu1 }
 0x24e   : > { %v4789_v34 = vadd.f32 %v5996_v59, %v8268_v2  ;;  %v5998_v6 = vadd.f32 %v4710_v37, %v2682_v35 }
 0x24f   : > { %v4823_v49 = vmax.f32 %v4791_v29, 0.0  ;;  %v4792_v23 = vadd.f32 %v5997_v26, %v8268_v2 }
 0x250   : > { %v4821_v25 = vmax.f32 %v4789_v34, 0.0  ;;  %v4790_v1 = vadd.f32 %v5998_v6, %v8268_v2 }
 0x251   : > { %4855 = vst [vmem:[%s8276_s19 + $0xf0] sm:$0xff] %v4823_v49  ;;  %v4824_v7 = vmax.f32 %v4792_v23, 0.0 }
 0x252   : > { %4853 = vst [vmem:[%s8276_s19 + $0xe0] sm:$0xff] %v4821_v25  ;;  %v4822_v61 = vmax.f32 %v4790_v1, 0.0 }
 0x253   : > { %4856 = vst [vmem:[%s8276_s19 + $0xf8] sm:$0xff] %v4824_v7 }
 0x254   : > { %4854 = vst [vmem:[%s8276_s19 + $0xe8] sm:$0xff] %v4822_v61 }
 0x255   : > { %6409 = shalt.err (!%p6406_p5)
}
 0x256   : > { %s6410_s6 = scalar_lea.hbm %s8344_s28, 4096  ;;  %s6414_s9 = scalar_lea.hbm %s8402_s3, 8192 }
 0x257   : > { %p6411_p6 = scmp.ne.s32.totalorder %s8344_s28, %s6410_s6  ;;  %p6415_p10 = scmp.lt.u32.totalorder %s8344_s28, %s8402_s3 }
 0x258   : > { %p6416_p11 = scmp.lt.u32.totalorder %s6414_s9, %s6410_s6  ;;  %p6418_p13 = scmp.lt.u32.totalorder %s6410_s6, %s8344_s28 }
 0x259   : > { %p6412_p7 = pnand %p6411_p6, %p6539_p4 }
 0x25a   : > { %p6417_p12 = por %p6416_p11, %p6415_p10 }
 0x25b   : > { %p6413_p9 = pneg %p6412_p7 }
 0x25c   : > { %p6419_p0 = por %p6418_p13, %p6417_p12 }
 0x25e   : > { %p6420_p1 = pnand %p6419_p0, %p6413_p9 }
 0x260   : > { %6423 = shalt.err (!%p6420_p1)
}
 0x261   : > { %s6477_s18 = smov 128   ;;  %s6478_s19 = smov 8  }
 0x262   : > { %6234 = dma.vmem_to_hbm [thread:$0]  (%p6539_p4), %s8346_s23, 4096, %s8344_s28, %s8353_s15, %s6477_s18, %s6477_s18, %s6478_s19  }
 0x263 PF: > { %p6240_p2 = scmp.ge.s32.totalorder %s6474_s17, 2  ;;  %s4888_s21 = sand.u32 1, %s6454_s12  }
 0x264   : > { %s4889_s26 = scalar_lea.sflag [#allocation3], %s4888_s21 }
 0x265   : > { %p6237_p3 = pnand %p6240_p2, %p6546_p8 }
 0x267   : > { %6449 = dma.done.wait (!%p6237_p3), %s4889_s26, 4096  }
 0x268   : > { %6451 = vsyncadd (!%p6237_p3), %s4889_s26, 4294963200  ;;  %s16_s17 = sadd.s32 1, %s6474_s17   ;;  %s8472_s12 = smov %s6458_s13 }
 0x269   : > { %p13_p5 = scmp.ge.s32.totalorder %s16_s17, 4   ;;  %s8473_s13 = smov %s6462_s14 }
 0x26a   : > { %s8474_s14 = smov %s6552_s25  ;;  %s8475_s15 = smov %s6470_s16 }
 0x26b   : > { %s8476_s16 = smov %s8478_s20  ;;  %15 = sbr.rel (!%p13_p5) target bundleno = 4 (0x4), region = 78 }
 0x272   :  { %4894 = vsyncpa [#allocation3], 1 }
 0x273   :  { %4896 = vsyncpa [#allocation3 + $0x1], 1 }

</bundles_post_ra>
